<compile_context>
chip_gen: v7x
topology: tpu7x:2x2x1
jax: 0.10.0
libtpu: 0.0.40
codegen_flags: <defaults>
</compile_context>

<pallas_src>
import math

import jax
import jax.numpy as jnp
from jax import lax
from jax.experimental import pallas as pl
from jax.experimental.pallas import tpu as pltpu

# ---------------- config (small synthetic BERT) ----------------
VOCAB = 100
SEQ = 8
HIDDEN = 128          # bert-base uses 768; scaled down
N_HEADS = 4
HEAD_DIM = HIDDEN // N_HEADS
FFN = 256             # bert-base uses 3072
N_LAYERS = 2          # bert-base uses 12
LABELS = 4
BATCH = 2
BS = BATCH * SEQ      # flattened token count (MXU M dimension)
LANE = 128            # lane-dense padding for the classifier output
LN_EPS = 1e-12        # BERT LayerNorm eps
ATTN_SCALE = 1.0 / math.sqrt(HEAD_DIM)


def _layernorm(x, g, b):
    mu = jnp.mean(x, axis=-1, keepdims=True)
    var = jnp.mean((x - mu) ** 2, axis=-1, keepdims=True)
    return (x - mu) * lax.rsqrt(var + LN_EPS) * g + b


# ---------------- the fused forward kernel (single invocation) ----------------
def fused_bert_kernel(emb_ref, embln_ref, wqkv_ref, bqkv_ref, wo_ref, vec_ref,
                      w1_ref, b1_ref, w2_ref, cw_ref, cb_ref, out_ref):
    # Embedding LayerNorm.
    embln = embln_ref[...]                                   # (2, H): [gamma; beta]
    x = _layernorm(emb_ref[...], embln[0:1, :], embln[1:2, :])   # (B*S, H) f32

    # Encoder layers, unrolled in Python (all weights VMEM-resident).
    for l in range(N_LAYERS):
        vec = vec_ref[l]          # (6, H): [bo, ln1_g, ln1_b, b2, ln2_g, ln2_b]
        xb = x.astype(jnp.bfloat16)

        # Fused QKV projection: one (B*S,128)x(128,384) bf16 MXU dot, f32 acc.
        # ATTN_SCALE is pre-folded into the Q columns of wqkv at init time.
        qkv = jnp.dot(xb, wqkv_ref[l],
                      preferred_element_type=jnp.float32) + bqkv_ref[l]
        q = qkv[:, 0 * HIDDEN:1 * HIDDEN]                    # 128-lane-aligned slices
        k = qkv[:, 1 * HIDDEN:2 * HIDDEN]
        v = qkv[:, 2 * HIDDEN:3 * HIDDEN]

        # Attention, batched over batch; bf16 MXU operands, f32 accumulate.
        ctx_heads = []
        for h in range(N_HEADS):
            c0 = h * HEAD_DIM
            qh = q[:, c0:c0 + HEAD_DIM].reshape(BATCH, SEQ, HEAD_DIM).astype(jnp.bfloat16)
            kh = k[:, c0:c0 + HEAD_DIM].reshape(BATCH, SEQ, HEAD_DIM).astype(jnp.bfloat16)
            vh = v[:, c0:c0 + HEAD_DIM].reshape(BATCH, SEQ, HEAD_DIM).astype(jnp.bfloat16)
            s = jnp.einsum('bqd,bkd->bqk', qh, kh,
                           preferred_element_type=jnp.float32)     # (B, S, S) f32
            s = s - jnp.max(s, axis=-1, keepdims=True)
            p = jnp.exp(s)
            p = p * pl.reciprocal(jnp.sum(p, axis=-1, keepdims=True), approx=True)
            ch = jnp.einsum('bqk,bkd->bqd', p.astype(jnp.bfloat16), vh,
                            preferred_element_type=jnp.float32)     # (B, S, hd) f32
            ctx_heads.append(ch.reshape(BS, HEAD_DIM))
        ctx = jnp.concatenate(ctx_heads, axis=-1)            # (B*S, H) f32, in regs

        # Attention output projection + residual + LayerNorm.
        attn = jnp.dot(ctx.astype(jnp.bfloat16), wo_ref[l],
                       preferred_element_type=jnp.float32) + vec[0:1, :]
        x1 = _layernorm(x + attn, vec[1:2, :], vec[2:3, :])

        # Feed-forward.
        # TODO(synk): exact-erf GELU of HF BERT replaced by tanh approximation.
        h1 = jnp.dot(x1.astype(jnp.bfloat16), w1_ref[l],
                     preferred_element_type=jnp.float32) + b1_ref[l]
        h1 = jax.nn.gelu(h1, approximate=True)
        ffn = jnp.dot(h1.astype(jnp.bfloat16), w2_ref[l],
                      preferred_element_type=jnp.float32) + vec[3:4, :]
        x = _layernorm(x1 + ffn, vec[4:5, :], vec[5:6, :])

    # Mean-pool over seq + classifier (lane-dense padded output slab).
    pooled = jnp.mean(x.reshape(BATCH, SEQ, HIDDEN), axis=1)      # (B, H)
    out_ref[...] = jnp.dot(pooled.astype(jnp.bfloat16), cw_ref[...],
                           preferred_element_type=jnp.float32) + cb_ref[...]


def fused_forward_call(emb_flat, params):
    arrays = [
        emb_flat,             # (B*S, H) f32
        params["emb_ln"],     # (2, H) f32
        params["wqkv"],       # (L, H, 3H) bf16
        params["bqkv"],       # (L, 1, 3H) f32
        params["wo"],         # (L, H, H) bf16
        params["vecs"],       # (L, 6, H) f32
        params["w1"],         # (L, H, FFN) bf16
        params["b1"],         # (L, 1, FFN) f32
        params["w2"],         # (L, FFN, H) bf16
        params["cls_w"],      # (H, LANE) bf16
        params["cls_b"],      # (1, LANE) f32
    ]
    vmem = pltpu.MemorySpace.VMEM
    return pl.pallas_call(
        fused_bert_kernel,
        out_shape=jax.ShapeDtypeStruct((BATCH, LANE), jnp.float32),
        in_specs=[pl.BlockSpec(memory_space=vmem) for _ in arrays],
        out_specs=pl.BlockSpec(memory_space=vmem),
    )(*arrays)


# ---------------- parameter init (deterministic, BERT-style, packed) ----------------
def init_params(key):
    keys = iter(jax.random.split(key, 12))

    def nrm(shape, scale=0.02):
        return scale * jax.random.normal(next(keys), shape, dtype=jnp.float32)

    # Fused QKV weight; ATTN_SCALE folded into the Q columns at init (the Q bias
    # is zero, so folding into the weight alone is exact here).
    wq = nrm((N_LAYERS, HIDDEN, HIDDEN)) * ATTN_SCALE
    wk = nrm((N_LAYERS, HIDDEN, HIDDEN))
    wv = nrm((N_LAYERS, HIDDEN, HIDDEN))
    wqkv = jnp.concatenate([wq, wk, wv], axis=-1).astype(jnp.bfloat16)
    bqkv = jnp.zeros((N_LAYERS, 1, 3 * HIDDEN), jnp.float32)

    # Packed per-layer H-wide vectors: [bo, ln1_g, ln1_b, b2, ln2_g, ln2_b].
    zeros_h = jnp.zeros((N_LAYERS, HIDDEN), jnp.float32)
    ones_h = jnp.ones((N_LAYERS, HIDDEN), jnp.float32)
    vecs = jnp.stack([zeros_h, ones_h, zeros_h, zeros_h, ones_h, zeros_h], axis=1)

    cls_w = jnp.zeros((HIDDEN, LANE), jnp.float32)
    cls_w = cls_w.at[:, :LABELS].set(nrm((HIDDEN, LABELS)))

    emb_ln = jnp.concatenate([jnp.ones((1, HIDDEN), jnp.float32),
                              jnp.zeros((1, HIDDEN), jnp.float32)], axis=0)

    return {
        "word_emb": nrm((VOCAB, HIDDEN)),
        "pos_emb": nrm((SEQ, HIDDEN)),
        "type_emb": nrm((2, HIDDEN)),
        "emb_ln": emb_ln,
        # matmul weights stored bf16 (bf16-native MXU, f32 accumulate in-kernel);
        # biases / LN params stay f32 (elementwise path stays f32, v5e-safe).
        "wqkv": wqkv,
        "bqkv": bqkv,
        "wo": nrm((N_LAYERS, HIDDEN, HIDDEN)).astype(jnp.bfloat16),
        "vecs": vecs,
        "w1": nrm((N_LAYERS, HIDDEN, FFN)).astype(jnp.bfloat16),
        "b1": jnp.zeros((N_LAYERS, 1, FFN), jnp.float32),
        "w2": nrm((N_LAYERS, FFN, HIDDEN)).astype(jnp.bfloat16),
        "cls_w": cls_w.astype(jnp.bfloat16),
        "cls_b": jnp.zeros((1, LANE), jnp.float32),
    }


# ---------------- full forward (== BERTFast.forward) ----------------
def bert_fast_forward(input_ids, params):
    B, S = input_ids.shape
    # Embedding gather (glue in plain JAX): word + position + token-type(=0).
    emb = (params["word_emb"][input_ids]
           + params["pos_emb"][None, :S, :]
           + params["type_emb"][None, 0:1, :])
    emb_flat = emb.reshape(B * S, HIDDEN).astype(jnp.float32)

    logits_padded = fused_forward_call(emb_flat, params)     # (B, 128) lane-dense
    return logits_padded[:, :LABELS]                         # (B, label_size)


if __name__ == "__main__":
    key = jax.random.PRNGKey(0)
    pkey, dkey = jax.random.split(key)
    params = init_params(pkey)
    content = jax.random.randint(dkey, (BATCH, SEQ), 0, VOCAB, dtype=jnp.int32)

    fwd = jax.jit(bert_fast_forward)
    logits = jax.block_until_ready(fwd(content, params))
    assert logits.shape == (BATCH, LABELS), logits.shape
    assert bool(jnp.all(jnp.isfinite(logits)))
    print("KERNEL_OK")
</pallas_src>

<mosaic_0001>
module attributes {stable_mosaic.version = 11 : i64} {
  func.func @fused_bert_kernel(%arg0: memref<16x128xf32, #tpu.memory_space<vmem>>, %arg1: memref<2x128xf32, #tpu.memory_space<vmem>>, %arg2: memref<2x128x384xbf16, #tpu.memory_space<vmem>>, %arg3: memref<2x1x384xf32, #tpu.memory_space<vmem>>, %arg4: memref<2x128x128xbf16, #tpu.memory_space<vmem>>, %arg5: memref<2x6x128xf32, #tpu.memory_space<vmem>>, %arg6: memref<2x128x256xbf16, #tpu.memory_space<vmem>>, %arg7: memref<2x1x256xf32, #tpu.memory_space<vmem>>, %arg8: memref<2x256x128xbf16, #tpu.memory_space<vmem>>, %arg9: memref<128x128xbf16, #tpu.memory_space<vmem>>, %arg10: memref<1x128xf32, #tpu.memory_space<vmem>>, %arg11: memref<2x128xf32, #tpu.memory_space<vmem>>) attributes {dimension_semantics = [], scalar_prefetch = 0 : i64, scratch_operands = 0 : i64, tpu.core_type = #tpu.core_type<tc>} {
    %c0 = arith.constant 0 : index
    %c0_0 = arith.constant 0 : index
    %0 = vector.load %arg1[%c0, %c0_0] : memref<2x128xf32, #tpu.memory_space<vmem>>, vector<2x128xf32>
    %c0_1 = arith.constant 0 : index
    %c0_2 = arith.constant 0 : index
    %1 = vector.load %arg0[%c0_1, %c0_2] : memref<16x128xf32, #tpu.memory_space<vmem>>, vector<16x128xf32>
    %2 = vector.extract_strided_slice %0 {offsets = [0, 0], sizes = [1, 128], strides = [1, 1]} : vector<2x128xf32> to vector<1x128xf32>
    %3 = vector.extract_strided_slice %0 {offsets = [1, 0], sizes = [1, 128], strides = [1, 1]} : vector<2x128xf32> to vector<1x128xf32>
    %cst = arith.constant dense<0.000000e+00> : vector<16xf32>
    %4 = vector.multi_reduction <add>, %1, %cst [1] : vector<16x128xf32> to vector<16xf32>
    %5 = vector.shape_cast %4 : vector<16xf32> to vector<16x1xf32>
    %cst_3 = arith.constant 1.280000e+02 : f32
    %6 = vector.broadcast %cst_3 : f32 to vector<16x1xf32>
    %7 = arith.divf %5, %6 : vector<16x1xf32>
    %8 = vector.broadcast %7 : vector<16x1xf32> to vector<16x128xf32>
    %9 = arith.subf %1, %8 : vector<16x128xf32>
    %10 = arith.mulf %9, %9 : vector<16x128xf32>
    %cst_4 = arith.constant dense<0.000000e+00> : vector<16xf32>
    %11 = vector.multi_reduction <add>, %10, %cst_4 [1] : vector<16x128xf32> to vector<16xf32>
    %12 = vector.shape_cast %11 : vector<16xf32> to vector<16x1xf32>
    %cst_5 = arith.constant 1.280000e+02 : f32
    %13 = vector.broadcast %cst_5 : f32 to vector<16x1xf32>
    %14 = arith.divf %12, %13 : vector<16x1xf32>
    %15 = vector.broadcast %7 : vector<16x1xf32> to vector<16x128xf32>
    %16 = arith.subf %1, %15 : vector<16x128xf32>
    %cst_6 = arith.constant 9.99999996E-13 : f32
    %17 = vector.broadcast %cst_6 : f32 to vector<16x1xf32>
    %18 = arith.addf %14, %17 : vector<16x1xf32>
    %19 = math.rsqrt %18 : vector<16x1xf32>
    %20 = vector.broadcast %19 : vector<16x1xf32> to vector<16x128xf32>
    %21 = arith.mulf %16, %20 : vector<16x128xf32>
    %22 = vector.broadcast %2 : vector<1x128xf32> to vector<16x128xf32>
    %23 = arith.mulf %21, %22 : vector<16x128xf32>
    %24 = vector.broadcast %3 : vector<1x128xf32> to vector<16x128xf32>
    %25 = arith.addf %23, %24 : vector<16x128xf32>
    %c0_7 = arith.constant 0 : index
    %c0_8 = arith.constant 0 : index
    %c0_9 = arith.constant 0 : index
    %26 = vector.load %arg5[%c0_7, %c0_8, %c0_9] : memref<2x6x128xf32, #tpu.memory_space<vmem>>, vector<1x6x128xf32>
    %27 = vector.shape_cast %26 : vector<1x6x128xf32> to vector<6x128xf32>
    %28 = arith.truncf %25 : vector<16x128xf32> to vector<16x128xbf16>
    %c0_10 = arith.constant 0 : index
    %c0_11 = arith.constant 0 : index
    %c0_12 = arith.constant 0 : index
    %29 = vector.load %arg2[%c0_10, %c0_11, %c0_12] : memref<2x128x384xbf16, #tpu.memory_space<vmem>>, vector<1x128x384xbf16>
    %30 = vector.shape_cast %29 : vector<1x128x384xbf16> to vector<128x384xbf16>
    %cst_13 = arith.constant dense<0.000000e+00> : vector<16x384xf32>
    %31 = tpu.matmul %28, %30, %cst_13 {dimension_numbers = #tpu.dot_dimension_numbers<[1], [0], [0], [1], [0, 0, 1, 1], [], []>} : vector<16x128xbf16>, vector<128x384xbf16>, vector<16x384xf32> -> vector<16x384xf32>
    %c0_14 = arith.constant 0 : index
    %c0_15 = arith.constant 0 : index
    %c0_16 = arith.constant 0 : index
    %32 = vector.load %arg3[%c0_14, %c0_15, %c0_16] : memref<2x1x384xf32, #tpu.memory_space<vmem>>, vector<1x1x384xf32>
    %33 = vector.shape_cast %32 : vector<1x1x384xf32> to vector<1x384xf32>
    %34 = vector.broadcast %33 : vector<1x384xf32> to vector<16x384xf32>
    %35 = arith.addf %31, %34 : vector<16x384xf32>
    %36 = vector.extract_strided_slice %35 {offsets = [0, 0], sizes = [16, 128], strides = [1, 1]} : vector<16x384xf32> to vector<16x128xf32>
    %37 = vector.extract_strided_slice %35 {offsets = [0, 128], sizes = [16, 128], strides = [1, 1]} : vector<16x384xf32> to vector<16x128xf32>
    %38 = vector.extract_strided_slice %35 {offsets = [0, 256], sizes = [16, 128], strides = [1, 1]} : vector<16x384xf32> to vector<16x128xf32>
    %39 = vector.extract_strided_slice %36 {offsets = [0, 0], sizes = [16, 32], strides = [1, 1]} : vector<16x128xf32> to vector<16x32xf32>
    %40 = vector.shape_cast %39 : vector<16x32xf32> to vector<2x8x32xf32>
    %41 = arith.truncf %40 : vector<2x8x32xf32> to vector<2x8x32xbf16>
    %42 = vector.extract_strided_slice %37 {offsets = [0, 0], sizes = [16, 32], strides = [1, 1]} : vector<16x128xf32> to vector<16x32xf32>
    %43 = vector.shape_cast %42 : vector<16x32xf32> to vector<2x8x32xf32>
    %44 = arith.truncf %43 : vector<2x8x32xf32> to vector<2x8x32xbf16>
    %45 = vector.extract_strided_slice %38 {offsets = [0, 0], sizes = [16, 32], strides = [1, 1]} : vector<16x128xf32> to vector<16x32xf32>
    %46 = vector.shape_cast %45 : vector<16x32xf32> to vector<2x8x32xf32>
    %47 = arith.truncf %46 : vector<2x8x32xf32> to vector<2x8x32xbf16>
    "tpu.trace_start"() <{level = 10 : i32, message = "bqd,bkd->bqk"}> : () -> ()
    %cst_17 = arith.constant dense<0.000000e+00> : vector<2x8x8xf32>
    %48 = tpu.matmul %41, %44, %cst_17 {dimension_numbers = #tpu.dot_dimension_numbers<[2], [2], [1], [1], [0, 0, 0, 1, 1, 1], [0], [0]>} : vector<2x8x32xbf16>, vector<2x8x32xbf16>, vector<2x8x8xf32> -> vector<2x8x8xf32>
    "tpu.trace_stop"() : () -> ()
    %cst_18 = arith.constant dense<0xFF800000> : vector<2x8xf32>
    %49 = vector.multi_reduction <maximumf>, %48, %cst_18 [2] : vector<2x8x8xf32> to vector<2x8xf32>
    %50 = vector.shape_cast %49 : vector<2x8xf32> to vector<2x8x1xf32>
    %51 = vector.broadcast %50 : vector<2x8x1xf32> to vector<2x8x8xf32>
    %52 = arith.subf %48, %51 : vector<2x8x8xf32>
    %53 = math.exp %52 : vector<2x8x8xf32>
    %cst_19 = arith.constant dense<0.000000e+00> : vector<2x8xf32>
    %54 = vector.multi_reduction <add>, %53, %cst_19 [2] : vector<2x8x8xf32> to vector<2x8xf32>
    %55 = vector.shape_cast %54 : vector<2x8xf32> to vector<2x8x1xf32>
    %56 = tpu.reciprocal %55 {approx = true} : vector<2x8x1xf32> -> vector<2x8x1xf32>
    %57 = vector.broadcast %56 : vector<2x8x1xf32> to vector<2x8x8xf32>
    %58 = arith.mulf %53, %57 : vector<2x8x8xf32>
    %59 = arith.truncf %58 : vector<2x8x8xf32> to vector<2x8x8xbf16>
    "tpu.trace_start"() <{level = 10 : i32, message = "bqk,bkd->bqd"}> : () -> ()
    %cst_20 = arith.constant dense<0.000000e+00> : vector<2x8x32xf32>
    %60 = tpu.matmul %59, %47, %cst_20 {dimension_numbers = #tpu.dot_dimension_numbers<[2], [1], [1], [2], [0, 0, 0, 1, 1, 2], [0], [0]>} : vector<2x8x8xbf16>, vector<2x8x32xbf16>, vector<2x8x32xf32> -> vector<2x8x32xf32>
    "tpu.trace_stop"() : () -> ()
    %61 = vector.shape_cast %60 : vector<2x8x32xf32> to vector<16x32xf32>
    %62 = vector.extract_strided_slice %36 {offsets = [0, 32], sizes = [16, 32], strides = [1, 1]} : vector<16x128xf32> to vector<16x32xf32>
    %63 = vector.shape_cast %62 : vector<16x32xf32> to vector<2x8x32xf32>
    %64 = arith.truncf %63 : vector<2x8x32xf32> to vector<2x8x32xbf16>
    %65 = vector.extract_strided_slice %37 {offsets = [0, 32], sizes = [16, 32], strides = [1, 1]} : vector<16x128xf32> to vector<16x32xf32>
    %66 = vector.shape_cast %65 : vector<16x32xf32> to vector<2x8x32xf32>
    %67 = arith.truncf %66 : vector<2x8x32xf32> to vector<2x8x32xbf16>
    %68 = vector.extract_strided_slice %38 {offsets = [0, 32], sizes = [16, 32], strides = [1, 1]} : vector<16x128xf32> to vector<16x32xf32>
    %69 = vector.shape_cast %68 : vector<16x32xf32> to vector<2x8x32xf32>
    %70 = arith.truncf %69 : vector<2x8x32xf32> to vector<2x8x32xbf16>
    "tpu.trace_start"() <{level = 10 : i32, message = "bqd,bkd->bqk"}> : () -> ()
    %cst_21 = arith.constant dense<0.000000e+00> : vector<2x8x8xf32>
    %71 = tpu.matmul %64, %67, %cst_21 {dimension_numbers = #tpu.dot_dimension_numbers<[2], [2], [1], [1], [0, 0, 0, 1, 1, 1], [0], [0]>} : vector<2x8x32xbf16>, vector<2x8x32xbf16>, vector<2x8x8xf32> -> vector<2x8x8xf32>
    "tpu.trace_stop"() : () -> ()
    %cst_22 = arith.constant dense<0xFF800000> : vector<2x8xf32>
    %72 = vector.multi_reduction <maximumf>, %71, %cst_22 [2] : vector<2x8x8xf32> to vector<2x8xf32>
    %73 = vector.shape_cast %72 : vector<2x8xf32> to vector<2x8x1xf32>
    %74 = vector.broadcast %73 : vector<2x8x1xf32> to vector<2x8x8xf32>
    %75 = arith.subf %71, %74 : vector<2x8x8xf32>
    %76 = math.exp %75 : vector<2x8x8xf32>
    %cst_23 = arith.constant dense<0.000000e+00> : vector<2x8xf32>
    %77 = vector.multi_reduction <add>, %76, %cst_23 [2] : vector<2x8x8xf32> to vector<2x8xf32>
    %78 = vector.shape_cast %77 : vector<2x8xf32> to vector<2x8x1xf32>
    %79 = tpu.reciprocal %78 {approx = true} : vector<2x8x1xf32> -> vector<2x8x1xf32>
    %80 = vector.broadcast %79 : vector<2x8x1xf32> to vector<2x8x8xf32>
    %81 = arith.mulf %76, %80 : vector<2x8x8xf32>
    %82 = arith.truncf %81 : vector<2x8x8xf32> to vector<2x8x8xbf16>
    "tpu.trace_start"() <{level = 10 : i32, message = "bqk,bkd->bqd"}> : () -> ()
    %cst_24 = arith.constant dense<0.000000e+00> : vector<2x8x32xf32>
    %83 = tpu.matmul %82, %70, %cst_24 {dimension_numbers = #tpu.dot_dimension_numbers<[2], [1], [1], [2], [0, 0, 0, 1, 1, 2], [0], [0]>} : vector<2x8x8xbf16>, vector<2x8x32xbf16>, vector<2x8x32xf32> -> vector<2x8x32xf32>
    "tpu.trace_stop"() : () -> ()
    %84 = vector.shape_cast %83 : vector<2x8x32xf32> to vector<16x32xf32>
    %85 = vector.extract_strided_slice %36 {offsets = [0, 64], sizes = [16, 32], strides = [1, 1]} : vector<16x128xf32> to vector<16x32xf32>
    %86 = vector.shape_cast %85 : vector<16x32xf32> to vector<2x8x32xf32>
    %87 = arith.truncf %86 : vector<2x8x32xf32> to vector<2x8x32xbf16>
    %88 = vector.extract_strided_slice %37 {offsets = [0, 64], sizes = [16, 32], strides = [1, 1]} : vector<16x128xf32> to vector<16x32xf32>
    %89 = vector.shape_cast %88 : vector<16x32xf32> to vector<2x8x32xf32>
    %90 = arith.truncf %89 : vector<2x8x32xf32> to vector<2x8x32xbf16>
    %91 = vector.extract_strided_slice %38 {offsets = [0, 64], sizes = [16, 32], strides = [1, 1]} : vector<16x128xf32> to vector<16x32xf32>
    %92 = vector.shape_cast %91 : vector<16x32xf32> to vector<2x8x32xf32>
    %93 = arith.truncf %92 : vector<2x8x32xf32> to vector<2x8x32xbf16>
    "tpu.trace_start"() <{level = 10 : i32, message = "bqd,bkd->bqk"}> : () -> ()
    %cst_25 = arith.constant dense<0.000000e+00> : vector<2x8x8xf32>
    %94 = tpu.matmul %87, %90, %cst_25 {dimension_numbers = #tpu.dot_dimension_numbers<[2], [2], [1], [1], [0, 0, 0, 1, 1, 1], [0], [0]>} : vector<2x8x32xbf16>, vector<2x8x32xbf16>, vector<2x8x8xf32> -> vector<2x8x8xf32>
    "tpu.trace_stop"() : () -> ()
    %cst_26 = arith.constant dense<0xFF800000> : vector<2x8xf32>
    %95 = vector.multi_reduction <maximumf>, %94, %cst_26 [2] : vector<2x8x8xf32> to vector<2x8xf32>
    %96 = vector.shape_cast %95 : vector<2x8xf32> to vector<2x8x1xf32>
    %97 = vector.broadcast %96 : vector<2x8x1xf32> to vector<2x8x8xf32>
    %98 = arith.subf %94, %97 : vector<2x8x8xf32>
    %99 = math.exp %98 : vector<2x8x8xf32>
    %cst_27 = arith.constant dense<0.000000e+00> : vector<2x8xf32>
    %100 = vector.multi_reduction <add>, %99, %cst_27 [2] : vector<2x8x8xf32> to vector<2x8xf32>
    %101 = vector.shape_cast %100 : vector<2x8xf32> to vector<2x8x1xf32>
    %102 = tpu.reciprocal %101 {approx = true} : vector<2x8x1xf32> -> vector<2x8x1xf32>
    %103 = vector.broadcast %102 : vector<2x8x1xf32> to vector<2x8x8xf32>
    %104 = arith.mulf %99, %103 : vector<2x8x8xf32>
    %105 = arith.truncf %104 : vector<2x8x8xf32> to vector<2x8x8xbf16>
    "tpu.trace_start"() <{level = 10 : i32, message = "bqk,bkd->bqd"}> : () -> ()
    %cst_28 = arith.constant dense<0.000000e+00> : vector<2x8x32xf32>
    %106 = tpu.matmul %105, %93, %cst_28 {dimension_numbers = #tpu.dot_dimension_numbers<[2], [1], [1], [2], [0, 0, 0, 1, 1, 2], [0], [0]>} : vector<2x8x8xbf16>, vector<2x8x32xbf16>, vector<2x8x32xf32> -> vector<2x8x32xf32>
    "tpu.trace_stop"() : () -> ()
    %107 = vector.shape_cast %106 : vector<2x8x32xf32> to vector<16x32xf32>
    %108 = vector.extract_strided_slice %36 {offsets = [0, 96], sizes = [16, 32], strides = [1, 1]} : vector<16x128xf32> to vector<16x32xf32>
    %109 = vector.shape_cast %108 : vector<16x32xf32> to vector<2x8x32xf32>
    %110 = arith.truncf %109 : vector<2x8x32xf32> to vector<2x8x32xbf16>
    %111 = vector.extract_strided_slice %37 {offsets = [0, 96], sizes = [16, 32], strides = [1, 1]} : vector<16x128xf32> to vector<16x32xf32>
    %112 = vector.shape_cast %111 : vector<16x32xf32> to vector<2x8x32xf32>
    %113 = arith.truncf %112 : vector<2x8x32xf32> to vector<2x8x32xbf16>
    %114 = vector.extract_strided_slice %38 {offsets = [0, 96], sizes = [16, 32], strides = [1, 1]} : vector<16x128xf32> to vector<16x32xf32>
    %115 = vector.shape_cast %114 : vector<16x32xf32> to vector<2x8x32xf32>
    %116 = arith.truncf %115 : vector<2x8x32xf32> to vector<2x8x32xbf16>
    "tpu.trace_start"() <{level = 10 : i32, message = "bqd,bkd->bqk"}> : () -> ()
    %cst_29 = arith.constant dense<0.000000e+00> : vector<2x8x8xf32>
    %117 = tpu.matmul %110, %113, %cst_29 {dimension_numbers = #tpu.dot_dimension_numbers<[2], [2], [1], [1], [0, 0, 0, 1, 1, 1], [0], [0]>} : vector<2x8x32xbf16>, vector<2x8x32xbf16>, vector<2x8x8xf32> -> vector<2x8x8xf32>
    "tpu.trace_stop"() : () -> ()
    %cst_30 = arith.constant dense<0xFF800000> : vector<2x8xf32>
    %118 = vector.multi_reduction <maximumf>, %117, %cst_30 [2] : vector<2x8x8xf32> to vector<2x8xf32>
    %119 = vector.shape_cast %118 : vector<2x8xf32> to vector<2x8x1xf32>
    %120 = vector.broadcast %119 : vector<2x8x1xf32> to vector<2x8x8xf32>
    %121 = arith.subf %117, %120 : vector<2x8x8xf32>
    %122 = math.exp %121 : vector<2x8x8xf32>
    %cst_31 = arith.constant dense<0.000000e+00> : vector<2x8xf32>
    %123 = vector.multi_reduction <add>, %122, %cst_31 [2] : vector<2x8x8xf32> to vector<2x8xf32>
    %124 = vector.shape_cast %123 : vector<2x8xf32> to vector<2x8x1xf32>
    %125 = tpu.reciprocal %124 {approx = true} : vector<2x8x1xf32> -> vector<2x8x1xf32>
    %126 = vector.broadcast %125 : vector<2x8x1xf32> to vector<2x8x8xf32>
    %127 = arith.mulf %122, %126 : vector<2x8x8xf32>
    %128 = arith.truncf %127 : vector<2x8x8xf32> to vector<2x8x8xbf16>
    "tpu.trace_start"() <{level = 10 : i32, message = "bqk,bkd->bqd"}> : () -> ()
    %cst_32 = arith.constant dense<0.000000e+00> : vector<2x8x32xf32>
    %129 = tpu.matmul %128, %116, %cst_32 {dimension_numbers = #tpu.dot_dimension_numbers<[2], [1], [1], [2], [0, 0, 0, 1, 1, 2], [0], [0]>} : vector<2x8x8xbf16>, vector<2x8x32xbf16>, vector<2x8x32xf32> -> vector<2x8x32xf32>
    "tpu.trace_stop"() : () -> ()
    %130 = vector.shape_cast %129 : vector<2x8x32xf32> to vector<16x32xf32>
    %131 = tpu.concatenate %61, %84, %107, %130 in 1 : vector<16x32xf32>, vector<16x32xf32>, vector<16x32xf32>, vector<16x32xf32> -> vector<16x128xf32>
    %132 = arith.truncf %131 : vector<16x128xf32> to vector<16x128xbf16>
    %c0_33 = arith.constant 0 : index
    %c0_34 = arith.constant 0 : index
    %c0_35 = arith.constant 0 : index
    %133 = vector.load %arg4[%c0_33, %c0_34, %c0_35] : memref<2x128x128xbf16, #tpu.memory_space<vmem>>, vector<1x128x128xbf16>
    %134 = vector.shape_cast %133 : vector<1x128x128xbf16> to vector<128x128xbf16>
    %cst_36 = arith.constant dense<0.000000e+00> : vector<16x128xf32>
    %135 = tpu.matmul %132, %134, %cst_36 {dimension_numbers = #tpu.dot_dimension_numbers<[1], [0], [0], [1], [0, 0, 1, 1], [], []>} : vector<16x128xbf16>, vector<128x128xbf16>, vector<16x128xf32> -> vector<16x128xf32>
    %136 = vector.extract_strided_slice %27 {offsets = [0, 0], sizes = [1, 128], strides = [1, 1]} : vector<6x128xf32> to vector<1x128xf32>
    %137 = vector.broadcast %136 : vector<1x128xf32> to vector<16x128xf32>
    %138 = arith.addf %135, %137 : vector<16x128xf32>
    %139 = arith.addf %25, %138 : vector<16x128xf32>
    %140 = vector.extract_strided_slice %27 {offsets = [1, 0], sizes = [1, 128], strides = [1, 1]} : vector<6x128xf32> to vector<1x128xf32>
    %141 = vector.extract_strided_slice %27 {offsets = [2, 0], sizes = [1, 128], strides = [1, 1]} : vector<6x128xf32> to vector<1x128xf32>
    %cst_37 = arith.constant dense<0.000000e+00> : vector<16xf32>
    %142 = vector.multi_reduction <add>, %139, %cst_37 [1] : vector<16x128xf32> to vector<16xf32>
    %143 = vector.shape_cast %142 : vector<16xf32> to vector<16x1xf32>
    %cst_38 = arith.constant 1.280000e+02 : f32
    %144 = vector.broadcast %cst_38 : f32 to vector<16x1xf32>
    %145 = arith.divf %143, %144 : vector<16x1xf32>
    %146 = vector.broadcast %145 : vector<16x1xf32> to vector<16x128xf32>
    %147 = arith.subf %139, %146 : vector<16x128xf32>
    %148 = arith.mulf %147, %147 : vector<16x128xf32>
    %cst_39 = arith.constant dense<0.000000e+00> : vector<16xf32>
    %149 = vector.multi_reduction <add>, %148, %cst_39 [1] : vector<16x128xf32> to vector<16xf32>
    %150 = vector.shape_cast %149 : vector<16xf32> to vector<16x1xf32>
    %cst_40 = arith.constant 1.280000e+02 : f32
    %151 = vector.broadcast %cst_40 : f32 to vector<16x1xf32>
    %152 = arith.divf %150, %151 : vector<16x1xf32>
    %153 = vector.broadcast %145 : vector<16x1xf32> to vector<16x128xf32>
    %154 = arith.subf %139, %153 : vector<16x128xf32>
    %cst_41 = arith.constant 9.99999996E-13 : f32
    %155 = vector.broadcast %cst_41 : f32 to vector<16x1xf32>
    %156 = arith.addf %152, %155 : vector<16x1xf32>
    %157 = math.rsqrt %156 : vector<16x1xf32>
    %158 = vector.broadcast %157 : vector<16x1xf32> to vector<16x128xf32>
    %159 = arith.mulf %154, %158 : vector<16x128xf32>
    %160 = vector.broadcast %140 : vector<1x128xf32> to vector<16x128xf32>
    %161 = arith.mulf %159, %160 : vector<16x128xf32>
    %162 = vector.broadcast %141 : vector<1x128xf32> to vector<16x128xf32>
    %163 = arith.addf %161, %162 : vector<16x128xf32>
    %164 = arith.truncf %163 : vector<16x128xf32> to vector<16x128xbf16>
    %c0_42 = arith.constant 0 : index
    %c0_43 = arith.constant 0 : index
    %c0_44 = arith.constant 0 : index
    %165 = vector.load %arg6[%c0_42, %c0_43, %c0_44] : memref<2x128x256xbf16, #tpu.memory_space<vmem>>, vector<1x128x256xbf16>
    %166 = vector.shape_cast %165 : vector<1x128x256xbf16> to vector<128x256xbf16>
    %cst_45 = arith.constant dense<0.000000e+00> : vector<16x256xf32>
    %167 = tpu.matmul %164, %166, %cst_45 {dimension_numbers = #tpu.dot_dimension_numbers<[1], [0], [0], [1], [0, 0, 1, 1], [], []>} : vector<16x128xbf16>, vector<128x256xbf16>, vector<16x256xf32> -> vector<16x256xf32>
    %c0_46 = arith.constant 0 : index
    %c0_47 = arith.constant 0 : index
    %c0_48 = arith.constant 0 : index
    %168 = vector.load %arg7[%c0_46, %c0_47, %c0_48] : memref<2x1x256xf32, #tpu.memory_space<vmem>>, vector<1x1x256xf32>
    %169 = vector.shape_cast %168 : vector<1x1x256xf32> to vector<1x256xf32>
    %170 = vector.broadcast %169 : vector<1x256xf32> to vector<16x256xf32>
    %171 = arith.addf %167, %170 : vector<16x256xf32>
    %172 = arith.mulf %171, %171 : vector<16x256xf32>
    %173 = arith.mulf %171, %172 : vector<16x256xf32>
    %cst_49 = arith.constant 4.471500e-02 : f32
    %174 = vector.broadcast %cst_49 : f32 to vector<16x256xf32>
    %175 = arith.mulf %174, %173 : vector<16x256xf32>
    %176 = arith.addf %171, %175 : vector<16x256xf32>
    %cst_50 = arith.constant 0.797884583 : f32
    %177 = vector.broadcast %cst_50 : f32 to vector<16x256xf32>
    %178 = arith.mulf %177, %176 : vector<16x256xf32>
    %179 = math.tanh %178 : vector<16x256xf32>
    %cst_51 = arith.constant 1.000000e+00 : f32
    %180 = vector.broadcast %cst_51 : f32 to vector<16x256xf32>
    %181 = arith.addf %180, %179 : vector<16x256xf32>
    %cst_52 = arith.constant 5.000000e-01 : f32
    %182 = vector.broadcast %cst_52 : f32 to vector<16x256xf32>
    %183 = arith.mulf %182, %181 : vector<16x256xf32>
    %184 = arith.mulf %171, %183 : vector<16x256xf32>
    %185 = arith.truncf %184 : vector<16x256xf32> to vector<16x256xbf16>
    %c0_53 = arith.constant 0 : index
    %c0_54 = arith.constant 0 : index
    %c0_55 = arith.constant 0 : index
    %186 = vector.load %arg8[%c0_53, %c0_54, %c0_55] : memref<2x256x128xbf16, #tpu.memory_space<vmem>>, vector<1x256x128xbf16>
    %187 = vector.shape_cast %186 : vector<1x256x128xbf16> to vector<256x128xbf16>
    %cst_56 = arith.constant dense<0.000000e+00> : vector<16x128xf32>
    %188 = tpu.matmul %185, %187, %cst_56 {dimension_numbers = #tpu.dot_dimension_numbers<[1], [0], [0], [1], [0, 0, 1, 1], [], []>} : vector<16x256xbf16>, vector<256x128xbf16>, vector<16x128xf32> -> vector<16x128xf32>
    %189 = vector.extract_strided_slice %27 {offsets = [3, 0], sizes = [1, 128], strides = [1, 1]} : vector<6x128xf32> to vector<1x128xf32>
    %190 = vector.broadcast %189 : vector<1x128xf32> to vector<16x128xf32>
    %191 = arith.addf %188, %190 : vector<16x128xf32>
    %192 = arith.addf %163, %191 : vector<16x128xf32>
    %193 = vector.extract_strided_slice %27 {offsets = [4, 0], sizes = [1, 128], strides = [1, 1]} : vector<6x128xf32> to vector<1x128xf32>
    %194 = vector.extract_strided_slice %27 {offsets = [5, 0], sizes = [1, 128], strides = [1, 1]} : vector<6x128xf32> to vector<1x128xf32>
    %cst_57 = arith.constant dense<0.000000e+00> : vector<16xf32>
    %195 = vector.multi_reduction <add>, %192, %cst_57 [1] : vector<16x128xf32> to vector<16xf32>
    %196 = vector.shape_cast %195 : vector<16xf32> to vector<16x1xf32>
    %cst_58 = arith.constant 1.280000e+02 : f32
    %197 = vector.broadcast %cst_58 : f32 to vector<16x1xf32>
    %198 = arith.divf %196, %197 : vector<16x1xf32>
    %199 = vector.broadcast %198 : vector<16x1xf32> to vector<16x128xf32>
    %200 = arith.subf %192, %199 : vector<16x128xf32>
    %201 = arith.mulf %200, %200 : vector<16x128xf32>
    %cst_59 = arith.constant dense<0.000000e+00> : vector<16xf32>
    %202 = vector.multi_reduction <add>, %201, %cst_59 [1] : vector<16x128xf32> to vector<16xf32>
    %203 = vector.shape_cast %202 : vector<16xf32> to vector<16x1xf32>
    %cst_60 = arith.constant 1.280000e+02 : f32
    %204 = vector.broadcast %cst_60 : f32 to vector<16x1xf32>
    %205 = arith.divf %203, %204 : vector<16x1xf32>
    %206 = vector.broadcast %198 : vector<16x1xf32> to vector<16x128xf32>
    %207 = arith.subf %192, %206 : vector<16x128xf32>
    %cst_61 = arith.constant 9.99999996E-13 : f32
    %208 = vector.broadcast %cst_61 : f32 to vector<16x1xf32>
    %209 = arith.addf %205, %208 : vector<16x1xf32>
    %210 = math.rsqrt %209 : vector<16x1xf32>
    %211 = vector.broadcast %210 : vector<16x1xf32> to vector<16x128xf32>
    %212 = arith.mulf %207, %211 : vector<16x128xf32>
    %213 = vector.broadcast %193 : vector<1x128xf32> to vector<16x128xf32>
    %214 = arith.mulf %212, %213 : vector<16x128xf32>
    %215 = vector.broadcast %194 : vector<1x128xf32> to vector<16x128xf32>
    %216 = arith.addf %214, %215 : vector<16x128xf32>
    %c1 = arith.constant 1 : index
    %c0_62 = arith.constant 0 : index
    %c0_63 = arith.constant 0 : index
    %217 = vector.load %arg5[%c1, %c0_62, %c0_63] : memref<2x6x128xf32, #tpu.memory_space<vmem>>, vector<1x6x128xf32>
    %218 = vector.shape_cast %217 : vector<1x6x128xf32> to vector<6x128xf32>
    %219 = arith.truncf %216 : vector<16x128xf32> to vector<16x128xbf16>
    %c1_64 = arith.constant 1 : index
    %c0_65 = arith.constant 0 : index
    %c0_66 = arith.constant 0 : index
    %220 = vector.load %arg2[%c1_64, %c0_65, %c0_66] : memref<2x128x384xbf16, #tpu.memory_space<vmem>>, vector<1x128x384xbf16>
    %221 = vector.shape_cast %220 : vector<1x128x384xbf16> to vector<128x384xbf16>
    %cst_67 = arith.constant dense<0.000000e+00> : vector<16x384xf32>
    %222 = tpu.matmul %219, %221, %cst_67 {dimension_numbers = #tpu.dot_dimension_numbers<[1], [0], [0], [1], [0, 0, 1, 1], [], []>} : vector<16x128xbf16>, vector<128x384xbf16>, vector<16x384xf32> -> vector<16x384xf32>
    %c1_68 = arith.constant 1 : index
    %c0_69 = arith.constant 0 : index
    %c0_70 = arith.constant 0 : index
    %223 = vector.load %arg3[%c1_68, %c0_69, %c0_70] : memref<2x1x384xf32, #tpu.memory_space<vmem>>, vector<1x1x384xf32>
    %224 = vector.shape_cast %223 : vector<1x1x384xf32> to vector<1x384xf32>
    %225 = vector.broadcast %224 : vector<1x384xf32> to vector<16x384xf32>
    %226 = arith.addf %222, %225 : vector<16x384xf32>
    %227 = vector.extract_strided_slice %226 {offsets = [0, 0], sizes = [16, 128], strides = [1, 1]} : vector<16x384xf32> to vector<16x128xf32>
    %228 = vector.extract_strided_slice %226 {offsets = [0, 128], sizes = [16, 128], strides = [1, 1]} : vector<16x384xf32> to vector<16x128xf32>
    %229 = vector.extract_strided_slice %226 {offsets = [0, 256], sizes = [16, 128], strides = [1, 1]} : vector<16x384xf32> to vector<16x128xf32>
    %230 = vector.extract_strided_slice %227 {offsets = [0, 0], sizes = [16, 32], strides = [1, 1]} : vector<16x128xf32> to vector<16x32xf32>
    %231 = vector.shape_cast %230 : vector<16x32xf32> to vector<2x8x32xf32>
    %232 = arith.truncf %231 : vector<2x8x32xf32> to vector<2x8x32xbf16>
    %233 = vector.extract_strided_slice %228 {offsets = [0, 0], sizes = [16, 32], strides = [1, 1]} : vector<16x128xf32> to vector<16x32xf32>
    %234 = vector.shape_cast %233 : vector<16x32xf32> to vector<2x8x32xf32>
    %235 = arith.truncf %234 : vector<2x8x32xf32> to vector<2x8x32xbf16>
    %236 = vector.extract_strided_slice %229 {offsets = [0, 0], sizes = [16, 32], strides = [1, 1]} : vector<16x128xf32> to vector<16x32xf32>
    %237 = vector.shape_cast %236 : vector<16x32xf32> to vector<2x8x32xf32>
    %238 = arith.truncf %237 : vector<2x8x32xf32> to vector<2x8x32xbf16>
    "tpu.trace_start"() <{level = 10 : i32, message = "bqd,bkd->bqk"}> : () -> ()
    %cst_71 = arith.constant dense<0.000000e+00> : vector<2x8x8xf32>
    %239 = tpu.matmul %232, %235, %cst_71 {dimension_numbers = #tpu.dot_dimension_numbers<[2], [2], [1], [1], [0, 0, 0, 1, 1, 1], [0], [0]>} : vector<2x8x32xbf16>, vector<2x8x32xbf16>, vector<2x8x8xf32> -> vector<2x8x8xf32>
    "tpu.trace_stop"() : () -> ()
    %cst_72 = arith.constant dense<0xFF800000> : vector<2x8xf32>
    %240 = vector.multi_reduction <maximumf>, %239, %cst_72 [2] : vector<2x8x8xf32> to vector<2x8xf32>
    %241 = vector.shape_cast %240 : vector<2x8xf32> to vector<2x8x1xf32>
    %242 = vector.broadcast %241 : vector<2x8x1xf32> to vector<2x8x8xf32>
    %243 = arith.subf %239, %242 : vector<2x8x8xf32>
    %244 = math.exp %243 : vector<2x8x8xf32>
    %cst_73 = arith.constant dense<0.000000e+00> : vector<2x8xf32>
    %245 = vector.multi_reduction <add>, %244, %cst_73 [2] : vector<2x8x8xf32> to vector<2x8xf32>
    %246 = vector.shape_cast %245 : vector<2x8xf32> to vector<2x8x1xf32>
    %247 = tpu.reciprocal %246 {approx = true} : vector<2x8x1xf32> -> vector<2x8x1xf32>
    %248 = vector.broadcast %247 : vector<2x8x1xf32> to vector<2x8x8xf32>
    %249 = arith.mulf %244, %248 : vector<2x8x8xf32>
    %250 = arith.truncf %249 : vector<2x8x8xf32> to vector<2x8x8xbf16>
    "tpu.trace_start"() <{level = 10 : i32, message = "bqk,bkd->bqd"}> : () -> ()
    %cst_74 = arith.constant dense<0.000000e+00> : vector<2x8x32xf32>
    %251 = tpu.matmul %250, %238, %cst_74 {dimension_numbers = #tpu.dot_dimension_numbers<[2], [1], [1], [2], [0, 0, 0, 1, 1, 2], [0], [0]>} : vector<2x8x8xbf16>, vector<2x8x32xbf16>, vector<2x8x32xf32> -> vector<2x8x32xf32>
    "tpu.trace_stop"() : () -> ()
    %252 = vector.shape_cast %251 : vector<2x8x32xf32> to vector<16x32xf32>
    %253 = vector.extract_strided_slice %227 {offsets = [0, 32], sizes = [16, 32], strides = [1, 1]} : vector<16x128xf32> to vector<16x32xf32>
    %254 = vector.shape_cast %253 : vector<16x32xf32> to vector<2x8x32xf32>
    %255 = arith.truncf %254 : vector<2x8x32xf32> to vector<2x8x32xbf16>
    %256 = vector.extract_strided_slice %228 {offsets = [0, 32], sizes = [16, 32], strides = [1, 1]} : vector<16x128xf32> to vector<16x32xf32>
    %257 = vector.shape_cast %256 : vector<16x32xf32> to vector<2x8x32xf32>
    %258 = arith.truncf %257 : vector<2x8x32xf32> to vector<2x8x32xbf16>
    %259 = vector.extract_strided_slice %229 {offsets = [0, 32], sizes = [16, 32], strides = [1, 1]} : vector<16x128xf32> to vector<16x32xf32>
    %260 = vector.shape_cast %259 : vector<16x32xf32> to vector<2x8x32xf32>
    %261 = arith.truncf %260 : vector<2x8x32xf32> to vector<2x8x32xbf16>
    "tpu.trace_start"() <{level = 10 : i32, message = "bqd,bkd->bqk"}> : () -> ()
    %cst_75 = arith.constant dense<0.000000e+00> : vector<2x8x8xf32>
    %262 = tpu.matmul %255, %258, %cst_75 {dimension_numbers = #tpu.dot_dimension_numbers<[2], [2], [1], [1], [0, 0, 0, 1, 1, 1], [0], [0]>} : vector<2x8x32xbf16>, vector<2x8x32xbf16>, vector<2x8x8xf32> -> vector<2x8x8xf32>
    "tpu.trace_stop"() : () -> ()
    %cst_76 = arith.constant dense<0xFF800000> : vector<2x8xf32>
    %263 = vector.multi_reduction <maximumf>, %262, %cst_76 [2] : vector<2x8x8xf32> to vector<2x8xf32>
    %264 = vector.shape_cast %263 : vector<2x8xf32> to vector<2x8x1xf32>
    %265 = vector.broadcast %264 : vector<2x8x1xf32> to vector<2x8x8xf32>
    %266 = arith.subf %262, %265 : vector<2x8x8xf32>
    %267 = math.exp %266 : vector<2x8x8xf32>
    %cst_77 = arith.constant dense<0.000000e+00> : vector<2x8xf32>
    %268 = vector.multi_reduction <add>, %267, %cst_77 [2] : vector<2x8x8xf32> to vector<2x8xf32>
    %269 = vector.shape_cast %268 : vector<2x8xf32> to vector<2x8x1xf32>
    %270 = tpu.reciprocal %269 {approx = true} : vector<2x8x1xf32> -> vector<2x8x1xf32>
    %271 = vector.broadcast %270 : vector<2x8x1xf32> to vector<2x8x8xf32>
    %272 = arith.mulf %267, %271 : vector<2x8x8xf32>
    %273 = arith.truncf %272 : vector<2x8x8xf32> to vector<2x8x8xbf16>
    "tpu.trace_start"() <{level = 10 : i32, message = "bqk,bkd->bqd"}> : () -> ()
    %cst_78 = arith.constant dense<0.000000e+00> : vector<2x8x32xf32>
    %274 = tpu.matmul %273, %261, %cst_78 {dimension_numbers = #tpu.dot_dimension_numbers<[2], [1], [1], [2], [0, 0, 0, 1, 1, 2], [0], [0]>} : vector<2x8x8xbf16>, vector<2x8x32xbf16>, vector<2x8x32xf32> -> vector<2x8x32xf32>
    "tpu.trace_stop"() : () -> ()
    %275 = vector.shape_cast %274 : vector<2x8x32xf32> to vector<16x32xf32>
    %276 = vector.extract_strided_slice %227 {offsets = [0, 64], sizes = [16, 32], strides = [1, 1]} : vector<16x128xf32> to vector<16x32xf32>
    %277 = vector.shape_cast %276 : vector<16x32xf32> to vector<2x8x32xf32>
    %278 = arith.truncf %277 : vector<2x8x32xf32> to vector<2x8x32xbf16>
    %279 = vector.extract_strided_slice %228 {offsets = [0, 64], sizes = [16, 32], strides = [1, 1]} : vector<16x128xf32> to vector<16x32xf32>
    %280 = vector.shape_cast %279 : vector<16x32xf32> to vector<2x8x32xf32>
    %281 = arith.truncf %280 : vector<2x8x32xf32> to vector<2x8x32xbf16>
    %282 = vector.extract_strided_slice %229 {offsets = [0, 64], sizes = [16, 32], strides = [1, 1]} : vector<16x128xf32> to vector<16x32xf32>
    %283 = vector.shape_cast %282 : vector<16x32xf32> to vector<2x8x32xf32>
    %284 = arith.truncf %283 : vector<2x8x32xf32> to vector<2x8x32xbf16>
    "tpu.trace_start"() <{level = 10 : i32, message = "bqd,bkd->bqk"}> : () -> ()
    %cst_79 = arith.constant dense<0.000000e+00> : vector<2x8x8xf32>
    %285 = tpu.matmul %278, %281, %cst_79 {dimension_numbers = #tpu.dot_dimension_numbers<[2], [2], [1], [1], [0, 0, 0, 1, 1, 1], [0], [0]>} : vector<2x8x32xbf16>, vector<2x8x32xbf16>, vector<2x8x8xf32> -> vector<2x8x8xf32>
    "tpu.trace_stop"() : () -> ()
    %cst_80 = arith.constant dense<0xFF800000> : vector<2x8xf32>
    %286 = vector.multi_reduction <maximumf>, %285, %cst_80 [2] : vector<2x8x8xf32> to vector<2x8xf32>
    %287 = vector.shape_cast %286 : vector<2x8xf32> to vector<2x8x1xf32>
    %288 = vector.broadcast %287 : vector<2x8x1xf32> to vector<2x8x8xf32>
    %289 = arith.subf %285, %288 : vector<2x8x8xf32>
    %290 = math.exp %289 : vector<2x8x8xf32>
    %cst_81 = arith.constant dense<0.000000e+00> : vector<2x8xf32>
    %291 = vector.multi_reduction <add>, %290, %cst_81 [2] : vector<2x8x8xf32> to vector<2x8xf32>
    %292 = vector.shape_cast %291 : vector<2x8xf32> to vector<2x8x1xf32>
    %293 = tpu.reciprocal %292 {approx = true} : vector<2x8x1xf32> -> vector<2x8x1xf32>
    %294 = vector.broadcast %293 : vector<2x8x1xf32> to vector<2x8x8xf32>
    %295 = arith.mulf %290, %294 : vector<2x8x8xf32>
    %296 = arith.truncf %295 : vector<2x8x8xf32> to vector<2x8x8xbf16>
    "tpu.trace_start"() <{level = 10 : i32, message = "bqk,bkd->bqd"}> : () -> ()
    %cst_82 = arith.constant dense<0.000000e+00> : vector<2x8x32xf32>
    %297 = tpu.matmul %296, %284, %cst_82 {dimension_numbers = #tpu.dot_dimension_numbers<[2], [1], [1], [2], [0, 0, 0, 1, 1, 2], [0], [0]>} : vector<2x8x8xbf16>, vector<2x8x32xbf16>, vector<2x8x32xf32> -> vector<2x8x32xf32>
    "tpu.trace_stop"() : () -> ()
    %298 = vector.shape_cast %297 : vector<2x8x32xf32> to vector<16x32xf32>
    %299 = vector.extract_strided_slice %227 {offsets = [0, 96], sizes = [16, 32], strides = [1, 1]} : vector<16x128xf32> to vector<16x32xf32>
    %300 = vector.shape_cast %299 : vector<16x32xf32> to vector<2x8x32xf32>
    %301 = arith.truncf %300 : vector<2x8x32xf32> to vector<2x8x32xbf16>
    %302 = vector.extract_strided_slice %228 {offsets = [0, 96], sizes = [16, 32], strides = [1, 1]} : vector<16x128xf32> to vector<16x32xf32>
    %303 = vector.shape_cast %302 : vector<16x32xf32> to vector<2x8x32xf32>
    %304 = arith.truncf %303 : vector<2x8x32xf32> to vector<2x8x32xbf16>
    %305 = vector.extract_strided_slice %229 {offsets = [0, 96], sizes = [16, 32], strides = [1, 1]} : vector<16x128xf32> to vector<16x32xf32>
    %306 = vector.shape_cast %305 : vector<16x32xf32> to vector<2x8x32xf32>
    %307 = arith.truncf %306 : vector<2x8x32xf32> to vector<2x8x32xbf16>
    "tpu.trace_start"() <{level = 10 : i32, message = "bqd,bkd->bqk"}> : () -> ()
    %cst_83 = arith.constant dense<0.000000e+00> : vector<2x8x8xf32>
    %308 = tpu.matmul %301, %304, %cst_83 {dimension_numbers = #tpu.dot_dimension_numbers<[2], [2], [1], [1], [0, 0, 0, 1, 1, 1], [0], [0]>} : vector<2x8x32xbf16>, vector<2x8x32xbf16>, vector<2x8x8xf32> -> vector<2x8x8xf32>
    "tpu.trace_stop"() : () -> ()
    %cst_84 = arith.constant dense<0xFF800000> : vector<2x8xf32>
    %309 = vector.multi_reduction <maximumf>, %308, %cst_84 [2] : vector<2x8x8xf32> to vector<2x8xf32>
    %310 = vector.shape_cast %309 : vector<2x8xf32> to vector<2x8x1xf32>
    %311 = vector.broadcast %310 : vector<2x8x1xf32> to vector<2x8x8xf32>
    %312 = arith.subf %308, %311 : vector<2x8x8xf32>
    %313 = math.exp %312 : vector<2x8x8xf32>
    %cst_85 = arith.constant dense<0.000000e+00> : vector<2x8xf32>
    %314 = vector.multi_reduction <add>, %313, %cst_85 [2] : vector<2x8x8xf32> to vector<2x8xf32>
    %315 = vector.shape_cast %314 : vector<2x8xf32> to vector<2x8x1xf32>
    %316 = tpu.reciprocal %315 {approx = true} : vector<2x8x1xf32> -> vector<2x8x1xf32>
    %317 = vector.broadcast %316 : vector<2x8x1xf32> to vector<2x8x8xf32>
    %318 = arith.mulf %313, %317 : vector<2x8x8xf32>
    %319 = arith.truncf %318 : vector<2x8x8xf32> to vector<2x8x8xbf16>
    "tpu.trace_start"() <{level = 10 : i32, message = "bqk,bkd->bqd"}> : () -> ()
    %cst_86 = arith.constant dense<0.000000e+00> : vector<2x8x32xf32>
    %320 = tpu.matmul %319, %307, %cst_86 {dimension_numbers = #tpu.dot_dimension_numbers<[2], [1], [1], [2], [0, 0, 0, 1, 1, 2], [0], [0]>} : vector<2x8x8xbf16>, vector<2x8x32xbf16>, vector<2x8x32xf32> -> vector<2x8x32xf32>
    "tpu.trace_stop"() : () -> ()
    %321 = vector.shape_cast %320 : vector<2x8x32xf32> to vector<16x32xf32>
    %322 = tpu.concatenate %252, %275, %298, %321 in 1 : vector<16x32xf32>, vector<16x32xf32>, vector<16x32xf32>, vector<16x32xf32> -> vector<16x128xf32>
    %323 = arith.truncf %322 : vector<16x128xf32> to vector<16x128xbf16>
    %c1_87 = arith.constant 1 : index
    %c0_88 = arith.constant 0 : index
    %c0_89 = arith.constant 0 : index
    %324 = vector.load %arg4[%c1_87, %c0_88, %c0_89] : memref<2x128x128xbf16, #tpu.memory_space<vmem>>, vector<1x128x128xbf16>
    %325 = vector.shape_cast %324 : vector<1x128x128xbf16> to vector<128x128xbf16>
    %cst_90 = arith.constant dense<0.000000e+00> : vector<16x128xf32>
    %326 = tpu.matmul %323, %325, %cst_90 {dimension_numbers = #tpu.dot_dimension_numbers<[1], [0], [0], [1], [0, 0, 1, 1], [], []>} : vector<16x128xbf16>, vector<128x128xbf16>, vector<16x128xf32> -> vector<16x128xf32>
    %327 = vector.extract_strided_slice %218 {offsets = [0, 0], sizes = [1, 128], strides = [1, 1]} : vector<6x128xf32> to vector<1x128xf32>
    %328 = vector.broadcast %327 : vector<1x128xf32> to vector<16x128xf32>
    %329 = arith.addf %326, %328 : vector<16x128xf32>
    %330 = arith.addf %216, %329 : vector<16x128xf32>
    %331 = vector.extract_strided_slice %218 {offsets = [1, 0], sizes = [1, 128], strides = [1, 1]} : vector<6x128xf32> to vector<1x128xf32>
    %332 = vector.extract_strided_slice %218 {offsets = [2, 0], sizes = [1, 128], strides = [1, 1]} : vector<6x128xf32> to vector<1x128xf32>
    %cst_91 = arith.constant dense<0.000000e+00> : vector<16xf32>
    %333 = vector.multi_reduction <add>, %330, %cst_91 [1] : vector<16x128xf32> to vector<16xf32>
    %334 = vector.shape_cast %333 : vector<16xf32> to vector<16x1xf32>
    %cst_92 = arith.constant 1.280000e+02 : f32
    %335 = vector.broadcast %cst_92 : f32 to vector<16x1xf32>
    %336 = arith.divf %334, %335 : vector<16x1xf32>
    %337 = vector.broadcast %336 : vector<16x1xf32> to vector<16x128xf32>
    %338 = arith.subf %330, %337 : vector<16x128xf32>
    %339 = arith.mulf %338, %338 : vector<16x128xf32>
    %cst_93 = arith.constant dense<0.000000e+00> : vector<16xf32>
    %340 = vector.multi_reduction <add>, %339, %cst_93 [1] : vector<16x128xf32> to vector<16xf32>
    %341 = vector.shape_cast %340 : vector<16xf32> to vector<16x1xf32>
    %cst_94 = arith.constant 1.280000e+02 : f32
    %342 = vector.broadcast %cst_94 : f32 to vector<16x1xf32>
    %343 = arith.divf %341, %342 : vector<16x1xf32>
    %344 = vector.broadcast %336 : vector<16x1xf32> to vector<16x128xf32>
    %345 = arith.subf %330, %344 : vector<16x128xf32>
    %cst_95 = arith.constant 9.99999996E-13 : f32
    %346 = vector.broadcast %cst_95 : f32 to vector<16x1xf32>
    %347 = arith.addf %343, %346 : vector<16x1xf32>
    %348 = math.rsqrt %347 : vector<16x1xf32>
    %349 = vector.broadcast %348 : vector<16x1xf32> to vector<16x128xf32>
    %350 = arith.mulf %345, %349 : vector<16x128xf32>
    %351 = vector.broadcast %331 : vector<1x128xf32> to vector<16x128xf32>
    %352 = arith.mulf %350, %351 : vector<16x128xf32>
    %353 = vector.broadcast %332 : vector<1x128xf32> to vector<16x128xf32>
    %354 = arith.addf %352, %353 : vector<16x128xf32>
    %355 = arith.truncf %354 : vector<16x128xf32> to vector<16x128xbf16>
    %c1_96 = arith.constant 1 : index
    %c0_97 = arith.constant 0 : index
    %c0_98 = arith.constant 0 : index
    %356 = vector.load %arg6[%c1_96, %c0_97, %c0_98] : memref<2x128x256xbf16, #tpu.memory_space<vmem>>, vector<1x128x256xbf16>
    %357 = vector.shape_cast %356 : vector<1x128x256xbf16> to vector<128x256xbf16>
    %cst_99 = arith.constant dense<0.000000e+00> : vector<16x256xf32>
    %358 = tpu.matmul %355, %357, %cst_99 {dimension_numbers = #tpu.dot_dimension_numbers<[1], [0], [0], [1], [0, 0, 1, 1], [], []>} : vector<16x128xbf16>, vector<128x256xbf16>, vector<16x256xf32> -> vector<16x256xf32>
    %c1_100 = arith.constant 1 : index
    %c0_101 = arith.constant 0 : index
    %c0_102 = arith.constant 0 : index
    %359 = vector.load %arg7[%c1_100, %c0_101, %c0_102] : memref<2x1x256xf32, #tpu.memory_space<vmem>>, vector<1x1x256xf32>
    %360 = vector.shape_cast %359 : vector<1x1x256xf32> to vector<1x256xf32>
    %361 = vector.broadcast %360 : vector<1x256xf32> to vector<16x256xf32>
    %362 = arith.addf %358, %361 : vector<16x256xf32>
    %363 = arith.mulf %362, %362 : vector<16x256xf32>
    %364 = arith.mulf %362, %363 : vector<16x256xf32>
    %cst_103 = arith.constant 4.471500e-02 : f32
    %365 = vector.broadcast %cst_103 : f32 to vector<16x256xf32>
    %366 = arith.mulf %365, %364 : vector<16x256xf32>
    %367 = arith.addf %362, %366 : vector<16x256xf32>
    %cst_104 = arith.constant 0.797884583 : f32
    %368 = vector.broadcast %cst_104 : f32 to vector<16x256xf32>
    %369 = arith.mulf %368, %367 : vector<16x256xf32>
    %370 = math.tanh %369 : vector<16x256xf32>
    %cst_105 = arith.constant 1.000000e+00 : f32
    %371 = vector.broadcast %cst_105 : f32 to vector<16x256xf32>
    %372 = arith.addf %371, %370 : vector<16x256xf32>
    %cst_106 = arith.constant 5.000000e-01 : f32
    %373 = vector.broadcast %cst_106 : f32 to vector<16x256xf32>
    %374 = arith.mulf %373, %372 : vector<16x256xf32>
    %375 = arith.mulf %362, %374 : vector<16x256xf32>
    %376 = arith.truncf %375 : vector<16x256xf32> to vector<16x256xbf16>
    %c1_107 = arith.constant 1 : index
    %c0_108 = arith.constant 0 : index
    %c0_109 = arith.constant 0 : index
    %377 = vector.load %arg8[%c1_107, %c0_108, %c0_109] : memref<2x256x128xbf16, #tpu.memory_space<vmem>>, vector<1x256x128xbf16>
    %378 = vector.shape_cast %377 : vector<1x256x128xbf16> to vector<256x128xbf16>
    %cst_110 = arith.constant dense<0.000000e+00> : vector<16x128xf32>
    %379 = tpu.matmul %376, %378, %cst_110 {dimension_numbers = #tpu.dot_dimension_numbers<[1], [0], [0], [1], [0, 0, 1, 1], [], []>} : vector<16x256xbf16>, vector<256x128xbf16>, vector<16x128xf32> -> vector<16x128xf32>
    %380 = vector.extract_strided_slice %218 {offsets = [3, 0], sizes = [1, 128], strides = [1, 1]} : vector<6x128xf32> to vector<1x128xf32>
    %381 = vector.broadcast %380 : vector<1x128xf32> to vector<16x128xf32>
    %382 = arith.addf %379, %381 : vector<16x128xf32>
    %383 = arith.addf %354, %382 : vector<16x128xf32>
    %384 = vector.extract_strided_slice %218 {offsets = [4, 0], sizes = [1, 128], strides = [1, 1]} : vector<6x128xf32> to vector<1x128xf32>
    %385 = vector.extract_strided_slice %218 {offsets = [5, 0], sizes = [1, 128], strides = [1, 1]} : vector<6x128xf32> to vector<1x128xf32>
    %cst_111 = arith.constant dense<0.000000e+00> : vector<16xf32>
    %386 = vector.multi_reduction <add>, %383, %cst_111 [1] : vector<16x128xf32> to vector<16xf32>
    %387 = vector.shape_cast %386 : vector<16xf32> to vector<16x1xf32>
    %cst_112 = arith.constant 1.280000e+02 : f32
    %388 = vector.broadcast %cst_112 : f32 to vector<16x1xf32>
    %389 = arith.divf %387, %388 : vector<16x1xf32>
    %390 = vector.broadcast %389 : vector<16x1xf32> to vector<16x128xf32>
    %391 = arith.subf %383, %390 : vector<16x128xf32>
    %392 = arith.mulf %391, %391 : vector<16x128xf32>
    %cst_113 = arith.constant dense<0.000000e+00> : vector<16xf32>
    %393 = vector.multi_reduction <add>, %392, %cst_113 [1] : vector<16x128xf32> to vector<16xf32>
    %394 = vector.shape_cast %393 : vector<16xf32> to vector<16x1xf32>
    %cst_114 = arith.constant 1.280000e+02 : f32
    %395 = vector.broadcast %cst_114 : f32 to vector<16x1xf32>
    %396 = arith.divf %394, %395 : vector<16x1xf32>
    %397 = vector.broadcast %389 : vector<16x1xf32> to vector<16x128xf32>
    %398 = arith.subf %383, %397 : vector<16x128xf32>
    %cst_115 = arith.constant 9.99999996E-13 : f32
    %399 = vector.broadcast %cst_115 : f32 to vector<16x1xf32>
    %400 = arith.addf %396, %399 : vector<16x1xf32>
    %401 = math.rsqrt %400 : vector<16x1xf32>
    %402 = vector.broadcast %401 : vector<16x1xf32> to vector<16x128xf32>
    %403 = arith.mulf %398, %402 : vector<16x128xf32>
    %404 = vector.broadcast %384 : vector<1x128xf32> to vector<16x128xf32>
    %405 = arith.mulf %403, %404 : vector<16x128xf32>
    %406 = vector.broadcast %385 : vector<1x128xf32> to vector<16x128xf32>
    %407 = arith.addf %405, %406 : vector<16x128xf32>
    %408 = vector.shape_cast %407 : vector<16x128xf32> to vector<2x8x128xf32>
    %cst_116 = arith.constant dense<0.000000e+00> : vector<2x128xf32>
    %409 = vector.multi_reduction <add>, %408, %cst_116 [1] : vector<2x8x128xf32> to vector<2x128xf32>
    %cst_117 = arith.constant 8.000000e+00 : f32
    %410 = vector.broadcast %cst_117 : f32 to vector<2x128xf32>
    %411 = arith.divf %409, %410 : vector<2x128xf32>
    %412 = arith.truncf %411 : vector<2x128xf32> to vector<2x128xbf16>
    %c0_118 = arith.constant 0 : index
    %c0_119 = arith.constant 0 : index
    %413 = vector.load %arg9[%c0_118, %c0_119] : memref<128x128xbf16, #tpu.memory_space<vmem>>, vector<128x128xbf16>
    %cst_120 = arith.constant dense<0.000000e+00> : vector<2x128xf32>
    %414 = tpu.matmul %412, %413, %cst_120 {dimension_numbers = #tpu.dot_dimension_numbers<[1], [0], [0], [1], [0, 0, 1, 1], [], []>} : vector<2x128xbf16>, vector<128x128xbf16>, vector<2x128xf32> -> vector<2x128xf32>
    %c0_121 = arith.constant 0 : index
    %c0_122 = arith.constant 0 : index
    %415 = vector.load %arg10[%c0_121, %c0_122] : memref<1x128xf32, #tpu.memory_space<vmem>>, vector<1x128xf32>
    %416 = vector.broadcast %415 : vector<1x128xf32> to vector<2x128xf32>
    %417 = arith.addf %414, %416 : vector<2x128xf32>
    %c0_123 = arith.constant 0 : index
    %c0_124 = arith.constant 0 : index
    %418 = vector.load %arg11[%c0_123, %c0_124] : memref<2x128xf32, #tpu.memory_space<vmem>>, vector<2x128xf32>
    tpu.vector_store %arg11[%c0_123, %c0_124], %417 {strides = array<i32>} : memref<2x128xf32, #tpu.memory_space<vmem>>, vector<2x128xf32>,
    return
  }
}

</mosaic_0001>

<bundles_post_ra>
// kernel: bert_fast_forward.1
= control target key start
LH: loop header
LB: loop body
LE: loop exit
PB: predicated region body
PF: predicated region fallthrough
CT: control target
= control target key end

     0   :  { %16 = vsyncpa [#allocation3], 0  ;;  %s5582_s0 = inlined_call_operand.vmem [shape: f32[16,128], index: 0, kind: input, shape index: {}]   ;;  %s5583_s1 = inlined_call_operand.vmem [shape: f32[2,128], index: 1, kind: input, shape index: {}]   ;;  %s5584_s2 = inlined_call_operand.hbm [shape: bf16[2,128,384], index: 2, kind: input, shape index: {}]   ;;  %s5585_s3 = inlined_call_operand.vmem [shape: f32[2,1,384], index: 3, kind: input, shape index: {}]   ;;  %s5586_s4 = inlined_call_operand.hbm [shape: bf16[2,128,128], index: 4, kind: input, shape index: {}]   ;;  %s5587_s5 = inlined_call_operand.vmem [shape: f32[2,6,128], index: 5, kind: input, shape index: {}]   ;;  %s5588_s6 = inlined_call_operand.vmem [shape: bf16[2,128,256], index: 6, kind: input, shape index: {}]   ;;  %s5589_s7 = inlined_call_operand.vmem [shape: f32[2,1,256], index: 7, kind: input, shape index: {}]   ;;  %s5590_s8 = inlined_call_operand.hbm [shape: bf16[2,256,128], index: 8, kind: input, shape index: {}]   ;;  %s5591_s9 = inlined_call_operand.hbm [shape: bf16[128,128], index: 9, kind: input, shape index: {}]   ;;  %s5592_s10 = inlined_call_operand.vmem [shape: f32[1,128], index: 10, kind: input, shape index: {}]   ;;  %s5593_s11 = inlined_call_operand.hbm [shape: f32[2,128], index: 11, kind: output, shape index: {}]  }
   0x1   :  { %17 = vsyncpa [#allocation6], 0 }
   0x2   :  { %18 = vsyncpa [#allocation9], 0 }
   0x3   :  { %19 = vsyncpa [#allocation4], 0  ;;  %s4798_s17 = smov [#allocation5]   ;;  %s4680_s21 = scalar_lea.hbm %s5586_s4, 2048 }
   0x4   :  { %s43_s18 = sshll.u32 %s4798_s17, 4  ;;  %p4681_p0 = scmp.ne.s32.totalorder %s5586_s4, %s4680_s21  ;;  %s44_s18 = int_to_ptr.vmem [resolvable:$true] %s43_s18 }
   0x5   :  { %p4684_p1 = scmp.lt.u32.totalorder %s4680_s21, %s5586_s4 }
   0x7   :  { %p4686_p2 = pnand %p4684_p1, %p4681_p0 }
   0x9   :  { %4689 = shalt.err (!%p4686_p2)
}
   0xa   :  { %s4690_s26 = scalar_lea.vmem %s44_s18, 2048  ;;  %p4695_p4 = scmp.lt.s32.totalorder %s44_s18, %s44_s18 }
   0xb   :  { %p4691_p3 = scmp.ne.s32.totalorder %s44_s18, %s4690_s26  ;;  %p4696_p5 = scmp.lt.s32.totalorder %s4690_s26, %s4690_s26 }
   0xd   :  { %p4697_p6 = por %p4696_p5, %p4695_p4 }
   0xf   :  { %p4698_p7 = pnand %p4697_p6, %p4691_p3 }
  0x11   :  { %4701 = shalt.err (!%p4698_p7)
}
  0x12   :  { %s4799_s27 = smov 64   ;;  %s4800_s28 = smov 4  }
  0x13   :  { %49 = dma.hbm_to_vmem [thread:$0]  %s5586_s4, 2048, %s44_s18, [#allocation6], %s4799_s27, %s4799_s27, %s4800_s28  }
  0x14   :  { %s4801_s12 = smov [#allocation2]   ;;  %s4702_s16 = scalar_lea.hbm %s5584_s2, 6144 }
  0x15   :  { %s29_s13 = sshll.u32 %s4801_s12, 4  ;;  %p4703_p8 = scmp.ne.s32.totalorder %s5584_s2, %s4702_s16  ;;  %s30_s13 = int_to_ptr.vmem [resolvable:$true] %s29_s13 }
  0x16   :  { %p4706_p9 = scmp.lt.u32.totalorder %s4702_s16, %s5584_s2 }
  0x18   :  { %p4708_p10 = pnand %p4706_p9, %p4703_p8 }
  0x1a   :  { %4711 = shalt.err (!%p4708_p10)
}
  0x1b   :  { %s4712_s22 = scalar_lea.vmem %s30_s13, 6144  ;;  %p4717_p12 = scmp.lt.s32.totalorder %s30_s13, %s30_s13 }
  0x1c   :  { %p4713_p11 = scmp.ne.s32.totalorder %s30_s13, %s4712_s22  ;;  %p4718_p13 = scmp.lt.s32.totalorder %s4712_s22, %s4712_s22 }
  0x1e   :  { %p4719_p0 = por %p4718_p13, %p4717_p12 }
  0x20   :  { %p4720_p1 = pnand %p4719_p0, %p4713_p11 }
  0x22   :  { %4723 = shalt.err (!%p4720_p1)
}
  0x23   :  { %s4802_s4 = smov 192   ;;  %s4803_s18 = smov 12  }
  0x24   :  { %35 = dma.hbm_to_vmem [thread:$0]  %s5584_s2, 6144, %s30_s13, [#allocation3], %s4802_s4, %s4802_s4, %s4803_s18  }
  0x25   :  { %s4804_s25 = smov [#allocation7]   ;;  %s4805_s29 = smov [#allocation8]  }
  0x26   :  { %s61_s26 = sshll.u32 %s4804_s25, 4  ;;  %s73_s30 = sshll.u32 %s4805_s29, 4  ;;  %s62_s26 = int_to_ptr.vmem [resolvable:$true] %s61_s26  ;;  %s4899_s30 = int_to_ptr.vmem [resolvable:$true] %s73_s30 }
  0x27   :  { %s4724_s15 = scalar_lea.hbm %s5590_s8, 4096 }
  0x28   :  { %p4725_p2 = scmp.ne.s32.totalorder %s5590_s8, %s4724_s15  ;;  %p4728_p3 = scmp.lt.u32.totalorder %s4724_s15, %s5590_s8 }
  0x2a   :  { %p4730_p4 = pnand %p4728_p3, %p4725_p2 }
  0x2c   :  { %4733 = shalt.err (!%p4730_p4)
}
  0x2d   :  { %s4734_s2 = scalar_lea.vmem %s62_s26, 4096  ;;  %p4739_p6 = scmp.lt.s32.totalorder %s62_s26, %s62_s26 }
  0x2e   :  { %p4735_p5 = scmp.ne.s32.totalorder %s62_s26, %s4734_s2  ;;  %p4740_p7 = scmp.lt.s32.totalorder %s4734_s2, %s4734_s2 }
  0x30   :  { %p4741_p8 = por %p4740_p7, %p4739_p6 }
  0x32   :  { %p4742_p9 = pnand %p4741_p8, %p4735_p5 }
  0x34   :  { %4745 = shalt.err (!%p4742_p9)
}
  0x35   :  { %67 = dma.hbm_to_vmem [thread:$0]  %s5590_s8, 4096, %s62_s26, [#allocation6], %s4799_s27, %s4799_s27, %s4800_s28  }
  0x36   :  { %s4746_s18 = scalar_lea.hbm %s5591_s9, 1024 }
  0x37   :  { %p4747_p10 = scmp.ne.s32.totalorder %s5591_s9, %s4746_s18  ;;  %p4750_p11 = scmp.lt.u32.totalorder %s4746_s18, %s5591_s9 }
  0x39   :  { %p4752_p12 = pnand %p4750_p11, %p4747_p10 }
  0x3b   :  { %4755 = shalt.err (!%p4752_p12)
}
  0x3c   :  { %s4756_s12 = scalar_lea.vmem %s4899_s30, 1024  ;;  %p4761_p0 = scmp.lt.s32.totalorder %s4899_s30, %s4899_s30 }
  0x3d   :  { %p4757_p13 = scmp.ne.s32.totalorder %s4899_s30, %s4756_s12  ;;  %p4762_p1 = scmp.lt.s32.totalorder %s4756_s12, %s4756_s12 }
  0x3f   :  { %p4763_p2 = por %p4762_p1, %p4761_p0 }
  0x41   :  { %p4764_p3 = pnand %p4763_p2, %p4757_p13 }
  0x43   :  { %4767 = shalt.err (!%p4764_p3)
}
  0x44   :  { %79 = dma.hbm_to_vmem [thread:$0]  %s5591_s9, 1024, %s4899_s30, [#allocation9], %s4799_s27, %s4799_s27, %s4800_s28  }
  0x45   :  { %4790 = dma.done.wait [#allocation3], 6144  }
  0x46   :  { %4791 = vsyncadd [#allocation3], 4294961152 }
  0x47   :  { %4792 = dma.done.wait [#allocation6], 6144  }
  0x48   :  { %4793 = vsyncadd [#allocation6], 4294961152 }
  0x49   :  { %4794 = dma.done.wait [#allocation9], 1024  }
  0x4a   :  { %4795 = vsyncadd [#allocation9], 4294966272  ;;  %v96_v0 = vld [vmem:[%s5582_s0] sm:$0xff]  ;;  %v97_v1 = vld [vmem:[%s5582_s0 + $0x8] sm:$0xff]  ;;  %v4806_v4 = vmov 0.0   ;;  %v4807_v30 = vmov 0   ;;  %v121_v40 = vlaneseq }
  0x4b   :  { %98 = vadd.xlane.f32.xlu0 %v96_v0  ;;  %v4412_v2 = vld [vmem:[#allocation2 + $0x4] ss:$12 sps:$4 sm:$0xff]   ;;  %v4414_v3 = vld [vmem:[#allocation2] ss:$12 sps:$4 sm:$0xff]   ;;  %4076 = vmatprep.subr.bf16.mxu1 %v4806_v4  ;;  %v4415_v5 = vld [vmem:[#allocation2 + $0x8] ss:$12 sps:$4 sm:$0xff]  }
  0x4c   :  { %v4416_v6 = vld [vmem:[#allocation2 + $0x1c] ss:$12 sps:$4 sm:$0xff]   ;;  %312 = vmatprep.subr.bf16.mxu0 %v4412_v2  ;;  %4077 = vmatpush3.bf16.msra.mxu1 %v4415_v5  ;;  %v4418_v15 = vld [vmem:[#allocation2 + $0x18] ss:$12 sps:$4 sm:$0xff]   ;;  %v4419_v16 = vld [vmem:[#allocation2 + $0x20] ss:$12 sps:$4 sm:$0xff]  }
  0x4d   :  { %313 = vmatpush1.bf16.msra.mxu0 %v4414_v3  ;;  %4078 = vmatprep.subr.bf16.mxu1 %v4806_v4  ;;  %v4420_v17 = vld [vmem:[#allocation2 + $0x34] ss:$12 sps:$4 sm:$0xff]   ;;  %v4422_v18 = vld [vmem:[#allocation2 + $0x30] ss:$12 sps:$4 sm:$0xff]   ;;  %v4423_v19 = vld [vmem:[#allocation2 + $0x38] ss:$12 sps:$4 sm:$0xff]  }
  0x4e   :  { %314 = vmatprep.subr.bf16.mxu0 %v4416_v6  ;;  %v4424_v20 = vld [vmem:[#allocation2 + $0x4c] ss:$12 sps:$4 sm:$0xff]   ;;  %v4426_v21 = vld [vmem:[#allocation2 + $0x48] ss:$12 sps:$4 sm:$0xff]   ;;  %v4427_v22 = vld [vmem:[#allocation2 + $0x50] ss:$12 sps:$4 sm:$0xff]   ;;  %344 = vmatprep.mubr.bf16.mxu0 %v4807_v30 }
  0x4f   :  { %100 = vadd.xlane.f32.xlu0 %v97_v1  ;;  %v4428_v23 = vld [vmem:[#allocation2 + $0x64] ss:$12 sps:$4 sm:$0xff]   ;;  %v4430_v24 = vld [vmem:[#allocation2 + $0x60] ss:$12 sps:$4 sm:$0xff]   ;;  %v4431_v25 = vld [vmem:[#allocation2 + $0x68] ss:$12 sps:$4 sm:$0xff]  }
  0x50   :  { %4079 = vmatpush3.bf16.msra.mxu1 %v4419_v16  ;;  %v4432_v26 = vld [vmem:[#allocation2 + $0x7c] ss:$12 sps:$4 sm:$0xff]   ;;  %v4434_v27 = vld [vmem:[#allocation2 + $0x78] ss:$12 sps:$4 sm:$0xff]   ;;  %v4435_v28 = vld [vmem:[#allocation2 + $0x80] ss:$12 sps:$4 sm:$0xff]  }
  0x51   :  { %315 = vmatpush1.bf16.msra.mxu0 %v4418_v15  ;;  %4080 = vmatprep.subr.bf16.mxu1 %v4806_v4  ;;  %v4436_v29 = vld [vmem:[#allocation2 + $0x94] ss:$12 sps:$4 sm:$0xff]   ;;  %vm4808_vm0 = vmmov 0   ;;  %v4438_v31 = vld [vmem:[#allocation2 + $0x90] ss:$12 sps:$4 sm:$0xff]   ;;  %v4963_v43 = vshrl.u32 %v121_v40, 7 }
  0x52   :  { %316 = vmatprep.subr.bf16.mxu0 %v4420_v17  ;;  %4092 = vmatprep.mubr.msk.bf16.mxu1 %vm4808_vm0, %v4806_v4  ;;  %v4439_v32 = vld [vmem:[#allocation2 + $0x98] ss:$12 sps:$4 sm:$0xff]   ;;  %v4442_v34 = vld [vmem:[#allocation2 + $0xa8] ss:$12 sps:$4 sm:$0xff]   ;;  %v4443_v35 = vld [vmem:[#allocation2 + $0xb0] ss:$12 sps:$4 sm:$0xff]  }
  0x53   :  { %v4440_v33 = vld [vmem:[#allocation2 + $0xac] ss:$12 sps:$4 sm:$0xff]   ;;  %v4966_v44 = vsub.s32 0, %v4963_v43  ;;  %v95_v45 = vld [vmem:[%s5583_s1] sm:$0x3]  ;;  %v4974_v49 = vsub.s32 1, %v4963_v43 }
  0x54   :  { %4081 = vmatpush3.bf16.msra.mxu1 %v4423_v19  ;;  %v167_v58 = vld [vmem:[%s5585_s3] sm:$0x7]  ;;  %v4992_v59 = vsub.s32 2, %v4963_v43  ;;  %vm402_vm1 = vcmask 261120   ;;  %vm523_vm2 = vcmask 1043456   ;;  %vm495_vm3 = vcmask 64512  }
  0x55   :  { %317 = vmatpush1.bf16.msra.mxu0 %v4422_v18  ;;  %4082 = vmatprep.subr.bf16.mxu1 %v4806_v4  ;;  %v124_v48 = vrot.slane %v95_v45, %v4966_v44  ;;  %v130_v53 = vrot.slane %v95_v45, %v4974_v49  ;;  %v176_v60 = vrot.slane %v167_v58, %v4974_v49  ;;  %s4809_s30 = smov 96   ;;  %s4810_s19 = smov 32   ;;  %vm1305_vm4 = vcmask 523264  }
  0x56   :  { %318 = vmatprep.subr.bf16.mxu0 %v4424_v20  ;;  %vm1308_vm5 = vcmask 785408   ;;  %vm3625_vm6 = vcmask 1041409   ;;  %s4811_s1 = smov [#allocation10]  }
  0x57   :  { %s3724_s28 = sshll.u32 %s4811_s1, 4  ;;  %s3725_s28 = int_to_ptr.vmem [resolvable:$true] %s3724_s28 }
  0x58   :  { %4083 = vmatpush3.bf16.msra.mxu1 %v4427_v22  ;;  %s4768_s20 = scalar_lea.vmem %s3725_s28, 32  ;;  %p4773_p5 = scmp.lt.s32.totalorder %s3725_s28, %s3725_s28 }
  0x59   :  { %319 = vmatpush1.bf16.msra.mxu0 %v4426_v21  ;;  %4084 = vmatprep.subr.bf16.mxu1 %v4806_v4  ;;  %p4769_p4 = scmp.ne.s32.totalorder %s3725_s28, %s4768_s20  ;;  %p4774_p6 = scmp.lt.s32.totalorder %s4768_s20, %s4768_s20 }
  0x5a   :  { %320 = vmatprep.subr.bf16.mxu0 %v4428_v23 }
  0x5b   :  { %p4775_p7 = por %p4774_p6, %p4773_p5 }
  0x5c   :  { %4085 = vmatpush3.bf16.msra.mxu1 %v4431_v25 }
  0x5d   :  { %321 = vmatpush1.bf16.msra.mxu0 %v4430_v24  ;;  %4086 = vmatprep.subr.bf16.mxu1 %v4806_v4  ;;  %p4776_p8 = pnand %p4775_p7, %p4769_p4 }
  0x5e   :  { %322 = vmatprep.subr.bf16.mxu0 %v4432_v26 }
  0x60   :  { %4087 = vmatpush3.bf16.msra.mxu1 %v4435_v28 }
  0x61   :  { %323 = vmatpush1.bf16.msra.mxu0 %v4434_v27  ;;  %4088 = vmatprep.subr.bf16.mxu1 %v4806_v4 }
  0x62   :  { %324 = vmatprep.subr.bf16.mxu0 %v4436_v29 }
  0x64   :  { %4089 = vmatpush3.bf16.msra.mxu1 %v4439_v32 }
  0x65   :  { %325 = vmatpush1.bf16.msra.mxu0 %v4438_v31  ;;  %4090 = vmatprep.subr.bf16.mxu1 %v4806_v4 }
  0x66   :  { %326 = vmatprep.subr.bf16.mxu0 %v4440_v33 }
  0x68   :  { %4091 = vmatpush3.bf16.msra.mxu1 %v4443_v35 }
  0x69   :  { %327 = vmatpush1.bf16.msra.mxu0 %v4442_v34  ;;  %4102 = vmatprep.subr.bf16.mxu1 %v4806_v4 }
  0x6a   :  { %4096 = vmatprep.subr.bf16.mxu0 %v4806_v4 }
  0xd8   :  { %v99_v7 = vpop.xlane.xlu0 %98 }
  0xd9   :  { %v103_v8 = vmul.f32 0.0078125, %v99_v7 }
  0xdb   :  { %v4944_v9 = vsub.f32 %v96_v0, %v103_v8  ;;  %v172_v8 = vrot.slane %v167_v58, %v4966_v44 }
  0xdc   :  { %v101_v10 = vpop.xlane.xlu0 %100 }
  0xdd   :  { %v104_v11 = vmul.f32 0.0078125, %v101_v10  ;;  %v107_v12 = vmul.f32 %v4944_v9, %v4944_v9 }
  0xdf   :  { %v4948_v13 = vsub.f32 %v97_v1, %v104_v11  ;;  %109 = vadd.xlane.f32.xlu1 %v107_v12  ;;  %v180_v1 = vrot.slane %v167_v58, %v4992_v59 }
  0xe1   :  { %v108_v14 = vmul.f32 %v4948_v13, %v4948_v13 }
  0xe3   :  { %111 = vadd.xlane.f32.xlu1 %v108_v14 }
 0x16c   :  { %v110_v36 = vpop.xlane.xlu1 %109 }
 0x16d   :  { %v113_v37 = vmul.f32 0.0078125, %v110_v36 }
 0x16f   :  { %v115_v38 = vadd.f32 1e-12, %v113_v37 }
 0x170   :  { %v112_v39 = vpop.xlane.xlu1 %111 }
 0x171   :  { %4580 = vrsqrt.f32 %v115_v38  ;;  %v114_v41 = vmul.f32 0.0078125, %v112_v39 }
 0x173   :  { %v116_v42 = vadd.f32 1e-12, %v114_v41 }
 0x175   :  { %4582 = vrsqrt.f32 %v116_v42 }
 0x17b   :  { %v4581_v46 = vpop.eup %4580 }
 0x17c   :  { %v119_v47 = vmul.f32 %v4581_v46, %v4944_v9 }
 0x17e   :  { %v125_v52 = vmul.f32 %v124_v48, %v119_v47 }
 0x17f   :  { %v4583_v50 = vpop.eup %4582 }
 0x180   :  { %v120_v51 = vmul.f32 %v4583_v50, %v4948_v13  ;;  %v4978_v55 = vadd.f32 %v130_v53, %v125_v52 }
 0x182   :  { %v126_v54 = vmul.f32 %v124_v48, %v120_v51 }
 0x184   :  { %v4980_v56 = vadd.f32 %v130_v53, %v126_v54 }
 0x186   :  { %v134_v57 = vpack.c.bf16 %v4980_v56, %v4978_v55 }
 0x188   :  { %345 = vmatmul.mubr.bf16.vlgmr.msra.gmra.mrb[0].mxu0 %v134_v57  ;;  %4093 = vmatmul.mubr.bf16.vlgmr.msra.gmra.mrb[0].mxu1 %v134_v57 }
 0x189   :  { %4098 = vmatprep.mubr.msk.bf16.mxu0 %vm4808_vm0, %v4806_v4  ;;  %4104 = vmatprep.mubr.msk.bf16.mxu1 %vm4808_vm0, %v4806_v4 }
 0x25b   :  { %v346_v61 = vpop.f32.mrb[0].mxu0  ;;  %v389_v62 = vpop.f32.mrb[0].mxu1 }
 0x25c   :  { %v348_v63 = vpop.f32.mrb[1].mxu0  ;;  %v4094_v0 = vpop.f32.mrb[1].mxu1  ;;  %v390_v11 = vadd.f32 %v389_v62, %v180_v1  ;;  %v347_v14 = vadd.f32 %v346_v61, %v172_v8 }
 0x25d   :  { %v349_v2 = vadd.f32 %v348_v63, %v176_v60  ;;  %v350_v3 = vpop.f32.mrb[2].mxu0  ;;  %v392_v5 = vpop.f32.mrb[2].mxu1 }
 0x25e   :  { %v352_v6 = vpop.f32.mrb[3].mxu0  ;;  %v4095_v7 = vpop.f32.mrb[3].mxu1  ;;  %v393_v15 = vadd.f32 %v392_v5, %v180_v1  ;;  %v5006_v17 = vpack.c.bf16 %v390_v11, %v390_v11  ;;  %v351_v18 = vadd.f32 %v350_v3, %v172_v8  ;;  %v5009_v19 = vpack.c.bf16 %v347_v14, %v347_v14 }
 0x25f   :  { %v4997_v9 = vpack.c.bf16 %v349_v2, %v349_v2  ;;  %v353_v10 = vadd.f32 %v352_v6, %v176_v60 }
 0x260   :  { %v5011_v20 = vpack.c.bf16 %v393_v15, %v393_v15  ;;  %v5013_v21 = vpack.c.bf16 %v351_v18, %v351_v18  ;;  %v525_v22 = vsel %vm523_vm2, %v5006_v17, 0 }
 0x261   :  { %v4999_v12 = vpack.c.bf16 %v353_v10, %v353_v10  ;;  %v407_v13 = vsel %vm402_vm1, %v4997_v9, 0 }
 0x262   :  { %4097 = vmatpush3.bf16.xpose.msra.mxu0 %v407_v13  ;;  %v571_v23 = vsel %vm523_vm2, %v5011_v20, 0 }
 0x263   :  { %v453_v16 = vsel %vm402_vm1, %v4999_v12, 0  ;;  %4108 = vmatprep.subr.bf16.mxu0 %v4806_v4 }
 0x264   :  { %4103 = vmatpush3.bf16.xpose.msra.mxu1 %v453_v16 }
 0x265   :  { %4114 = vmatprep.subr.bf16.mxu1 %v4806_v4 }
 0x269   :  { %4099 = vmatmul.mubr.msk.bf16.vlgmr.msra.gmra.mrb[4].mxu0 %vm402_vm1, %v5009_v19 }
 0x26a   :  { %4109 = vmatpush3.bf16.msra.mxu0 %v525_v22  ;;  %4110 = vmatprep.mubr.msk.bf16.mxu0 %vm4808_vm0, %v4806_v4 }
 0x26b   :  { %4105 = vmatmul.mubr.msk.bf16.vlgmr.msra.gmra.mrb[4].mxu1 %vm402_vm1, %v5013_v21  ;;  %4120 = vmatprep.subr.bf16.mxu0 %v4806_v4 }
 0x26c   :  { %4115 = vmatpush3.bf16.msra.mxu1 %v571_v23  ;;  %4116 = vmatprep.mubr.msk.bf16.mxu1 %vm4808_vm0, %v4806_v4 }
 0x26d   :  { %4126 = vmatprep.subr.bf16.mxu1 %v4806_v4 }
 0x33c   :  { %v443_v24 = vpop.f32.mrb[4].mxu0 }
 0x33d   :  { %v4100_v25 = vpop.f32.mrb[5].mxu0  ;;  %v496_v26 = vsel %vm495_vm3, %v443_v24, -inf }
 0x33e   :  { %v489_v27 = vpop.f32.mrb[4].mxu1  ;;  %497 = vmax.xlane.f32.xlu0 %v496_v26  ;;  %v446_v28 = vpop.f32.mrb[6].mxu0 }
 0x33f   :  { %v4101_v29 = vpop.f32.mrb[7].mxu0  ;;  %v4106_v31 = vpop.f32.mrb[5].mxu1  ;;  %v499_v32 = vsel %vm495_vm3, %v489_v27, -inf }
 0x340   :  { %500 = vmax.xlane.f32.xlu1 %v499_v32  ;;  %v492_v33 = vpop.f32.mrb[6].mxu1 }
 0x341   :  { %v4107_v34 = vpop.f32.mrb[7].mxu1 }
 0x351   :  { %669 = vrot.lane.b32.xlu1 %v4999_v12, %s4809_s30 }
 0x3cb   :  { %v498_v35 = vpop.xlane.xlu0 %497 }
 0x3cc   :  { %v502_v36 = vsub.f32 %v443_v24, %v498_v35 }
 0x3cd   :  { %v501_v37 = vpop.xlane.xlu1 %500 }
 0x3ce   :  { %v504_v38 = vmul.f32 1.442695, %v502_v36  ;;  %v503_v39 = vsub.f32 %v489_v27, %v501_v37 }
 0x3d0   :  { %4584 = vpow2.f32 %v504_v38  ;;  %v506_v40 = vmul.f32 1.442695, %v503_v39 }
 0x3d1   :  { %v670_v47 = vpop.permute.xlu1 %669 }
 0x3d2   :  { %4586 = vpow2.f32 %v506_v40  ;;  %v675_v62 = vsel %vm402_vm1, %v670_v47, 0 }
 0x3da   :  { %v4585_v41 = vpop.eup %4584 }
 0x3db   :  { %v508_v42 = vsel %vm495_vm3, %v4585_v41, 0.0 }
 0x3dc   :  { %v4587_v45 = vpop.eup %4586  ;;  %509 = vadd.xlane.f32.xlu0 %v508_v42 }
 0x3dd   :  { %v511_v46 = vsel %vm495_vm3, %v4587_v45, 0.0 }
 0x3de   :  { %512 = vadd.xlane.f32.xlu1 %v511_v46 }
 0x3ef   :  { %614 = vrot.lane.b32.xlu1 %v5009_v19, %s4809_s30 }
 0x3f2   :  { %617 = vrot.lane.b32.xlu0 %v4997_v9, %s4809_s30 }
 0x3f3   :  { %666 = vrot.lane.b32.xlu1 %v5013_v21, %s4809_s30 }
 0x469   :  { %v510_v48 = vpop.xlane.xlu0 %509 }
 0x46a   :  { %4588 = vrcp.f32 %v510_v48 }
 0x46b   :  { %v513_v50 = vpop.xlane.xlu1 %512 }
 0x46c   :  { %4590 = vrcp.f32 %v513_v50 }
 0x46d   :  { %v618_v54 = vpop.permute.xlu0 %617 }
 0x46e   :  { %v623_v60 = vsel %vm402_vm1, %v618_v54, 0 }
 0x46f   :  { %v615_v63 = vpop.permute.xlu1 %614 }
 0x473   :  { %v667_v0 = vpop.permute.xlu1 %666 }
 0x474   :  { %v4589_v51 = vpop.eup %4588 }
 0x475   :  { %v516_v52 = vmul.f32 %v4589_v51, %v4585_v41 }
 0x476   :  { %v4591_v53 = vpop.eup %4590 }
 0x477   :  { %v517_v57 = vmul.f32 %v4591_v53, %v4587_v45  ;;  %v518_v58 = vpack.c.bf16 %v516_v52, %v516_v52 }
 0x479   :  { %4111 = vmatmul.mubr.msk.bf16.vlgmr.msra.gmra.mrb[8].mxu0 %vm495_vm3, %v518_v58  ;;  %v519_v61 = vpack.c.bf16 %v517_v57, %v517_v57 }
 0x47a   :  { %4121 = vmatpush3.bf16.xpose.msra.mxu0 %v623_v60  ;;  %4122 = vmatprep.mubr.msk.bf16.mxu0 %vm4808_vm0, %v4806_v4 }
 0x47b   :  { %4117 = vmatmul.mubr.msk.bf16.vlgmr.msra.gmra.mrb[8].mxu1 %vm495_vm3, %v519_v61  ;;  %4132 = vmatprep.subr.bf16.mxu0 %v4806_v4 }
 0x47c   :  { %4127 = vmatpush3.bf16.xpose.msra.mxu1 %v675_v62  ;;  %4128 = vmatprep.mubr.msk.bf16.mxu1 %vm4808_vm0, %v4806_v4 }
 0x47d   :  { %4138 = vmatprep.subr.bf16.mxu1 %v4806_v4 }
 0x481   :  { %4123 = vmatmul.mubr.msk.bf16.vlgmr.msra.gmra.mrb[12].mxu0 %vm402_vm1, %v615_v63 }
 0x482   :  { %4134 = vmatprep.mubr.msk.bf16.mxu0 %vm4808_vm0, %v4806_v4 }
 0x483   :  { %4129 = vmatmul.mubr.msk.bf16.vlgmr.msra.gmra.mrb[12].mxu1 %vm402_vm1, %v667_v0 }
 0x484   :  { %4140 = vmatprep.mubr.msk.bf16.mxu1 %vm4808_vm0, %v4806_v4 }
 0x54c   :  { %v5057_v1 = vpop.f32.mrb[8].mxu0 }
 0x54d   :  { %v4112_v2 = vpop.f32.mrb[9].mxu0 }
 0x54e   :  { %v564_v3 = vpop.f32.mrb[10].mxu0  ;;  %v5059_v5 = vpop.f32.mrb[8].mxu1 }
 0x54f   :  { %v4113_v6 = vpop.f32.mrb[11].mxu0  ;;  %v4118_v7 = vpop.f32.mrb[9].mxu1 }
 0x550   :  { %v610_v8 = vpop.f32.mrb[10].mxu1 }
 0x551   :  { %v4119_v10 = vpop.f32.mrb[11].mxu1 }
 0x554   :  { %v659_v11 = vpop.f32.mrb[12].mxu0 }
 0x555   :  { %v4124_v13 = vpop.f32.mrb[13].mxu0  ;;  %v717_v14 = vsel %vm495_vm3, %v659_v11, -inf }
 0x556   :  { %v711_v15 = vpop.f32.mrb[12].mxu1  ;;  %718 = vmax.xlane.f32.xlu0 %v717_v14  ;;  %v662_v16 = vpop.f32.mrb[14].mxu0 }
 0x557   :  { %v4125_v18 = vpop.f32.mrb[15].mxu0  ;;  %v4130_v22 = vpop.f32.mrb[13].mxu1  ;;  %v720_v23 = vsel %vm495_vm3, %v711_v15, -inf }
 0x558   :  { %721 = vmax.xlane.f32.xlu1 %v720_v23  ;;  %v714_v24 = vpop.f32.mrb[14].mxu1 }
 0x559   :  { %v4131_v25 = vpop.f32.mrb[15].mxu1 }
 0x569   :  { %791 = vrot.lane.b32.xlu1 %v5011_v20, %s4809_s30 }
 0x56d   :  { %841 = vrot.lane.b32.xlu1 %v4997_v9, %s4799_s27 }
 0x571   :  { %891 = vrot.lane.b32.xlu1 %v4999_v12, %s4799_s27 }
 0x575   :  { %889 = vrot.lane.b32.xlu1 %v5013_v21, %s4799_s27 }
 0x5e3   :  { %v719_v26 = vpop.xlane.xlu0 %718 }
 0x5e4   :  { %v723_v27 = vsub.f32 %v659_v11, %v719_v26 }
 0x5e5   :  { %v722_v28 = vpop.xlane.xlu1 %721 }
 0x5e6   :  { %v725_v29 = vmul.f32 1.442695, %v723_v27  ;;  %v724_v31 = vsub.f32 %v711_v15, %v722_v28 }
 0x5e8   :  { %4592 = vpow2.f32 %v725_v29  ;;  %v727_v32 = vmul.f32 1.442695, %v724_v31 }
 0x5e9   :  { %v792_v33 = vpop.permute.xlu1 %791 }
 0x5ea   :  { %4594 = vpow2.f32 %v727_v32  ;;  %v797_v34 = vsel %vm523_vm2, %v792_v33, 0 }
 0x5eb   :  { %4139 = vmatpush3.bf16.msra.mxu1 %v797_v34 }
 0x5ec   :  { %4150 = vmatprep.subr.bf16.mxu1 %v4806_v4 }
 0x5ed   :  { %v842_v46 = vpop.permute.xlu1 %841 }
 0x5ee   :  { %v847_v53 = vsel %vm402_vm1, %v842_v46, 0 }
 0x5f1   :  { %v892_v52 = vpop.permute.xlu1 %891 }
 0x5f2   :  { %v4593_v35 = vpop.eup %4592  ;;  %v897_v57 = vsel %vm402_vm1, %v892_v52, 0 }
 0x5f3   :  { %v729_v36 = vsel %vm495_vm3, %v4593_v35, 0.0 }
 0x5f4   :  { %v4595_v37 = vpop.eup %4594  ;;  %730 = vadd.xlane.f32.xlu0 %v729_v36 }
 0x5f5   :  { %v732_v38 = vsel %vm495_vm3, %v4595_v37, 0.0  ;;  %v890_v60 = vpop.permute.xlu1 %889 }
 0x5f8   :  { %733 = vadd.xlane.f32.xlu0 %v732_v38 }
 0x60e   :  { %742 = vrot.lane.b32.xlu0 %v5006_v17, %s4809_s30 }
 0x612   :  { %839 = vrot.lane.b32.xlu0 %v5009_v19, %s4799_s27 }
 0x681   :  { %v731_v39 = vpop.xlane.xlu0 %730 }
 0x682   :  { %4596 = vrcp.f32 %v731_v39 }
 0x685   :  { %v734_v40 = vpop.xlane.xlu0 %733 }
 0x686   :  { %4598 = vrcp.f32 %v734_v40 }
 0x689   :  { %v743_v41 = vpop.permute.xlu0 %742 }
 0x68a   :  { %v748_v42 = vsel %vm523_vm2, %v743_v41, 0 }
 0x68b   :  { %4133 = vmatpush3.bf16.msra.mxu0 %v748_v42 }
 0x68c   :  { %v4597_v45 = vpop.eup %4596  ;;  %4144 = vmatprep.subr.bf16.mxu0 %v4806_v4 }
 0x68d   :  { %v737_v47 = vmul.f32 %v4597_v45, %v4593_v35  ;;  %v840_v58 = vpop.permute.xlu0 %839 }
 0x68f   :  { %v739_v48 = vpack.c.bf16 %v737_v47, %v737_v47 }
 0x690   :  { %v4599_v50 = vpop.eup %4598 }
 0x691   :  { %v738_v51 = vmul.f32 %v4599_v50, %v4595_v37  ;;  %4135 = vmatmul.mubr.msk.bf16.vlgmr.msra.gmra.mrb[16].mxu0 %vm495_vm3, %v739_v48 }
 0x692   :  { %4146 = vmatprep.mubr.msk.bf16.mxu0 %vm4808_vm0, %v4806_v4 }
 0x693   :  { %v740_v54 = vpack.c.bf16 %v738_v51, %v738_v51 }
 0x694   :  { %4145 = vmatpush3.bf16.xpose.msra.mxu0 %v847_v53 }
 0x695   :  { %4141 = vmatmul.mubr.msk.bf16.vlgmr.msra.gmra.mrb[16].mxu1 %vm495_vm3, %v740_v54  ;;  %4156 = vmatprep.subr.bf16.mxu0 %v4806_v4 }
 0x696   :  { %4151 = vmatpush3.bf16.xpose.msra.mxu1 %v897_v57  ;;  %4152 = vmatprep.mubr.msk.bf16.mxu1 %vm4808_vm0, %v4806_v4 }
 0x697   :  { %4162 = vmatprep.subr.bf16.mxu1 %v4806_v4 }
 0x69b   :  { %4147 = vmatmul.mubr.msk.bf16.vlgmr.msra.gmra.mrb[20].mxu0 %vm402_vm1, %v840_v58 }
 0x69c   :  { %4158 = vmatprep.mubr.msk.bf16.mxu0 %vm4808_vm0, %v4806_v4 }
 0x69d   :  { %4153 = vmatmul.mubr.msk.bf16.vlgmr.msra.gmra.mrb[20].mxu1 %vm402_vm1, %v890_v60 }
 0x69e   :  { %4164 = vmatprep.mubr.msk.bf16.mxu1 %vm4808_vm0, %v4806_v4 }
 0x764   :  { %v5097_v61 = vpop.f32.mrb[16].mxu0 }
 0x765   :  { %v4136_v62 = vpop.f32.mrb[17].mxu0 }
 0x766   :  { %v787_v63 = vpop.f32.mrb[18].mxu0 }
 0x767   :  { %v4137_v0 = vpop.f32.mrb[19].mxu0 }
 0x768   :  { %v5099_v2 = vpop.f32.mrb[16].mxu1 }
 0x769   :  { %v4382_v3 = vpack.i.bf16 %v5099_v2, %v5097_v61  ;;  %v4142_v6 = vpop.f32.mrb[17].mxu1 }
 0x76a   :  { %v836_v7 = vpop.f32.mrb[18].mxu1 }
 0x76b   :  { %v4143_v8 = vpop.f32.mrb[19].mxu1 }
 0x76e   :  { %v883_v10 = vpop.f32.mrb[20].mxu0 }
 0x76f   :  { %v4148_v11 = vpop.f32.mrb[21].mxu0  ;;  %v939_v13 = vsel %vm495_vm3, %v883_v10, -inf }
 0x770   :  { %v933_v14 = vpop.f32.mrb[20].mxu1  ;;  %940 = vmax.xlane.f32.xlu0 %v939_v13  ;;  %v886_v15 = vpop.f32.mrb[22].mxu0 }
 0x771   :  { %v4149_v16 = vpop.f32.mrb[23].mxu0  ;;  %v4154_v18 = vpop.f32.mrb[21].mxu1  ;;  %v942_v22 = vsel %vm495_vm3, %v933_v14, -inf }
 0x772   :  { %943 = vmax.xlane.f32.xlu1 %v942_v22  ;;  %v936_v23 = vpop.f32.mrb[22].mxu1 }
 0x773   :  { %v4155_v24 = vpop.f32.mrb[23].mxu1 }
 0x783   :  { %1011 = vrot.lane.b32.xlu1 %v5011_v20, %s4799_s27 }
 0x787   :  { %1061 = vrot.lane.b32.xlu1 %v4997_v9, %s4810_s19 }
 0x78b   :  { %1111 = vrot.lane.b32.xlu1 %v4999_v12, %s4810_s19 }
 0x78f   :  { %1109 = vrot.lane.b32.xlu1 %v5013_v21, %s4810_s19 }
 0x7fd   :  { %v941_v25 = vpop.xlane.xlu0 %940 }
 0x7fe   :  { %v945_v26 = vsub.f32 %v883_v10, %v941_v25 }
 0x7ff   :  { %v944_v27 = vpop.xlane.xlu1 %943 }
 0x800   :  { %v947_v28 = vmul.f32 1.442695, %v945_v26  ;;  %v946_v29 = vsub.f32 %v933_v14, %v944_v27 }
 0x802   :  { %4600 = vpow2.f32 %v947_v28  ;;  %v949_v31 = vmul.f32 1.442695, %v946_v29 }
 0x803   :  { %v1012_v32 = vpop.permute.xlu1 %1011 }
 0x804   :  { %4602 = vpow2.f32 %v949_v31  ;;  %v1017_v33 = vsel %vm523_vm2, %v1012_v32, 0 }
 0x805   :  { %4163 = vmatpush3.bf16.msra.mxu1 %v1017_v33 }
 0x806   :  { %4174 = vmatprep.subr.bf16.mxu1 %v4806_v4 }
 0x807   :  { %v1062_v40 = vpop.permute.xlu1 %1061 }
 0x80b   :  { %v1112_v47 = vpop.permute.xlu1 %1111 }
 0x80c   :  { %v4601_v9 = vpop.eup %4600  ;;  %v1117_v50 = vsel %vm402_vm1, %v1112_v47, 0  ;;  %v4451_v47 = vld [vmem:[#allocation5 + $0x38] sm:$0xff]  }
 0x80d   :  { %v951_v12 = vsel %vm495_vm3, %v4601_v9, 0.0 }
 0x80e   :  { %v4603_v34 = vpop.eup %4602  ;;  %952 = vadd.xlane.f32.xlu0 %v951_v12 }
 0x80f   :  { %v954_v21 = vsel %vm495_vm3, %v4603_v34, 0.0  ;;  %v1110_v52 = vpop.permute.xlu1 %1109 }
 0x812   :  { %955 = vadd.xlane.f32.xlu0 %v954_v21 }
 0x828   :  { %963 = vrot.lane.b32.xlu0 %v5006_v17, %s4799_s27 }
 0x82c   :  { %1059 = vrot.lane.b32.xlu0 %v5009_v19, %s4810_s19  ;;  %v1067_v19 = vsel %vm402_vm1, %v1062_v40, 0  ;;  %v4446_v40 = vld [vmem:[#allocation5 + $0x10] sm:$0xff]  }
 0x89b   :  { %v953_v35 = vpop.xlane.xlu0 %952 }
 0x89c   :  { %4604 = vrcp.f32 %v953_v35 }
 0x89f   :  { %v956_v36 = vpop.xlane.xlu0 %955 }
 0x8a0   :  { %4606 = vrcp.f32 %v956_v36 }
 0x8a3   :  { %v964_v37 = vpop.permute.xlu0 %963 }
 0x8a4   :  { %v969_v38 = vsel %vm523_vm2, %v964_v37, 0 }
 0x8a5   :  { %4157 = vmatpush3.bf16.msra.mxu0 %v969_v38  ;;  %v4444_v38 = vld [vmem:[#allocation5] sm:$0xff]  }
 0x8a6   :  { %v4605_v39 = vpop.eup %4604  ;;  %4168 = vmatprep.subr.bf16.mxu0 %v4806_v4 }
 0x8a7   :  { %v959_v41 = vmul.f32 %v4605_v39, %v4601_v9  ;;  %v1060_v51 = vpop.permute.xlu0 %1059  ;;  %v4445_v39 = vld [vmem:[#allocation5 + $0x8] sm:$0xff]  }
 0x8a9   :  { %v961_v42 = vpack.c.bf16 %v959_v41, %v959_v41  ;;  %v4447_v41 = vld [vmem:[#allocation5 + $0x18] sm:$0xff]  }
 0x8aa   :  { %v4607_v45 = vpop.eup %4606 }
 0x8ab   :  { %v960_v46 = vmul.f32 %v4607_v45, %v4603_v34  ;;  %4159 = vmatmul.mubr.msk.bf16.vlgmr.msra.gmra.mrb[24].mxu0 %vm495_vm3, %v961_v42  ;;  %v4448_v42 = vld [vmem:[#allocation5 + $0x20] sm:$0xff]   ;;  %v4449_v45 = vld [vmem:[#allocation5 + $0x28] sm:$0xff]  }
 0x8ac   :  { %4170 = vmatprep.mubr.msk.bf16.mxu0 %vm4808_vm0, %v4806_v4 }
 0x8ad   :  { %v962_v48 = vpack.c.bf16 %v960_v46, %v960_v46  ;;  %v4450_v46 = vld [vmem:[#allocation5 + $0x30] sm:$0xff]  }
 0x8ae   :  { %4169 = vmatpush3.bf16.xpose.msra.mxu0 %v1067_v19 }
 0x8af   :  { %4165 = vmatmul.mubr.msk.bf16.vlgmr.msra.gmra.mrb[24].mxu1 %vm495_vm3, %v962_v48  ;;  %4180 = vmatprep.subr.bf16.mxu0 %v4806_v4 }
 0x8b0   :  { %4175 = vmatpush3.bf16.xpose.msra.mxu1 %v1117_v50  ;;  %4176 = vmatprep.mubr.msk.bf16.mxu1 %vm4808_vm0, %v4806_v4 }
 0x8b1   :  { %4186 = vmatprep.subr.bf16.mxu1 %v4806_v4 }
 0x8b5   :  { %4171 = vmatmul.mubr.msk.bf16.vlgmr.msra.gmra.mrb[28].mxu0 %vm402_vm1, %v1060_v51 }
 0x8b6   :  { %4182 = vmatprep.mubr.msk.bf16.mxu0 %vm4808_vm0, %v4806_v4 }
 0x8b7   :  { %4177 = vmatmul.mubr.msk.bf16.vlgmr.msra.gmra.mrb[28].mxu1 %vm402_vm1, %v1110_v52 }
 0x8b8   :  { %4188 = vmatprep.mubr.msk.bf16.mxu1 %vm4808_vm0, %v4806_v4 }
 0x97e   :  { %v1005_v53 = vpop.f32.mrb[24].mxu0 }
 0x97f   :  { %v4160_v54 = vpop.f32.mrb[25].mxu0 }
 0x980   :  { %v1008_v57 = vpop.f32.mrb[26].mxu0 }
 0x981   :  { %v4161_v58 = vpop.f32.mrb[27].mxu0 }
 0x982   :  { %v1053_v60 = vpop.f32.mrb[24].mxu1 }
 0x983   :  { %v4387_v62 = vpack.i.bf16 %v1053_v60, %v1005_v53  ;;  %v4166_v63 = vpop.f32.mrb[25].mxu1 }
 0x984   :  { %v1056_v0 = vpop.f32.mrb[26].mxu1 }
 0x985   :  { %v4167_v6 = vpop.f32.mrb[27].mxu1 }
 0x988   :  { %v1103_v7 = vpop.f32.mrb[28].mxu0 }
 0x989   :  { %v4172_v8 = vpop.f32.mrb[29].mxu0  ;;  %v1159_v10 = vsel %vm495_vm3, %v1103_v7, -inf }
 0x98a   :  { %v1153_v11 = vpop.f32.mrb[28].mxu1  ;;  %1160 = vmax.xlane.f32.xlu0 %v1159_v10  ;;  %v1106_v13 = vpop.f32.mrb[30].mxu0 }
 0x98b   :  { %v4173_v14 = vpop.f32.mrb[31].mxu0  ;;  %v4178_v15 = vpop.f32.mrb[29].mxu1  ;;  %v1162_v16 = vsel %vm495_vm3, %v1153_v11, -inf }
 0x98c   :  { %1163 = vmax.xlane.f32.xlu1 %v1162_v16  ;;  %v1156_v18 = vpop.f32.mrb[30].mxu1 }
 0x98d   :  { %v4179_v22 = vpop.f32.mrb[31].mxu1 }
 0x99d   :  { %1231 = vrot.lane.b32.xlu1 %v5011_v20, %s4810_s19 }
 0x9a1   :  { %4383 = vrot.lane.b32.xlu1 %v4382_v3, %s4810_s19 }
 0x9a5   :  { %4388 = vrot.lane.b32.xlu1 %v4387_v62, %s4799_s27 }
 0xa17   :  { %v1161_v23 = vpop.xlane.xlu0 %1160 }
 0xa18   :  { %v1165_v24 = vsub.f32 %v1103_v7, %v1161_v23 }
 0xa19   :  { %v1164_v25 = vpop.xlane.xlu1 %1163 }
 0xa1a   :  { %v1167_v26 = vmul.f32 1.442695, %v1165_v24  ;;  %v1166_v27 = vsub.f32 %v1153_v11, %v1164_v25  ;;  %v5179_v24 = vld [vmem:[%s5587_s5] sm:$0x3f] }
 0xa1c   :  { %4608 = vpow2.f32 %v1167_v26  ;;  %v1169_v28 = vmul.f32 1.442695, %v1166_v27 }
 0xa1d   :  { %v1232_v29 = vpop.permute.xlu1 %1231 }
 0xa1e   :  { %4610 = vpow2.f32 %v1169_v28  ;;  %v1237_v31 = vsel %vm523_vm2, %v1232_v29, 0 }
 0xa1f   :  { %4187 = vmatpush3.bf16.msra.mxu1 %v1237_v31 }
 0xa21   :  { %v4384_v60 = vpop.permute.xlu1 %4383 }
 0xa22   :  { %v4386_v63 = vunpack.i.h.bf16 %v4384_v60  ;;  %v4385_v0 = vunpack.i.l.bf16 %v4384_v60  ;;  %v1448_v60 = vrot.slane %v5179_v24, %v4974_v49 }
 0xa24   :  { %v1304_v10 = vsel %vm402_vm1, %v5059_v5, %v4386_v63  ;;  %v1303_v11 = vsel %vm402_vm1, %v5057_v1, %v4385_v0  ;;  %v1331_v1 = vrot.slane %v5179_v24, %v4966_v44 }
 0xa25   :  { %v4389_v62 = vpop.permute.xlu1 %4388 }
 0xa26   :  { %v4609_v20 = vpop.eup %4608  ;;  %v4391_v6 = vunpack.i.h.bf16 %v4389_v62  ;;  %v4390_v7 = vunpack.i.l.bf16 %v4389_v62 }
 0xa27   :  { %v1171_v32 = vsel %vm495_vm3, %v4609_v20, 0.0 }
 0xa28   :  { %v4611_v33 = vpop.eup %4610  ;;  %1172 = vadd.xlane.f32.xlu0 %v1171_v32  ;;  %v1307_v15 = vsel %vm1305_vm4, %v1304_v10, %v4391_v6  ;;  %v1306_v16 = vsel %vm1305_vm4, %v1303_v11, %v4390_v7  ;;  %v4452_v32 = vld [vmem:[%s5588_s6] ss:$8 sps:$4 sm:$0xff]   ;;  %v1454_v6 = vrot.slane %v5179_v24, %v4992_v59 }
 0xa29   :  { %v1174_v61 = vsel %vm495_vm3, %v4611_v33, 0.0 }
 0xa2c   :  { %1175 = vadd.xlane.f32.xlu0 %v1174_v61  ;;  %v4457_v61 = vld [vmem:[%s5588_s6 + $0x14] ss:$8 sps:$4 sm:$0xff]  }
 0xa42   :  { %1183 = vrot.lane.b32.xlu0 %v5006_v17, %s4810_s19 }
 0xab5   :  { %v1173_v2 = vpop.xlane.xlu0 %1172 }
 0xab6   :  { %4612 = vrcp.f32 %v1173_v2 }
 0xab9   :  { %v1176_v3 = vpop.xlane.xlu0 %1175 }
 0xaba   :  { %4614 = vrcp.f32 %v1176_v3 }
 0xabd   :  { %v1184_v9 = vpop.permute.xlu0 %1183 }
 0xabe   :  { %v1189_v12 = vsel %vm523_vm2, %v1184_v9, 0 }
 0xabf   :  { %4181 = vmatpush3.bf16.msra.mxu0 %v1189_v12 }
 0xac0   :  { %v4613_v34 = vpop.eup %4612  ;;  %4192 = vmatprep.subr.bf16.mxu0 %v4806_v4 }
 0xac1   :  { %v1179_v21 = vmul.f32 %v4613_v34, %v4609_v20 }
 0xac3   :  { %v1181_v35 = vpack.c.bf16 %v1179_v21, %v1179_v21 }
 0xac4   :  { %v4615_v36 = vpop.eup %4614 }
 0xac5   :  { %v1180_v37 = vmul.f32 %v4615_v36, %v4611_v33  ;;  %4183 = vmatmul.mubr.msk.bf16.vlgmr.msra.gmra.mrb[32].mxu0 %vm495_vm3, %v1181_v35  ;;  %v4454_v33 = vld [vmem:[%s5588_s6 + $0x4] ss:$8 sps:$4 sm:$0xff]  }
 0xac6   :  { %4208 = vmatprep.mubr.msk.bf16.mxu0 %vm4808_vm0, %v4806_v4  ;;  %4193 = vmatpush3.bf16.msra.mxu0 %v4444_v38  ;;  %v4460_v36 = vld [vmem:[%s5588_s6 + $0x24] ss:$8 sps:$4 sm:$0xff]   ;;  %v4461_v38 = vld [vmem:[%s5588_s6 + $0x30] ss:$8 sps:$4 sm:$0xff]  }
 0xac7   :  { %v1182_v17 = vpack.c.bf16 %v1180_v37, %v1180_v37  ;;  %4194 = vmatprep.subr.bf16.mxu0 %v4806_v4  ;;  %1566 = vmatprep.subr.bf16.mxu1 %v4454_v33  ;;  %v4458_v37 = vld [vmem:[%s5588_s6 + $0x20] ss:$8 sps:$4 sm:$0xff]  }
 0xac9   :  { %4189 = vmatmul.mubr.msk.bf16.vlgmr.msra.gmra.mrb[32].mxu1 %vm495_vm3, %v1182_v17  ;;  %v4463_v17 = vld [vmem:[%s5588_s6 + $0x34] ss:$8 sps:$4 sm:$0xff]  }
 0xaca   :  { %1598 = vmatprep.mubr.bf16.mxu1 %v4807_v30  ;;  %4195 = vmatpush3.bf16.msra.mxu0 %v4445_v39  ;;  %v4466_v39 = vld [vmem:[%s5588_s6 + $0x44] ss:$8 sps:$4 sm:$0xff]  }
 0xacb   :  { %4196 = vmatprep.subr.bf16.mxu0 %v4806_v4  ;;  %1567 = vmatpush1.bf16.msra.mxu1 %v4452_v32  ;;  %v1474_v32 = vld [vmem:[%s5589_s7] sm:$0x3] }
 0xacc   :  { %1568 = vmatprep.subr.bf16.mxu1 %v4457_v61  ;;  %v1479_v33 = vrot.slane %v1474_v32, %v4966_v44  ;;  %v1483_v61 = vrot.slane %v1474_v32, %v4974_v49 }
 0xace   :  { %4197 = vmatpush3.bf16.msra.mxu0 %v4446_v40  ;;  %v4464_v40 = vld [vmem:[%s5588_s6 + $0x40] ss:$8 sps:$4 sm:$0xff]  }
 0xacf   :  { %4198 = vmatprep.subr.bf16.mxu0 %v4806_v4 }
 0xad2   :  { %4199 = vmatpush3.bf16.msra.mxu0 %v4447_v41  ;;  %v4469_v41 = vld [vmem:[%s5588_s6 + $0x54] ss:$8 sps:$4 sm:$0xff]  }
 0xad3   :  { %4200 = vmatprep.subr.bf16.mxu0 %v4806_v4 }
 0xad6   :  { %4201 = vmatpush3.bf16.msra.mxu0 %v4448_v42  ;;  %v4467_v42 = vld [vmem:[%s5588_s6 + $0x50] ss:$8 sps:$4 sm:$0xff]  }
 0xad7   :  { %4202 = vmatprep.subr.bf16.mxu0 %v4806_v4 }
 0xada   :  { %4203 = vmatpush3.bf16.msra.mxu0 %v4449_v45  ;;  %v4472_v45 = vld [vmem:[%s5588_s6 + $0x64] ss:$8 sps:$4 sm:$0xff]  }
 0xadb   :  { %4204 = vmatprep.subr.bf16.mxu0 %v4806_v4 }
 0xade   :  { %4205 = vmatpush3.bf16.msra.mxu0 %v4450_v46  ;;  %v4470_v46 = vld [vmem:[%s5588_s6 + $0x60] ss:$8 sps:$4 sm:$0xff]  }
 0xadf   :  { %4206 = vmatprep.subr.bf16.mxu0 %v4806_v4 }
 0xae2   :  { %4207 = vmatpush3.bf16.msra.mxu0 %v4451_v47  ;;  %v4475_v47 = vld [vmem:[%s5588_s6 + $0x74] ss:$8 sps:$4 sm:$0xff]  }
 0xb98   :  { %v1225_v19 = vpop.f32.mrb[32].mxu0 }
 0xb99   :  { %v4184_v48 = vpop.f32.mrb[33].mxu0 }
 0xb9a   :  { %v1228_v50 = vpop.f32.mrb[34].mxu0 }
 0xb9b   :  { %v4185_v51 = vpop.f32.mrb[35].mxu0 }
 0xb9c   :  { %v1273_v52 = vpop.f32.mrb[32].mxu1 }
 0xb9d   :  { %v4392_v53 = vpack.i.bf16 %v1273_v52, %v1225_v19  ;;  %v4190_v54 = vpop.f32.mrb[33].mxu1  ;;  %v4473_v19 = vld [vmem:[%s5588_s6 + $0x70] ss:$8 sps:$4 sm:$0xff]  }
 0xb9e   :  { %v1276_v57 = vpop.f32.mrb[34].mxu1 }
 0xb9f   :  { %v4191_v58 = vpop.f32.mrb[35].mxu1  ;;  %4393 = vrot.lane.b32.xlu0 %v4392_v53, %s4809_s30 }
 0xc11   :  { %v4394_v8 = vpop.permute.xlu0 %4393 }
 0xc12   :  { %v4396_v13 = vunpack.i.h.bf16 %v4394_v8  ;;  %v4395_v14 = vunpack.i.l.bf16 %v4394_v8 }
 0xc14   :  { %v1310_v18 = vsel %vm1308_vm5, %v1307_v15, %v4396_v13  ;;  %v1309_v22 = vsel %vm1308_vm5, %v1306_v16, %v4395_v14  ;;  %v4476_v13 = vld [vmem:[#allocation7 + $0x40] sm:$0xff]   ;;  %v4478_v15 = vld [vmem:[#allocation7 + $0x48] sm:$0xff]  }
 0xc15   :  { %v1311_v23 = vpack.c.bf16 %v1310_v18, %v1309_v22  ;;  %v4477_v14 = vld [vmem:[#allocation7] sm:$0xff]   ;;  %3973 = vmatprep.subr.bf16.mxu0 %v4476_v13  ;;  %v4479_v16 = vld [vmem:[#allocation7 + $0x8] sm:$0xff]   ;;  %v4480_v18 = vld [vmem:[#allocation7 + $0x50] sm:$0xff]  }
 0xc16   :  { %v4481_v22 = vld [vmem:[#allocation7 + $0x10] sm:$0xff]  }
 0xc17   :  { %4209 = vmatmul.mubr.bf16.vlgmr.msra.gmra.mrb[36].mxu0 %v1311_v23  ;;  %v4482_v23 = vld [vmem:[#allocation7 + $0x58] sm:$0xff]  }
 0xc18   :  { %3974 = vmatpush3.bf16.msra.mxu0 %v4477_v14 }
 0xc19   :  { %3975 = vmatprep.subr.bf16.mxu0 %v4478_v15 }
 0xc1c   :  { %3976 = vmatpush3.bf16.msra.mxu0 %v4479_v16 }
 0xc1d   :  { %3977 = vmatprep.subr.bf16.mxu0 %v4480_v18 }
 0xc20   :  { %3978 = vmatpush3.bf16.msra.mxu0 %v4481_v22 }
 0xc21   :  { %3979 = vmatprep.subr.bf16.mxu0 %v4482_v23 }
 0xcea   :  { %v1414_v5 = vpop.f32.mrb[36].mxu0 }
 0xceb   :  { %v1415_v25 = vadd.f32 %v1414_v5, %v1331_v1  ;;  %v4210_v26 = vpop.f32.mrb[37].mxu0  ;;  %v4484_v5 = vld [vmem:[#allocation7 + $0x60] sm:$0xff]  }
 0xcec   :  { %v1417_v27 = vpop.f32.mrb[38].mxu0  ;;  %v4486_v26 = vld [vmem:[#allocation7 + $0x68] sm:$0xff]  }
 0xced   :  { %v1418_v28 = vadd.f32 %v1417_v27, %v1331_v1  ;;  %v4211_v29 = vpop.f32.mrb[39].mxu0  ;;  %v1421_v31 = vadd.f32 %v1415_v25, %v4978_v55  ;;  %v4455_v55 = vld [vmem:[%s5588_s6 + $0x10] ss:$8 sps:$4 sm:$0xff]   ;;  %v4485_v25 = vld [vmem:[#allocation7 + $0x20] sm:$0xff]   ;;  %v4487_v27 = vld [vmem:[#allocation7 + $0x28] sm:$0xff]  }
 0xcee   :  { %1569 = vmatpush1.bf16.msra.mxu1 %v4455_v55  ;;  %v4483_v1 = vld [vmem:[#allocation7 + $0x18] sm:$0xff]   ;;  %v4489_v29 = vld [vmem:[#allocation7 + $0x30] sm:$0xff]  }
 0xcef   :  { %1423 = vadd.xlane.f32.xlu1 %v1421_v31  ;;  %v1422_v20 = vadd.f32 %v1418_v28, %v4980_v56  ;;  %1570 = vmatprep.subr.bf16.mxu1 %v4460_v36  ;;  %v4488_v28 = vld [vmem:[#allocation7 + $0x70] sm:$0xff]  }
 0xcf0   :  { %3980 = vmatpush3.bf16.msra.mxu0 %v4483_v1 }
 0xcf1   :  { %1425 = vadd.xlane.f32.xlu0 %v1422_v20  ;;  %3981 = vmatprep.subr.bf16.mxu0 %v4484_v5 }
 0xcf2   :  { %1571 = vmatpush1.bf16.msra.mxu1 %v4458_v37 }
 0xcf3   :  { %1572 = vmatprep.subr.bf16.mxu1 %v4463_v17 }
 0xcf4   :  { %3982 = vmatpush3.bf16.msra.mxu0 %v4485_v25 }
 0xcf5   :  { %3983 = vmatprep.subr.bf16.mxu0 %v4486_v26  ;;  %v1681_v26 = vsub.s32 3, %v4963_v43 }
 0xcf6   :  { %1573 = vmatpush1.bf16.msra.mxu1 %v4461_v38 }
 0xcf7   :  { %1574 = vmatprep.subr.bf16.mxu1 %v4466_v39 }
 0xcf8   :  { %3984 = vmatpush3.bf16.msra.mxu0 %v4487_v27 }
 0xcf9   :  { %3985 = vmatprep.subr.bf16.mxu0 %v4488_v28  ;;  %v1682_v28 = vrot.slane %v5179_v24, %v1681_v26 }
 0xcfa   :  { %1575 = vmatpush1.bf16.msra.mxu1 %v4464_v40 }
 0xcfb   :  { %1576 = vmatprep.subr.bf16.mxu1 %v4469_v41 }
 0xcfc   :  { %3986 = vmatpush3.bf16.msra.mxu0 %v4489_v29 }
 0xcfe   :  { %1577 = vmatpush1.bf16.msra.mxu1 %v4467_v42 }
 0xcff   :  { %1578 = vmatprep.subr.bf16.mxu1 %v4472_v45 }
 0xd02   :  { %1579 = vmatpush1.bf16.msra.mxu1 %v4470_v46 }
 0xd03   :  { %1580 = vmatprep.subr.bf16.mxu1 %v4475_v47 }
 0xd06   :  { %1581 = vmatpush1.bf16.msra.mxu1 %v4473_v19 }
 0xd7c   :  { %v1424_v56 = vpop.xlane.xlu1 %1423 }
 0xd7d   :  { %v1427_v2 = vmul.f32 0.0078125, %v1424_v56 }
 0xd7e   :  { %v1426_v3 = vpop.xlane.xlu0 %1425 }
 0xd7f   :  { %v1429_v9 = vsub.f32 %v1421_v31, %v1427_v2  ;;  %v1428_v12 = vmul.f32 0.0078125, %v1426_v3  ;;  %v4490_v31 = vld [vmem:[#allocation7 + $0x78] sm:$0xff]  }
 0xd80   :  { %3987 = vmatprep.subr.bf16.mxu0 %v4490_v31 }
 0xd81   :  { %v1430_v34 = vsub.f32 %v1422_v20, %v1428_v12  ;;  %v1431_v21 = vmul.f32 %v1429_v9, %v1429_v9  ;;  %v4491_v20 = vld [vmem:[#allocation7 + $0x38] sm:$0xff]  }
 0xd82   :  { %3988 = vmatpush3.bf16.msra.mxu0 %v4491_v20 }
 0xd83   :  { %1433 = vadd.xlane.f32.xlu0 %v1431_v21  ;;  %v1432_v35 = vmul.f32 %v1430_v34, %v1430_v34  ;;  %4212 = vmatprep.subr.bf16.mxu0 %v4806_v4 }
 0xd87   :  { %1435 = vadd.xlane.f32.xlu0 %v1432_v35 }
 0xe10   :  { %v1434_v48 = vpop.xlane.xlu0 %1433 }
 0xe11   :  { %v1437_v50 = vmul.f32 0.0078125, %v1434_v48 }
 0xe13   :  { %v1439_v51 = vadd.f32 1e-12, %v1437_v50 }
 0xe14   :  { %v1436_v52 = vpop.xlane.xlu0 %1435 }
 0xe15   :  { %4616 = vrsqrt.f32 %v1439_v51  ;;  %v1438_v53 = vmul.f32 0.0078125, %v1436_v52 }
 0xe17   :  { %v1440_v54 = vadd.f32 1e-12, %v1438_v53 }
 0xe19   :  { %4618 = vrsqrt.f32 %v1440_v54 }
 0xe1f   :  { %v4617_v57 = vpop.eup %4616 }
 0xe20   :  { %v1443_v58 = vmul.f32 %v4617_v57, %v1429_v9 }
 0xe22   :  { %v1449_v0 = vmul.f32 %v1448_v60, %v1443_v58 }
 0xe23   :  { %v4619_v62 = vpop.eup %4618 }
 0xe24   :  { %v1444_v63 = vmul.f32 %v4619_v62, %v1430_v34  ;;  %v5237_v8 = vadd.f32 %v1454_v6, %v1449_v0 }
 0xe26   :  { %v1450_v7 = vmul.f32 %v1448_v60, %v1444_v63 }
 0xe28   :  { %v5239_v10 = vadd.f32 %v1454_v6, %v1450_v7 }
 0xe2a   :  { %v1457_v11 = vpack.c.bf16 %v5239_v10, %v5237_v8 }
 0xe2c   :  { %1599 = vmatmul.mubr.bf16.vlgmr.msra.gmra.mrb[36].mxu1 %v1457_v11 }
 0xe2d   :  { %2070 = vmatprep.mubr.bf16.mxu1 %v4807_v30 }
 0xeff   :  { %v1600_v55 = vpop.f32.mrb[36].mxu1 }
 0xf00   :  { %v1601_v56 = vadd.f32 %v1600_v55, %v1479_v33  ;;  %v1602_v2 = vpop.f32.mrb[37].mxu1 }
 0xf01   :  { %v1603_v3 = vadd.f32 %v1602_v2, %v1483_v61  ;;  %v1604_v9 = vpop.f32.mrb[38].mxu1 }
 0xf02   :  { %v1609_v12 = vmul.f32 %v1601_v56, %v1601_v56  ;;  %v1605_v34 = vadd.f32 %v1604_v9, %v1479_v33  ;;  %v1606_v21 = vpop.f32.mrb[39].mxu1  ;;  %v4494_v9 = vld [vmem:[#allocation2 + $0xc4] ss:$12 sps:$4 sm:$0xff]  }
 0xf03   :  { %v1610_v35 = vmul.f32 %v1603_v3, %v1603_v3  ;;  %v1607_v36 = vadd.f32 %v1606_v21, %v1483_v61  ;;  %2038 = vmatprep.subr.bf16.mxu1 %v4494_v9  ;;  %v4499_v21 = vld [vmem:[#allocation2 + $0xe0] ss:$12 sps:$4 sm:$0xff]  }
 0xf04   :  { %v1613_v37 = vmul.f32 %v1609_v12, %v1601_v56  ;;  %v1611_v17 = vmul.f32 %v1605_v34, %v1605_v34  ;;  %v4495_v12 = vld [vmem:[#allocation2 + $0xc8] ss:$12 sps:$4 sm:$0xff]  }
 0xf05   :  { %v1614_v38 = vmul.f32 %v1610_v35, %v1603_v3  ;;  %v1612_v39 = vmul.f32 %v1607_v36, %v1607_v36  ;;  %v4496_v35 = vld [vmem:[#allocation2 + $0xd8] ss:$12 sps:$4 sm:$0xff]  }
 0xf06   :  { %v1617_v40 = vmul.f32 0.044715, %v1613_v37  ;;  %v1615_v41 = vmul.f32 %v1611_v17, %v1605_v34 }
 0xf07   :  { %v1618_v42 = vmul.f32 0.044715, %v1614_v38  ;;  %v1616_v45 = vmul.f32 %v1612_v39, %v1607_v36 }
 0xf08   :  { %v1621_v46 = vadd.f32 %v1617_v40, %v1601_v56  ;;  %v1619_v47 = vmul.f32 0.044715, %v1615_v41  ;;  %v4502_v41 = vld [vmem:[#allocation2 + $0xf4] ss:$12 sps:$4 sm:$0xff]  }
 0xf09   :  { %v1622_v19 = vadd.f32 %v1618_v42, %v1603_v3  ;;  %v1620_v48 = vmul.f32 0.044715, %v1616_v45  ;;  %v4500_v42 = vld [vmem:[#allocation2 + $0xf0] ss:$12 sps:$4 sm:$0xff]   ;;  %v4503_v45 = vld [vmem:[#allocation2 + $0xf8] ss:$12 sps:$4 sm:$0xff]  }
 0xf0a   :  { %v1625_v50 = vmul.f32 0.7978846, %v1621_v46  ;;  %v1623_v51 = vadd.f32 %v1619_v47, %v1605_v34  ;;  %v4506_v46 = vld [vmem:[#allocation2 + $0x10c] ss:$12 sps:$4 sm:$0xff]   ;;  %v4504_v47 = vld [vmem:[#allocation2 + $0x108] ss:$12 sps:$4 sm:$0xff]  }
 0xf0b   :  { %v1626_v52 = vmul.f32 0.7978846, %v1622_v19  ;;  %v1624_v53 = vadd.f32 %v1620_v48, %v1607_v36  ;;  %v4507_v19 = vld [vmem:[#allocation2 + $0x110] ss:$12 sps:$4 sm:$0xff]  }
 0xf0c   :  { %4620 = vtanh.f32 %v1625_v50  ;;  %v1627_v54 = vmul.f32 0.7978846, %v1623_v51  ;;  %v4510_v48 = vld [vmem:[#allocation2 + $0x124] ss:$12 sps:$4 sm:$0xff]   ;;  %v4508_v50 = vld [vmem:[#allocation2 + $0x120] ss:$12 sps:$4 sm:$0xff]  }
 0xf0d   :  { %4622 = vtanh.f32 %v1626_v52  ;;  %v1628_v57 = vmul.f32 0.7978846, %v1624_v53  ;;  %v4511_v51 = vld [vmem:[#allocation2 + $0x128] ss:$12 sps:$4 sm:$0xff]   ;;  %v4512_v53 = vld [vmem:[#allocation2 + $0x138] ss:$12 sps:$4 sm:$0xff]  }
 0xf0e   :  { %4624 = vtanh.f32 %v1627_v54  ;;  %v4514_v52 = vld [vmem:[#allocation2 + $0x13c] ss:$12 sps:$4 sm:$0xff]   ;;  %v4515_v54 = vld [vmem:[#allocation2 + $0x140] ss:$12 sps:$4 sm:$0xff]  }
 0xf0f   :  { %4626 = vtanh.f32 %v1628_v57  ;;  %v4518_v57 = vld [vmem:[#allocation2 + $0x154] ss:$12 sps:$4 sm:$0xff]  }
 0xf16   :  { %v4621_v58 = vpop.eup %4620 }
 0xf17   :  { %v4623_v60 = vpop.eup %4622  ;;  %v1633_v62 = vadd.f32 1.0, %v4621_v58  ;;  %v4516_v58 = vld [vmem:[#allocation2 + $0x150] ss:$12 sps:$4 sm:$0xff]  }
 0xf18   :  { %v4625_v63 = vpop.eup %4624  ;;  %v1634_v0 = vadd.f32 1.0, %v4623_v60  ;;  %v4519_v60 = vld [vmem:[#allocation2 + $0x158] ss:$12 sps:$4 sm:$0xff]  }
 0xf19   :  { %v4627_v6 = vpop.eup %4626  ;;  %v1637_v7 = vmul.f32 0.5, %v1633_v62  ;;  %v1635_v11 = vadd.f32 1.0, %v4625_v63  ;;  %v4522_v62 = vld [vmem:[#allocation2 + $0x16c] ss:$12 sps:$4 sm:$0xff]   ;;  %v4520_v63 = vld [vmem:[#allocation2 + $0x168] ss:$12 sps:$4 sm:$0xff]  }
 0xf1a   :  { %v1636_v13 = vadd.f32 1.0, %v4627_v6  ;;  %v1638_v14 = vmul.f32 0.5, %v1634_v0  ;;  %v4523_v0 = vld [vmem:[#allocation2 + $0x170] ss:$12 sps:$4 sm:$0xff]  }
 0xf1b   :  { %v1639_v15 = vmul.f32 0.5, %v1635_v11  ;;  %v1641_v18 = vmul.f32 %v1637_v7, %v1601_v56 }
 0xf1c   :  { %v1640_v16 = vmul.f32 0.5, %v1636_v13  ;;  %v1642_v23 = vmul.f32 %v1638_v14, %v1603_v3  ;;  %v4492_v3 = vld [vmem:[#allocation2 + $0xc0] ss:$12 sps:$4 sm:$0xff]  }
 0xf1d   :  { %v1643_v22 = vmul.f32 %v1639_v15, %v1605_v34  ;;  %v4498_v34 = vld [vmem:[#allocation2 + $0xdc] ss:$12 sps:$4 sm:$0xff]   ;;  %2039 = vmatpush1.bf16.msra.mxu1 %v4492_v3 }
 0xf1e   :  { %v1644_v1 = vmul.f32 %v1640_v16, %v1607_v36  ;;  %2040 = vmatprep.subr.bf16.mxu1 %v4498_v34  ;;  %v1846_v16 = vsub.s32 4, %v4963_v43 }
 0xf1f   :  { %v1645_v5 = vpack.c.bf16 %v1643_v22, %v1641_v18  ;;  %v1852_v22 = vsub.s32 5, %v4963_v43 }
 0xf20   :  { %v1646_v25 = vpack.c.bf16 %v1644_v1, %v1642_v23  ;;  %v1847_v18 = vrot.slane %v5179_v24, %v1846_v16 }
 0xf21   :  { %2041 = vmatpush1.bf16.msra.mxu1 %v4496_v35 }
 0xf22   :  { %1811 = vmatprep.mubr.bf16.mxu0 %v1646_v25  ;;  %2042 = vmatprep.subr.bf16.mxu1 %v4502_v41 }
 0xf23   :  { %1812 = vmatmul.mubr.bf16.vlgmr.msra.gmra.mrb[40].mxu0 %v1645_v5 }
 0xf24   :  { %4228 = vmatprep.mubr.msk.bf16.mxu0 %vm4808_vm0, %v4806_v4  ;;  %4213 = vmatpush3.bf16.msra.mxu0 %v4495_v12 }
 0xf25   :  { %4214 = vmatprep.subr.bf16.mxu0 %v4806_v4  ;;  %2043 = vmatpush1.bf16.msra.mxu1 %v4500_v42 }
 0xf26   :  { %2044 = vmatprep.subr.bf16.mxu1 %v4506_v46 }
 0xf28   :  { %4215 = vmatpush3.bf16.msra.mxu0 %v4499_v21 }
 0xf29   :  { %4216 = vmatprep.subr.bf16.mxu0 %v4806_v4  ;;  %2045 = vmatpush1.bf16.msra.mxu1 %v4504_v47 }
 0xf2a   :  { %2046 = vmatprep.subr.bf16.mxu1 %v4510_v48 }
 0xf2c   :  { %4217 = vmatpush3.bf16.msra.mxu0 %v4503_v45 }
 0xf2d   :  { %4218 = vmatprep.subr.bf16.mxu0 %v4806_v4  ;;  %2047 = vmatpush1.bf16.msra.mxu1 %v4508_v50 }
 0xf2e   :  { %2048 = vmatprep.subr.bf16.mxu1 %v4514_v52 }
 0xf30   :  { %4219 = vmatpush3.bf16.msra.mxu0 %v4507_v19 }
 0xf31   :  { %4220 = vmatprep.subr.bf16.mxu0 %v4806_v4  ;;  %2049 = vmatpush1.bf16.msra.mxu1 %v4512_v53 }
 0xf32   :  { %2050 = vmatprep.subr.bf16.mxu1 %v4518_v57 }
 0xf34   :  { %4221 = vmatpush3.bf16.msra.mxu0 %v4511_v51 }
 0xf35   :  { %4222 = vmatprep.subr.bf16.mxu0 %v4806_v4  ;;  %2051 = vmatpush1.bf16.msra.mxu1 %v4516_v58 }
 0xf36   :  { %2052 = vmatprep.subr.bf16.mxu1 %v4522_v62 }
 0xf38   :  { %4223 = vmatpush3.bf16.msra.mxu0 %v4515_v54 }
 0xf39   :  { %4224 = vmatprep.subr.bf16.mxu0 %v4806_v4  ;;  %2053 = vmatpush1.bf16.msra.mxu1 %v4520_v63 }
 0xf3a   :  { %4232 = vmatprep.subr.bf16.mxu1 %v4806_v4 }
 0xf3c   :  { %4225 = vmatpush3.bf16.msra.mxu0 %v4519_v60 }
 0xf3d   :  { %4226 = vmatprep.subr.bf16.mxu0 %v4806_v4 }
 0xf40   :  { %4227 = vmatpush3.bf16.msra.mxu0 %v4523_v0 }
 0xf41   :  { %4256 = vmatprep.subr.bf16.mxu0 %v4806_v4 }
 0xff6   :  { %v3989_v27 = vpop.f32.mrb[40].mxu0 }
 0xff7   :  { %v3990_v29 = vpop.f32.mrb[41].mxu0 }
 0xff8   :  { %v3991_v31 = vadd.f32 %v3990_v29, %v3989_v27  ;;  %v3992_v20 = vpop.f32.mrb[42].mxu0 }
 0xff9   :  { %v3993_v32 = vpop.f32.mrb[43].mxu0 }
 0xffa   :  { %v1814_v33 = vadd.f32 %v3991_v31, %v1682_v28  ;;  %v3994_v61 = vadd.f32 %v3993_v32, %v3992_v20 }
 0xffc   :  { %v1817_v55 = vadd.f32 %v3994_v61, %v1682_v28  ;;  %v1820_v56 = vadd.f32 %v1814_v33, %v5237_v8  ;;  %v1853_v28 = vrot.slane %v5179_v24, %v1852_v22  ;;  %v3816_v24 = vld [vmem:[%s5585_s3 + $0x3] sm:$0x7] }
 0xffd   :  { %v1902_v33 = vrot.slane %v3816_v24, %v4974_v49 }
 0xffe   :  { %1822 = vadd.xlane.f32.xlu1 %v1820_v56  ;;  %v1821_v2 = vadd.f32 %v1817_v55, %v5239_v10 }
0x1000   :  { %1824 = vadd.xlane.f32.xlu0 %v1821_v2 }
0x108b   :  { %v1823_v8 = vpop.xlane.xlu1 %1822 }
0x108c   :  { %v1826_v36 = vmul.f32 0.0078125, %v1823_v8 }
0x108d   :  { %v1825_v10 = vpop.xlane.xlu0 %1824 }
0x108e   :  { %v1828_v37 = vsub.f32 %v1820_v56, %v1826_v36  ;;  %v1827_v17 = vmul.f32 0.0078125, %v1825_v10  ;;  %v1906_v56 = vrot.slane %v3816_v24, %v4992_v59  ;;  %v1898_v36 = vrot.slane %v3816_v24, %v4966_v44 }
0x1090   :  { %v1829_v38 = vsub.f32 %v1821_v2, %v1827_v17  ;;  %v1830_v39 = vmul.f32 %v1828_v37, %v1828_v37 }
0x1092   :  { %1832 = vadd.xlane.f32.xlu1 %v1830_v39  ;;  %v1831_v40 = vmul.f32 %v1829_v38, %v1829_v38 }
0x1094   :  { %1834 = vadd.xlane.f32.xlu0 %v1831_v40 }
0x111f   :  { %v1833_v6 = vpop.xlane.xlu1 %1832 }
0x1120   :  { %v1836_v7 = vmul.f32 0.0078125, %v1833_v6 }
0x1121   :  { %v1835_v11 = vpop.xlane.xlu0 %1834 }
0x1122   :  { %v1838_v13 = vadd.f32 1e-12, %v1836_v7  ;;  %v1837_v14 = vmul.f32 0.0078125, %v1835_v11 }
0x1124   :  { %4628 = vrsqrt.f32 %v1838_v13  ;;  %v1839_v15 = vadd.f32 1e-12, %v1837_v14 }
0x1126   :  { %4630 = vrsqrt.f32 %v1839_v15 }
0x112e   :  { %v4629_v23 = vpop.eup %4628 }
0x112f   :  { %v1842_v1 = vmul.f32 %v4629_v23, %v1828_v37 }
0x1130   :  { %v4631_v5 = vpop.eup %4630 }
0x1131   :  { %v1843_v25 = vmul.f32 %v4631_v5, %v1829_v38  ;;  %v1848_v27 = vmul.f32 %v1847_v18, %v1842_v1 }
0x1133   :  { %v1849_v29 = vmul.f32 %v1847_v18, %v1843_v25  ;;  %v5275_v31 = vadd.f32 %v1853_v28, %v1848_v27 }
0x1135   :  { %v5277_v20 = vadd.f32 %v1853_v28, %v1849_v29 }
0x1137   :  { %v1858_v32 = vpack.c.bf16 %v5277_v20, %v5275_v31 }
0x1139   :  { %2071 = vmatmul.mubr.bf16.vlgmr.msra.gmra.mrb[40].mxu1 %v1858_v32  ;;  %4229 = vmatmul.mubr.bf16.vlgmr.msra.gmra.mrb[44].mxu0 %v1858_v32 }
0x113a   :  { %4234 = vmatprep.mubr.msk.bf16.mxu1 %vm4808_vm0, %v4806_v4  ;;  %4258 = vmatprep.mubr.msk.bf16.mxu0 %vm4808_vm0, %v4806_v4 }
0x120c   :  { %v2072_v61 = vpop.f32.mrb[40].mxu1  ;;  %v2115_v55 = vpop.f32.mrb[44].mxu0 }
0x120d   :  { %v2074_v2 = vpop.f32.mrb[41].mxu1  ;;  %v4230_v3 = vpop.f32.mrb[45].mxu0  ;;  %v2073_v38 = vadd.f32 %v2072_v61, %v1898_v36  ;;  %v2116_v41 = vadd.f32 %v2115_v55, %v1906_v56 }
0x120e   :  { %v2075_v9 = vadd.f32 %v2074_v2, %v1902_v33  ;;  %v2076_v12 = vpop.f32.mrb[42].mxu1  ;;  %v2118_v34 = vpop.f32.mrb[46].mxu0 }
0x120f   :  { %v5290_v21 = vadd.f32 %v2118_v34, %v1906_v56  ;;  %v2078_v35 = vpop.f32.mrb[43].mxu1  ;;  %v4231_v8 = vpop.f32.mrb[47].mxu0  ;;  %v5300_v40 = vpack.c.bf16 %v2073_v38, %v2073_v38  ;;  %v2077_v45 = vadd.f32 %v2076_v12, %v1898_v36  ;;  %v5309_v46 = vpack.c.bf16 %v2116_v41, %v2116_v41 }
0x1210   :  { %v5293_v10 = vpack.c.bf16 %v2075_v9, %v2075_v9  ;;  %v2079_v37 = vadd.f32 %v2078_v35, %v1902_v33 }
0x1211   :  { %v5311_v47 = vpack.c.bf16 %v2077_v45, %v2077_v45  ;;  %v2248_v19 = vsel %vm523_vm2, %v5309_v46, 0  ;;  %v5336_v29 = vpack.c.bf16 %v5290_v21, %v5290_v21 }
0x1212   :  { %v2132_v17 = vsel %vm402_vm1, %v5293_v10, 0  ;;  %v5298_v39 = vpack.c.bf16 %v2079_v37, %v2079_v37 }
0x1213   :  { %4233 = vmatpush3.bf16.xpose.msra.mxu1 %v2132_v17  ;;  %v2294_v61 = vsel %vm523_vm2, %v5336_v29, 0 }
0x1214   :  { %4238 = vmatprep.subr.bf16.mxu1 %v4806_v4  ;;  %v2178_v42 = vsel %vm402_vm1, %v5298_v39, 0 }
0x121a   :  { %4235 = vmatmul.mubr.msk.bf16.vlgmr.msra.gmra.mrb[44].mxu1 %vm402_vm1, %v5300_v40 }
0x121b   :  { %4239 = vmatpush3.bf16.xpose.msra.mxu1 %v2178_v42  ;;  %4240 = vmatprep.mubr.msk.bf16.mxu1 %vm4808_vm0, %v4806_v4 }
0x121c   :  { %4244 = vmatprep.subr.bf16.mxu1 %v4806_v4 }
0x1222   :  { %4241 = vmatmul.mubr.msk.bf16.vlgmr.msra.gmra.mrb[48].mxu1 %vm402_vm1, %v5311_v47 }
0x1223   :  { %4245 = vmatpush3.bf16.msra.mxu1 %v2248_v19  ;;  %4246 = vmatprep.mubr.msk.bf16.mxu1 %vm4808_vm0, %v4806_v4 }
0x1224   :  { %4250 = vmatprep.subr.bf16.mxu1 %v4806_v4 }
0x12ed   :  { %v2168_v48 = vpop.f32.mrb[44].mxu1 }
0x12ee   :  { %v4236_v50 = vpop.f32.mrb[45].mxu1  ;;  %v2220_v51 = vsel %vm495_vm3, %v2168_v48, -inf }
0x12ef   :  { %2221 = vmax.xlane.f32.xlu1 %v2220_v51  ;;  %v2171_v52 = vpop.f32.mrb[46].mxu1 }
0x12f0   :  { %v4237_v53 = vpop.f32.mrb[47].mxu1 }
0x12f5   :  { %v2214_v54 = vpop.f32.mrb[48].mxu1 }
0x12f6   :  { %v4242_v57 = vpop.f32.mrb[49].mxu1  ;;  %v2223_v58 = vsel %vm495_vm3, %v2214_v54, -inf }
0x12f7   :  { %2224 = vmax.xlane.f32.xlu0 %v2223_v58  ;;  %v2217_v60 = vpop.f32.mrb[50].mxu1 }
0x12f8   :  { %v4243_v62 = vpop.f32.mrb[51].mxu1 }
0x137c   :  { %v2222_v63 = vpop.xlane.xlu1 %2221 }
0x137d   :  { %v2226_v0 = vsub.f32 %v2168_v48, %v2222_v63 }
0x137f   :  { %v2228_v6 = vmul.f32 1.442695, %v2226_v0 }
0x1381   :  { %4632 = vpow2.f32 %v2228_v6 }
0x1384   :  { %v2225_v7 = vpop.xlane.xlu0 %2224 }
0x1385   :  { %v2227_v11 = vsub.f32 %v2214_v54, %v2225_v7 }
0x1387   :  { %v2230_v13 = vmul.f32 1.442695, %v2227_v11 }
0x1389   :  { %4634 = vpow2.f32 %v2230_v13 }
0x138b   :  { %v4633_v14 = vpop.eup %4632 }
0x138c   :  { %v2232_v15 = vsel %vm495_vm3, %v4633_v14, 0.0 }
0x138d   :  { %2233 = vadd.xlane.f32.xlu1 %v2232_v15 }
0x1393   :  { %v4635_v18 = vpop.eup %4634 }
0x1394   :  { %v2235_v23 = vsel %vm495_vm3, %v4635_v18, 0.0 }
0x1395   :  { %2236 = vadd.xlane.f32.xlu0 %v2235_v23 }
0x139e   :  { %2340 = vrot.lane.b32.xlu1 %v5293_v10, %s4809_s30 }
0x13a2   :  { %2337 = vrot.lane.b32.xlu1 %v5300_v40, %s4809_s30 }
0x13a6   :  { %2389 = vrot.lane.b32.xlu1 %v5311_v47, %s4809_s30 }
0x13ab   :  { %2392 = vrot.lane.b32.xlu0 %v5298_v39, %s4809_s30 }
0x141a   :  { %v2234_v1 = vpop.xlane.xlu1 %2233 }
0x141b   :  { %4636 = vrcp.f32 %v2234_v1 }
0x141e   :  { %v2341_v5 = vpop.permute.xlu1 %2340 }
0x141f   :  { %v2346_v25 = vsel %vm402_vm1, %v2341_v5, 0 }
0x1420   :  { %4257 = vmatpush3.bf16.xpose.msra.mxu0 %v2346_v25 }
0x1421   :  { %4268 = vmatprep.subr.bf16.mxu0 %v4806_v4 }
0x1422   :  { %v2237_v27 = vpop.xlane.xlu0 %2236  ;;  %v2338_v24 = vpop.permute.xlu1 %2337 }
0x1423   :  { %4638 = vrcp.f32 %v2237_v27 }
0x1425   :  { %v4637_v28 = vpop.eup %4636 }
0x1426   :  { %v2240_v32 = vmul.f32 %v4637_v28, %v4633_v14  ;;  %v2393_v2 = vpop.permute.xlu0 %2392  ;;  %v2390_v12 = vpop.permute.xlu1 %2389 }
0x1427   :  { %4259 = vmatmul.mubr.msk.bf16.vlgmr.msra.gmra.mrb[48].mxu0 %vm402_vm1, %v2338_v24  ;;  %v2398_v9 = vsel %vm402_vm1, %v2393_v2, 0 }
0x1428   :  { %v2242_v33 = vpack.c.bf16 %v2240_v32, %v2240_v32  ;;  %4270 = vmatprep.mubr.msk.bf16.mxu0 %vm4808_vm0, %v4806_v4 }
0x142a   :  { %4247 = vmatmul.mubr.msk.bf16.vlgmr.msra.gmra.mrb[52].mxu1 %vm495_vm3, %v2242_v33 }
0x142b   :  { %4251 = vmatpush3.bf16.msra.mxu1 %v2294_v61  ;;  %4252 = vmatprep.mubr.msk.bf16.mxu1 %vm4808_vm0, %v4806_v4 }
0x142c   :  { %4262 = vmatprep.subr.bf16.mxu1 %v4806_v4 }
0x142d   :  { %v4639_v55 = vpop.eup %4638 }
0x142e   :  { %v2241_v56 = vmul.f32 %v4639_v55, %v4635_v18 }
0x1430   :  { %v2243_v3 = vpack.c.bf16 %v2241_v56, %v2241_v56 }
0x1432   :  { %4253 = vmatmul.mubr.msk.bf16.vlgmr.msra.gmra.mrb[56].mxu1 %vm495_vm3, %v2243_v3 }
0x1433   :  { %4264 = vmatprep.mubr.msk.bf16.mxu1 %vm4808_vm0, %v4806_v4 }
0x1434   :  { %4263 = vmatpush3.bf16.xpose.msra.mxu1 %v2398_v9 }
0x1435   :  { %4274 = vmatprep.subr.bf16.mxu1 %v4806_v4 }
0x143b   :  { %4265 = vmatmul.mubr.msk.bf16.vlgmr.msra.gmra.mrb[60].mxu1 %vm402_vm1, %v2390_v12 }
0x143c   :  { %4276 = vmatprep.mubr.msk.bf16.mxu1 %vm4808_vm0, %v4806_v4 }
0x14fa   :  { %v2382_v34 = vpop.f32.mrb[48].mxu0 }
0x14fb   :  { %v4260_v21 = vpop.f32.mrb[49].mxu0  ;;  %v2440_v35 = vsel %vm495_vm3, %v2382_v34, -inf }
0x14fc   :  { %2441 = vmax.xlane.f32.xlu1 %v2440_v35  ;;  %v2385_v8 = vpop.f32.mrb[50].mxu0 }
0x14fd   :  { %v5356_v36 = vpop.f32.mrb[52].mxu1  ;;  %v4261_v37 = vpop.f32.mrb[51].mxu0 }
0x14fe   :  { %v4248_v17 = vpop.f32.mrb[53].mxu1 }
0x14ff   :  { %v2287_v38 = vpop.f32.mrb[54].mxu1 }
0x1500   :  { %v4249_v41 = vpop.f32.mrb[55].mxu1 }
0x1505   :  { %v5358_v42 = vpop.f32.mrb[56].mxu1 }
0x1506   :  { %v4254_v45 = vpop.f32.mrb[57].mxu1 }
0x1507   :  { %v2333_v19 = vpop.f32.mrb[58].mxu1 }
0x1508   :  { %v4255_v48 = vpop.f32.mrb[59].mxu1 }
0x150d   :  { %2465 = vrot.lane.b32.xlu1 %v5309_v46, %s4809_s30 }
0x150e   :  { %v2434_v50 = vpop.f32.mrb[60].mxu1 }
0x150f   :  { %v4266_v51 = vpop.f32.mrb[61].mxu1  ;;  %v2443_v52 = vsel %vm495_vm3, %v2434_v50, -inf }
0x1510   :  { %2444 = vmax.xlane.f32.xlu0 %v2443_v52  ;;  %v2437_v53 = vpop.f32.mrb[62].mxu1 }
0x1511   :  { %v4267_v54 = vpop.f32.mrb[63].mxu1  ;;  %2564 = vrot.lane.b32.xlu1 %v5293_v10, %s4799_s27 }
0x1515   :  { %2614 = vrot.lane.b32.xlu1 %v5298_v39, %s4799_s27 }
0x1519   :  { %2562 = vrot.lane.b32.xlu1 %v5300_v40, %s4799_s27 }
0x1589   :  { %v2442_v57 = vpop.xlane.xlu1 %2441 }
0x158a   :  { %v2446_v58 = vsub.f32 %v2382_v34, %v2442_v57 }
0x158c   :  { %v2448_v60 = vmul.f32 1.442695, %v2446_v58 }
0x158d   :  { %v2466_v62 = vpop.permute.xlu1 %2465 }
0x158e   :  { %4640 = vpow2.f32 %v2448_v60  ;;  %v2471_v63 = vsel %vm523_vm2, %v2466_v62, 0 }
0x158f   :  { %4269 = vmatpush3.bf16.msra.mxu0 %v2471_v63 }
0x1590   :  { %4280 = vmatprep.subr.bf16.mxu0 %v4806_v4 }
0x1591   :  { %v2565_v1 = vpop.permute.xlu1 %2564 }
0x1592   :  { %v2570_v27 = vsel %vm402_vm1, %v2565_v1, 0 }
0x1595   :  { %v2615_v28 = vpop.permute.xlu1 %2614 }
0x1596   :  { %v2620_v3 = vsel %vm402_vm1, %v2615_v28, 0 }
0x1598   :  { %v4641_v0 = vpop.eup %4640 }
0x1599   :  { %v2452_v6 = vsel %vm495_vm3, %v4641_v0, 0.0  ;;  %v2563_v24 = vpop.permute.xlu1 %2562 }
0x159a   :  { %2453 = vadd.xlane.f32.xlu0 %v2452_v6 }
0x159d   :  { %v2445_v7 = vpop.xlane.xlu0 %2444 }
0x159e   :  { %v2447_v11 = vsub.f32 %v2434_v50, %v2445_v7 }
0x15a0   :  { %v2450_v13 = vmul.f32 1.442695, %v2447_v11 }
0x15a2   :  { %4642 = vpow2.f32 %v2450_v13 }
0x15ac   :  { %v4643_v14 = vpop.eup %4642 }
0x15ad   :  { %v2455_v15 = vsel %vm495_vm3, %v4643_v14, 0.0 }
0x15ae   :  { %2456 = vadd.xlane.f32.xlu0 %v2455_v15 }
0x15c4   :  { %2514 = vrot.lane.b32.xlu0 %v5336_v29, %s4809_s30 }
0x15c8   :  { %2612 = vrot.lane.b32.xlu0 %v5311_v47, %s4799_s27 }
0x1627   :  { %v2454_v18 = vpop.xlane.xlu0 %2453 }
0x1628   :  { %4644 = vrcp.f32 %v2454_v18 }
0x1632   :  { %v4645_v23 = vpop.eup %4644 }
0x1633   :  { %v2460_v5 = vmul.f32 %v4645_v23, %v4641_v0 }
0x1635   :  { %v2462_v25 = vpack.c.bf16 %v2460_v5, %v2460_v5 }
0x1637   :  { %4271 = vmatmul.mubr.msk.bf16.vlgmr.msra.gmra.mrb[52].mxu0 %vm495_vm3, %v2462_v25 }
0x1638   :  { %4281 = vmatpush3.bf16.xpose.msra.mxu0 %v2570_v27  ;;  %4282 = vmatprep.mubr.msk.bf16.mxu0 %vm4808_vm0, %v4806_v4 }
0x1639   :  { %4292 = vmatprep.subr.bf16.mxu0 %v4806_v4 }
0x163b   :  { %v2457_v32 = vpop.xlane.xlu0 %2456 }
0x163c   :  { %4646 = vrcp.f32 %v2457_v32 }
0x163f   :  { %v2515_v33 = vpop.permute.xlu0 %2514  ;;  %4283 = vmatmul.mubr.msk.bf16.vlgmr.msra.gmra.mrb[56].mxu0 %vm402_vm1, %v2563_v24 }
0x1640   :  { %v2520_v61 = vsel %vm523_vm2, %v2515_v33, 0  ;;  %4294 = vmatprep.mubr.msk.bf16.mxu0 %vm4808_vm0, %v4806_v4 }
0x1641   :  { %4275 = vmatpush3.bf16.msra.mxu1 %v2520_v61 }
0x1642   :  { %4286 = vmatprep.subr.bf16.mxu1 %v4806_v4 }
0x1643   :  { %v2613_v9 = vpop.permute.xlu0 %2612 }
0x1646   :  { %v4647_v55 = vpop.eup %4646 }
0x1647   :  { %v2461_v56 = vmul.f32 %v4647_v55, %v4643_v14 }
0x1649   :  { %v2463_v2 = vpack.c.bf16 %v2461_v56, %v2461_v56 }
0x164b   :  { %4277 = vmatmul.mubr.msk.bf16.vlgmr.msra.gmra.mrb[64].mxu1 %vm495_vm3, %v2463_v2 }
0x164c   :  { %4287 = vmatpush3.bf16.xpose.msra.mxu1 %v2620_v3  ;;  %4288 = vmatprep.mubr.msk.bf16.mxu1 %vm4808_vm0, %v4806_v4 }
0x164d   :  { %4298 = vmatprep.subr.bf16.mxu1 %v4806_v4 }
0x1653   :  { %4289 = vmatmul.mubr.msk.bf16.vlgmr.msra.gmra.mrb[68].mxu1 %vm402_vm1, %v2613_v9 }
0x1654   :  { %4300 = vmatprep.mubr.msk.bf16.mxu1 %vm4808_vm0, %v4806_v4 }
0x170a   :  { %v5395_v12 = vpop.f32.mrb[52].mxu0 }
0x170b   :  { %v4272_v34 = vpop.f32.mrb[53].mxu0 }
0x170c   :  { %v2510_v21 = vpop.f32.mrb[54].mxu0 }
0x170d   :  { %v4273_v35 = vpop.f32.mrb[55].mxu0 }
0x1712   :  { %v2606_v8 = vpop.f32.mrb[56].mxu0 }
0x1713   :  { %v4284_v37 = vpop.f32.mrb[57].mxu0  ;;  %v2662_v17 = vsel %vm495_vm3, %v2606_v8, -inf }
0x1714   :  { %2663 = vmax.xlane.f32.xlu1 %v2662_v17  ;;  %v2609_v38 = vpop.f32.mrb[58].mxu0 }
0x1715   :  { %v4285_v41 = vpop.f32.mrb[59].mxu0 }
0x171e   :  { %v5398_v45 = vpop.f32.mrb[64].mxu1 }
0x171f   :  { %v4397_v19 = vpack.i.bf16 %v5398_v45, %v5395_v12  ;;  %v4278_v48 = vpop.f32.mrb[65].mxu1 }
0x1720   :  { %v2559_v50 = vpop.f32.mrb[66].mxu1 }
0x1721   :  { %v4279_v51 = vpop.f32.mrb[67].mxu1 }
0x1725   :  { %2686 = vrot.lane.b32.xlu1 %v5309_v46, %s4799_s27 }
0x1726   :  { %v2656_v52 = vpop.f32.mrb[68].mxu1 }
0x1727   :  { %v4290_v53 = vpop.f32.mrb[69].mxu1  ;;  %v2665_v54 = vsel %vm495_vm3, %v2656_v52, -inf }
0x1728   :  { %2666 = vmax.xlane.f32.xlu0 %v2665_v54  ;;  %v2659_v57 = vpop.f32.mrb[70].mxu1 }
0x1729   :  { %v4291_v58 = vpop.f32.mrb[71].mxu1  ;;  %2784 = vrot.lane.b32.xlu1 %v5293_v10, %s4810_s19 }
0x172d   :  { %2834 = vrot.lane.b32.xlu1 %v5298_v39, %s4810_s19 }
0x1731   :  { %2782 = vrot.lane.b32.xlu1 %v5300_v40, %s4810_s19 }
0x17a1   :  { %v2664_v60 = vpop.xlane.xlu1 %2663 }
0x17a2   :  { %v2668_v62 = vsub.f32 %v2606_v8, %v2664_v60 }
0x17a4   :  { %v2670_v63 = vmul.f32 1.442695, %v2668_v62 }
0x17a5   :  { %v2687_v0 = vpop.permute.xlu1 %2686 }
0x17a6   :  { %4648 = vpow2.f32 %v2670_v63  ;;  %v2692_v6 = vsel %vm523_vm2, %v2687_v0, 0 }
0x17a7   :  { %4293 = vmatpush3.bf16.msra.mxu0 %v2692_v6 }
0x17a8   :  { %4304 = vmatprep.subr.bf16.mxu0 %v4806_v4 }
0x17a9   :  { %v2785_v23 = vpop.permute.xlu1 %2784 }
0x17aa   :  { %v2790_v25 = vsel %vm402_vm1, %v2785_v23, 0 }
0x17ad   :  { %v2835_v27 = vpop.permute.xlu1 %2834 }
0x17ae   :  { %v2840_v56 = vsel %vm402_vm1, %v2835_v27, 0 }
0x17b0   :  { %v4649_v7 = vpop.eup %4648 }
0x17b1   :  { %v2674_v11 = vsel %vm495_vm3, %v4649_v7, 0.0 }
0x17b2   :  { %2675 = vadd.xlane.f32.xlu0 %v2674_v11 }
0x17b5   :  { %v2667_v10 = vpop.xlane.xlu0 %2666 }
0x17b6   :  { %v2669_v13 = vsub.f32 %v2656_v52, %v2667_v10 }
0x17b8   :  { %v2672_v39 = vmul.f32 1.442695, %v2669_v13 }
0x17ba   :  { %4650 = vpow2.f32 %v2672_v39 }
0x17c4   :  { %v4651_v14 = vpop.eup %4650 }
0x17c5   :  { %v2677_v40 = vsel %vm495_vm3, %v4651_v14, 0.0 }
0x17c6   :  { %2678 = vadd.xlane.f32.xlu0 %v2677_v40 }
0x17dc   :  { %2734 = vrot.lane.b32.xlu0 %v5336_v29, %s4799_s27 }
0x17e0   :  { %2832 = vrot.lane.b32.xlu0 %v5311_v47, %s4810_s19  ;;  %v2783_v47 = vpop.permute.xlu1 %2782 }
0x183f   :  { %v2676_v15 = vpop.xlane.xlu0 %2675 }
0x1840   :  { %4652 = vrcp.f32 %v2676_v15 }
0x184a   :  { %v4653_v18 = vpop.eup %4652 }
0x184b   :  { %v2682_v1 = vmul.f32 %v4653_v18, %v4649_v7 }
0x184d   :  { %v2684_v5 = vpack.c.bf16 %v2682_v1, %v2682_v1 }
0x184f   :  { %4295 = vmatmul.mubr.msk.bf16.vlgmr.msra.gmra.mrb[60].mxu0 %vm495_vm3, %v2684_v5 }
0x1850   :  { %4305 = vmatpush3.bf16.xpose.msra.mxu0 %v2790_v25  ;;  %4306 = vmatprep.mubr.msk.bf16.mxu0 %vm4808_vm0, %v4806_v4 }
0x1851   :  { %4316 = vmatprep.subr.bf16.mxu0 %v4806_v4 }
0x1853   :  { %v2679_v28 = vpop.xlane.xlu0 %2678 }
0x1854   :  { %4654 = vrcp.f32 %v2679_v28  ;;  %v4525_v28 = vld [vmem:[#allocation5 + $0x48] sm:$0xff]  }
0x1857   :  { %v2735_v32 = vpop.permute.xlu0 %2734  ;;  %4307 = vmatmul.mubr.msk.bf16.vlgmr.msra.gmra.mrb[64].mxu0 %vm402_vm1, %v2783_v47  ;;  %v4526_v47 = vld [vmem:[#allocation5 + $0x50] sm:$0xff]  }
0x1858   :  { %v2740_v24 = vsel %vm523_vm2, %v2735_v32, 0  ;;  %4318 = vmatprep.mubr.msk.bf16.mxu0 %vm4808_vm0, %v4806_v4  ;;  %v4527_v32 = vld [vmem:[#allocation5 + $0x58] sm:$0xff]  }
0x1859   :  { %4299 = vmatpush3.bf16.msra.mxu1 %v2740_v24  ;;  %v4528_v24 = vld [vmem:[#allocation5 + $0x60] sm:$0xff]  }
0x185a   :  { %4310 = vmatprep.subr.bf16.mxu1 %v4806_v4 }
0x185b   :  { %v2833_v2 = vpop.permute.xlu0 %2832 }
0x185e   :  { %v4655_v33 = vpop.eup %4654 }
0x185f   :  { %v2683_v61 = vmul.f32 %v4655_v33, %v4651_v14  ;;  %v4529_v33 = vld [vmem:[#allocation5 + $0x68] sm:$0xff]  }
0x1861   :  { %v2685_v55 = vpack.c.bf16 %v2683_v61, %v2683_v61 }
0x1863   :  { %4301 = vmatmul.mubr.msk.bf16.vlgmr.msra.gmra.mrb[72].mxu1 %vm495_vm3, %v2685_v55 }
0x1864   :  { %4311 = vmatpush3.bf16.xpose.msra.mxu1 %v2840_v56  ;;  %4312 = vmatprep.mubr.msk.bf16.mxu1 %vm4808_vm0, %v4806_v4 }
0x1865   :  { %4322 = vmatprep.subr.bf16.mxu1 %v4806_v4 }
0x186b   :  { %4313 = vmatmul.mubr.msk.bf16.vlgmr.msra.gmra.mrb[76].mxu1 %vm402_vm1, %v2833_v2 }
0x186c   :  { %4324 = vmatprep.mubr.msk.bf16.mxu1 %vm4808_vm0, %v4806_v4 }
0x1922   :  { %v2728_v3 = vpop.f32.mrb[60].mxu0 }
0x1923   :  { %v4296_v9 = vpop.f32.mrb[61].mxu0 }
0x1924   :  { %v2731_v34 = vpop.f32.mrb[62].mxu0 }
0x1925   :  { %v4297_v21 = vpop.f32.mrb[63].mxu0 }
0x192a   :  { %v2826_v35 = vpop.f32.mrb[64].mxu0 }
0x192b   :  { %v4308_v8 = vpop.f32.mrb[65].mxu0  ;;  %v2882_v37 = vsel %vm495_vm3, %v2826_v35, -inf }
0x192c   :  { %2883 = vmax.xlane.f32.xlu1 %v2882_v37  ;;  %v2829_v17 = vpop.f32.mrb[66].mxu0 }
0x192d   :  { %v4309_v38 = vpop.f32.mrb[67].mxu0 }
0x1936   :  { %v2776_v41 = vpop.f32.mrb[72].mxu1 }
0x1937   :  { %v4402_v48 = vpack.i.bf16 %v2776_v41, %v2728_v3  ;;  %v4302_v50 = vpop.f32.mrb[73].mxu1  ;;  %v4531_v3 = vld [vmem:[#allocation5 + $0x78] sm:$0xff]  }
0x1938   :  { %v2779_v51 = vpop.f32.mrb[74].mxu1 }
0x1939   :  { %v4303_v52 = vpop.f32.mrb[75].mxu1 }
0x193d   :  { %2906 = vrot.lane.b32.xlu1 %v5309_v46, %s4810_s19 }
0x193e   :  { %v2876_v53 = vpop.f32.mrb[76].mxu1 }
0x193f   :  { %v4314_v54 = vpop.f32.mrb[77].mxu1  ;;  %v2885_v57 = vsel %vm495_vm3, %v2876_v53, -inf }
0x1940   :  { %2886 = vmax.xlane.f32.xlu0 %v2885_v57  ;;  %v2879_v58 = vpop.f32.mrb[78].mxu1 }
0x1941   :  { %v4315_v60 = vpop.f32.mrb[79].mxu1  ;;  %4398 = vrot.lane.b32.xlu1 %v4397_v19, %s4810_s19 }
0x1945   :  { %4403 = vrot.lane.b32.xlu1 %v4402_v48, %s4799_s27 }
0x19b9   :  { %v2884_v62 = vpop.xlane.xlu1 %2883 }
0x19ba   :  { %v2888_v63 = vsub.f32 %v2826_v35, %v2884_v62 }
0x19bc   :  { %v2890_v0 = vmul.f32 1.442695, %v2888_v63 }
0x19bd   :  { %v2907_v6 = vpop.permute.xlu1 %2906 }
0x19be   :  { %4656 = vpow2.f32 %v2890_v0  ;;  %v2912_v46 = vsel %vm523_vm2, %v2907_v6, 0  ;;  %v5477_v6 = vld [vmem:[%s5587_s5 + $0x8] sm:$0x3f] }
0x19bf   :  { %4317 = vmatpush3.bf16.msra.mxu0 %v2912_v46 }
0x19c0   :  { %4328 = vmatprep.subr.bf16.mxu0 %v4806_v4 }
0x19c1   :  { %v4399_v37 = vpop.permute.xlu1 %4398 }
0x19c2   :  { %v4401_v38 = vunpack.i.h.bf16 %v4399_v37  ;;  %v4400_v41 = vunpack.i.l.bf16 %v4399_v37 }
0x19c4   :  { %v3027_v52 = vsel %vm402_vm1, %v5358_v42, %v4401_v38  ;;  %v3170_v38 = vrot.slane %v5477_v6, %v4974_v49 }
0x19c5   :  { %v4404_v17 = vpop.permute.xlu1 %4403 }
0x19c6   :  { %v4406_v48 = vunpack.i.h.bf16 %v4404_v17  ;;  %v4405_v50 = vunpack.i.l.bf16 %v4404_v17 }
0x19c8   :  { %v4657_v7 = vpop.eup %4656  ;;  %v3029_v58 = vsel %vm1305_vm4, %v3027_v52, %v4406_v48 }
0x19c9   :  { %v2894_v11 = vsel %vm495_vm3, %v4657_v7, 0.0 }
0x19ca   :  { %2895 = vadd.xlane.f32.xlu0 %v2894_v11 }
0x19cd   :  { %v2887_v10 = vpop.xlane.xlu0 %2886 }
0x19ce   :  { %v2889_v13 = vsub.f32 %v2876_v53, %v2887_v10  ;;  %v3026_v53 = vsel %vm402_vm1, %v5356_v36, %v4400_v41  ;;  %v3053_v36 = vrot.slane %v5477_v6, %v4966_v44 }
0x19cf   :  { %v3028_v60 = vsel %vm1305_vm4, %v3026_v53, %v4405_v50 }
0x19d0   :  { %v2892_v12 = vmul.f32 1.442695, %v2889_v13 }
0x19d2   :  { %4658 = vpow2.f32 %v2892_v12 }
0x19dc   :  { %v4659_v45 = vpop.eup %4658 }
0x19dd   :  { %v2897_v19 = vsel %vm495_vm3, %v4659_v45, 0.0 }
0x19de   :  { %2898 = vadd.xlane.f32.xlu0 %v2897_v19  ;;  %v4532_v19 = vld [vmem:[%s5588_s6 + $0x80] ss:$8 sps:$4 sm:$0xff]  }
0x19f4   :  { %2954 = vrot.lane.b32.xlu0 %v5336_v29, %s4810_s19  ;;  %v4524_v29 = vld [vmem:[#allocation5 + $0x40] sm:$0xff]  }
0x1a57   :  { %v2896_v39 = vpop.xlane.xlu0 %2895 }
0x1a58   :  { %4660 = vrcp.f32 %v2896_v39  ;;  %v4534_v39 = vld [vmem:[%s5588_s6 + $0x84] ss:$8 sps:$4 sm:$0xff]  }
0x1a62   :  { %v4661_v14 = vpop.eup %4660 }
0x1a63   :  { %v2902_v40 = vmul.f32 %v4661_v14, %v4657_v7  ;;  %v4537_v14 = vld [vmem:[%s5588_s6 + $0x94] ss:$8 sps:$4 sm:$0xff]  }
0x1a65   :  { %v2904_v15 = vpack.c.bf16 %v2902_v40, %v2902_v40 }
0x1a67   :  { %4319 = vmatmul.mubr.msk.bf16.vlgmr.msra.gmra.mrb[68].mxu0 %vm495_vm3, %v2904_v15 }
0x1a68   :  { %4344 = vmatprep.mubr.msk.bf16.mxu0 %vm4808_vm0, %v4806_v4  ;;  %4329 = vmatpush3.bf16.msra.mxu0 %v4524_v29  ;;  %v4538_v29 = vld [vmem:[%s5588_s6 + $0xa0] ss:$8 sps:$4 sm:$0xff]  }
0x1a69   :  { %4330 = vmatprep.subr.bf16.mxu0 %v4806_v4 }
0x1a6b   :  { %v2899_v18 = vpop.xlane.xlu0 %2898 }
0x1a6c   :  { %4662 = vrcp.f32 %v2899_v18  ;;  %4331 = vmatpush3.bf16.msra.mxu0 %v4525_v28  ;;  %v4543_v28 = vld [vmem:[%s5588_s6 + $0xb4] ss:$8 sps:$4 sm:$0xff]  }
0x1a6d   :  { %4332 = vmatprep.subr.bf16.mxu0 %v4806_v4 }
0x1a6f   :  { %v2955_v23 = vpop.permute.xlu0 %2954 }
0x1a70   :  { %v2960_v1 = vsel %vm523_vm2, %v2955_v23, 0  ;;  %4333 = vmatpush3.bf16.msra.mxu0 %v4526_v47  ;;  %v4541_v47 = vld [vmem:[%s5588_s6 + $0xb0] ss:$8 sps:$4 sm:$0xff]  }
0x1a71   :  { %4323 = vmatpush3.bf16.msra.mxu1 %v2960_v1  ;;  %4334 = vmatprep.subr.bf16.mxu0 %v4806_v4 }
0x1a72   :  { %3290 = vmatprep.subr.bf16.mxu1 %v4534_v39  ;;  %v3881_v39 = vld [vmem:[%s5589_s7 + $0x2] sm:$0x3] }
0x1a74   :  { %4335 = vmatpush3.bf16.msra.mxu0 %v4527_v32  ;;  %v4546_v32 = vld [vmem:[%s5588_s6 + $0xc4] ss:$8 sps:$4 sm:$0xff]  }
0x1a75   :  { %4336 = vmatprep.subr.bf16.mxu0 %v4806_v4 }
0x1a76   :  { %v4663_v5 = vpop.eup %4662 }
0x1a77   :  { %v2903_v25 = vmul.f32 %v4663_v5, %v4659_v45 }
0x1a78   :  { %4337 = vmatpush3.bf16.msra.mxu0 %v4528_v24  ;;  %v4544_v24 = vld [vmem:[%s5588_s6 + $0xc0] ss:$8 sps:$4 sm:$0xff]  }
0x1a79   :  { %v2905_v27 = vpack.c.bf16 %v2903_v25, %v2903_v25  ;;  %4338 = vmatprep.subr.bf16.mxu0 %v4806_v4 }
0x1a7b   :  { %4325 = vmatmul.mubr.msk.bf16.vlgmr.msra.gmra.mrb[80].mxu1 %vm495_vm3, %v2905_v27  ;;  %v4540_v27 = vld [vmem:[%s5588_s6 + $0xa4] ss:$8 sps:$4 sm:$0xff]  }
0x1a7c   :  { %3322 = vmatprep.mubr.bf16.mxu1 %v4807_v30  ;;  %4339 = vmatpush3.bf16.msra.mxu0 %v4529_v33  ;;  %v4530_v30 = vld [vmem:[#allocation5 + $0x70] sm:$0xff]  }
0x1a7d   :  { %4340 = vmatprep.subr.bf16.mxu0 %v4806_v4  ;;  %3291 = vmatpush1.bf16.msra.mxu1 %v4532_v19  ;;  %v4549_v33 = vld [vmem:[%s5588_s6 + $0xd4] ss:$8 sps:$4 sm:$0xff]  }
0x1a7e   :  { %3292 = vmatprep.subr.bf16.mxu1 %v4537_v14  ;;  %v4571_v19 = vld [vmem:[#allocation7 + $0xb8] sm:$0xff]   ;;  %v3203_v14 = vrot.slane %v3881_v39, %v4966_v44 }
0x1a80   :  { %4341 = vmatpush3.bf16.msra.mxu0 %v4530_v30  ;;  %v4547_v30 = vld [vmem:[%s5588_s6 + $0xd0] ss:$8 sps:$4 sm:$0xff]  }
0x1a81   :  { %4342 = vmatprep.subr.bf16.mxu0 %v4806_v4 }
0x1a84   :  { %4343 = vmatpush3.bf16.msra.mxu0 %v4531_v3 }
0x1b3a   :  { %v2948_v61 = vpop.f32.mrb[68].mxu0 }
0x1b3b   :  { %v4320_v55 = vpop.f32.mrb[69].mxu0 }
0x1b3c   :  { %v2951_v56 = vpop.f32.mrb[70].mxu0  ;;  %v4550_v55 = vld [vmem:[%s5588_s6 + $0xe0] ss:$8 sps:$4 sm:$0xff]  }
0x1b3d   :  { %v4321_v2 = vpop.f32.mrb[71].mxu0  ;;  %v4555_v56 = vld [vmem:[%s5588_s6 + $0xf4] ss:$8 sps:$4 sm:$0xff]  }
0x1b3e   :  { %v4553_v2 = vld [vmem:[%s5588_s6 + $0xf0] ss:$8 sps:$4 sm:$0xff]  }
0x1b4e   :  { %v2996_v9 = vpop.f32.mrb[80].mxu1 }
0x1b4f   :  { %v4407_v34 = vpack.i.bf16 %v2996_v9, %v2948_v61  ;;  %v4326_v21 = vpop.f32.mrb[81].mxu1  ;;  %v4552_v61 = vld [vmem:[%s5588_s6 + $0xe4] ss:$8 sps:$4 sm:$0xff]  }
0x1b50   :  { %v2999_v35 = vpop.f32.mrb[82].mxu1 }
0x1b51   :  { %4408 = vrot.lane.b32.xlu1 %v4407_v34, %s4809_s30  ;;  %v4327_v8 = vpop.f32.mrb[83].mxu1 }
0x1bc3   :  { %v4409_v51 = vpop.permute.xlu1 %4408 }
0x1bc4   :  { %v4411_v54 = vunpack.i.h.bf16 %v4409_v51  ;;  %v4410_v57 = vunpack.i.l.bf16 %v4409_v51  ;;  %v3176_v51 = vrot.slane %v5477_v6, %v4992_v59  ;;  %v4560_v59 = vld [vmem:[#allocation7 + $0xd0] sm:$0xff]  }
0x1bc6   :  { %v3031_v62 = vsel %vm1308_vm5, %v3029_v58, %v4411_v54  ;;  %v3030_v63 = vsel %vm1308_vm5, %v3028_v60, %v4410_v57  ;;  %v4556_v58 = vld [vmem:[#allocation7 + $0xc0] sm:$0xff]  }
0x1bc7   :  { %v3032_v0 = vpack.c.bf16 %v3031_v62, %v3030_v63  ;;  %v4557_v60 = vld [vmem:[#allocation7 + $0x80] sm:$0xff]   ;;  %4045 = vmatprep.subr.bf16.mxu0 %v4556_v58  ;;  %v4558_v62 = vld [vmem:[#allocation7 + $0xc8] sm:$0xff]  }
0x1bc8   :  { %v4559_v63 = vld [vmem:[#allocation7 + $0x88] sm:$0xff]  }
0x1bc9   :  { %4345 = vmatmul.mubr.bf16.vlgmr.msra.gmra.mrb[72].mxu0 %v3032_v0  ;;  %v4561_v0 = vld [vmem:[#allocation7 + $0x90] sm:$0xff]  }
0x1bca   :  { %4046 = vmatpush3.bf16.msra.mxu0 %v4557_v60 }
0x1bcb   :  { %4047 = vmatprep.subr.bf16.mxu0 %v4558_v62 }
0x1bce   :  { %4048 = vmatpush3.bf16.msra.mxu0 %v4559_v63 }
0x1bcf   :  { %4049 = vmatprep.subr.bf16.mxu0 %v4560_v59 }
0x1bd2   :  { %4050 = vmatpush3.bf16.msra.mxu0 %v4561_v0 }
0x1c9c   :  { %v3136_v42 = vpop.f32.mrb[72].mxu0 }
0x1c9d   :  { %v3137_v46 = vadd.f32 %v3136_v42, %v3053_v36  ;;  %v4346_v7 = vpop.f32.mrb[73].mxu0  ;;  %v4563_v42 = vld [vmem:[#allocation7 + $0x98] sm:$0xff]  }
0x1c9e   :  { %v3139_v11 = vpop.f32.mrb[74].mxu0  ;;  %v4565_v7 = vld [vmem:[#allocation7 + $0xa0] sm:$0xff]  }
0x1c9f   :  { %v3140_v10 = vadd.f32 %v3139_v11, %v3053_v36  ;;  %v4347_v13 = vpop.f32.mrb[75].mxu0  ;;  %v3143_v12 = vadd.f32 %v3137_v46, %v5275_v31  ;;  %v4535_v31 = vld [vmem:[%s5588_s6 + $0x90] ss:$8 sps:$4 sm:$0xff]   ;;  %v4564_v46 = vld [vmem:[#allocation7 + $0xe0] sm:$0xff]   ;;  %v4566_v11 = vld [vmem:[#allocation7 + $0xe8] sm:$0xff]  }
0x1ca0   :  { %3293 = vmatpush1.bf16.msra.mxu1 %v4535_v31  ;;  %v4562_v36 = vld [vmem:[#allocation7 + $0xd8] sm:$0xff]   ;;  %v4568_v13 = vld [vmem:[#allocation7 + $0xf0] sm:$0xff]   ;;  %v3207_v31 = vrot.slane %v3881_v39, %v4974_v49 }
0x1ca1   :  { %3145 = vadd.xlane.f32.xlu0 %v3143_v12  ;;  %v3144_v45 = vadd.f32 %v3140_v10, %v5277_v20  ;;  %3294 = vmatprep.subr.bf16.mxu1 %v4540_v27  ;;  %v4567_v10 = vld [vmem:[#allocation7 + $0xa8] sm:$0xff]  }
0x1ca2   :  { %4051 = vmatprep.subr.bf16.mxu0 %v4562_v36 }
0x1ca3   :  { %3147 = vadd.xlane.f32.xlu1 %v3144_v45  ;;  %4052 = vmatpush3.bf16.msra.mxu0 %v4563_v42 }
0x1ca4   :  { %3295 = vmatpush1.bf16.msra.mxu1 %v4538_v29  ;;  %4053 = vmatprep.subr.bf16.mxu0 %v4564_v46 }
0x1ca5   :  { %3296 = vmatprep.subr.bf16.mxu1 %v4543_v28 }
0x1ca7   :  { %4054 = vmatpush3.bf16.msra.mxu0 %v4565_v7 }
0x1ca8   :  { %3297 = vmatpush1.bf16.msra.mxu1 %v4541_v47  ;;  %4055 = vmatprep.subr.bf16.mxu0 %v4566_v11  ;;  %v3407_v11 = vrot.slane %v5477_v6, %v1681_v26 }
0x1ca9   :  { %3298 = vmatprep.subr.bf16.mxu1 %v4546_v32 }
0x1cab   :  { %4056 = vmatpush3.bf16.msra.mxu0 %v4567_v10 }
0x1cac   :  { %3299 = vmatpush1.bf16.msra.mxu1 %v4544_v24  ;;  %4057 = vmatprep.subr.bf16.mxu0 %v4568_v13 }
0x1cad   :  { %3300 = vmatprep.subr.bf16.mxu1 %v4549_v33 }
0x1cb0   :  { %3301 = vmatpush1.bf16.msra.mxu1 %v4547_v30 }
0x1cb1   :  { %3302 = vmatprep.subr.bf16.mxu1 %v4552_v61 }
0x1cb4   :  { %3303 = vmatpush1.bf16.msra.mxu1 %v4550_v55 }
0x1cb5   :  { %3304 = vmatprep.subr.bf16.mxu1 %v4555_v56 }
0x1cb8   :  { %3305 = vmatpush1.bf16.msra.mxu1 %v4553_v2 }
0x1cb9   :  { %4348 = vmatprep.subr.bf16.mxu1 %v4806_v4 }
0x1d2e   :  { %v3146_v20 = vpop.xlane.xlu0 %3145 }
0x1d2f   :  { %v3149_v40 = vmul.f32 0.0078125, %v3146_v20 }
0x1d30   :  { %v3148_v15 = vpop.xlane.xlu1 %3147 }
0x1d31   :  { %v3151_v18 = vsub.f32 %v3143_v12, %v3149_v40  ;;  %v3150_v23 = vmul.f32 0.0078125, %v3148_v15  ;;  %v4569_v12 = vld [vmem:[#allocation7 + $0xb0] sm:$0xff]  }
0x1d32   :  { %4058 = vmatpush3.bf16.msra.mxu0 %v4569_v12 }
0x1d33   :  { %v3152_v1 = vsub.f32 %v3144_v45, %v3150_v23  ;;  %v3153_v5 = vmul.f32 %v3151_v18, %v3151_v18  ;;  %v4570_v45 = vld [vmem:[#allocation7 + $0xf8] sm:$0xff]  }
0x1d34   :  { %4059 = vmatprep.subr.bf16.mxu0 %v4570_v45 }
0x1d35   :  { %3155 = vadd.xlane.f32.xlu0 %v3153_v5  ;;  %v3154_v25 = vmul.f32 %v3152_v1, %v3152_v1 }
0x1d36   :  { %4060 = vmatpush3.bf16.msra.mxu0 %v4571_v19 }
0x1d39   :  { %3157 = vadd.xlane.f32.xlu0 %v3154_v25 }
0x1dc2   :  { %v3156_v3 = vpop.xlane.xlu0 %3155 }
0x1dc3   :  { %v3159_v9 = vmul.f32 0.0078125, %v3156_v3 }
0x1dc5   :  { %v3161_v34 = vadd.f32 1e-12, %v3159_v9 }
0x1dc6   :  { %v3158_v21 = vpop.xlane.xlu0 %3157 }
0x1dc7   :  { %4664 = vrsqrt.f32 %v3161_v34  ;;  %v3160_v35 = vmul.f32 0.0078125, %v3158_v21 }
0x1dc9   :  { %v3162_v8 = vadd.f32 1e-12, %v3160_v35 }
0x1dcb   :  { %4666 = vrsqrt.f32 %v3162_v8 }
0x1dd1   :  { %v4665_v37 = vpop.eup %4664 }
0x1dd2   :  { %v3165_v17 = vmul.f32 %v4665_v37, %v3151_v18 }
0x1dd4   :  { %v3171_v50 = vmul.f32 %v3170_v38, %v3165_v17 }
0x1dd5   :  { %v4667_v41 = vpop.eup %4666 }
0x1dd6   :  { %v3166_v48 = vmul.f32 %v4667_v41, %v3152_v1  ;;  %v5536_v53 = vadd.f32 %v3176_v51, %v3171_v50 }
0x1dd8   :  { %v3172_v52 = vmul.f32 %v3170_v38, %v3166_v48 }
0x1dda   :  { %v5538_v54 = vadd.f32 %v3176_v51, %v3172_v52 }
0x1ddc   :  { %v3179_v57 = vpack.c.bf16 %v5538_v54, %v5536_v53 }
0x1dde   :  { %3323 = vmatmul.mubr.bf16.vlgmr.msra.gmra.mrb[84].mxu1 %v3179_v57 }
0x1ddf   :  { %4364 = vmatprep.mubr.msk.bf16.mxu1 %vm4808_vm0, %v4806_v4 }
0x1eb1   :  { %v3324_v20 = vpop.f32.mrb[84].mxu1 }
0x1eb2   :  { %v3325_v40 = vadd.f32 %v3324_v20, %v3203_v14  ;;  %v3326_v15 = vpop.f32.mrb[85].mxu1 }
0x1eb3   :  { %v3327_v18 = vadd.f32 %v3326_v15, %v3207_v31  ;;  %v3328_v23 = vpop.f32.mrb[86].mxu1 }
0x1eb4   :  { %v3333_v1 = vmul.f32 %v3325_v40, %v3325_v40  ;;  %v3329_v5 = vadd.f32 %v3328_v23, %v3203_v14  ;;  %v3330_v25 = vpop.f32.mrb[87].mxu1 }
0x1eb5   :  { %v3334_v27 = vmul.f32 %v3327_v18, %v3327_v18  ;;  %v3331_v29 = vadd.f32 %v3330_v25, %v3207_v31 }
0x1eb6   :  { %v3337_v28 = vmul.f32 %v3333_v1, %v3325_v40  ;;  %v3335_v47 = vmul.f32 %v3329_v5, %v3329_v5 }
0x1eb7   :  { %v3338_v32 = vmul.f32 %v3334_v27, %v3327_v18  ;;  %v3336_v24 = vmul.f32 %v3331_v29, %v3331_v29  ;;  %v4572_v27 = vld [vmem:[#allocation8] sm:$0xff]  }
0x1eb8   :  { %v3341_v33 = vmul.f32 0.044715, %v3337_v28  ;;  %v3339_v30 = vmul.f32 %v3335_v47, %v3329_v5  ;;  %4349 = vmatpush3.bf16.msra.mxu1 %v4572_v27  ;;  %v4576_v28 = vld [vmem:[#allocation8 + $0x20] sm:$0xff]   ;;  %v4577_v47 = vld [vmem:[#allocation8 + $0x28] sm:$0xff]  }
0x1eb9   :  { %v3342_v61 = vmul.f32 0.044715, %v3338_v32  ;;  %v3340_v44 = vmul.f32 %v3336_v24, %v3331_v29  ;;  %4350 = vmatprep.subr.bf16.mxu1 %v4806_v4  ;;  %v4578_v32 = vld [vmem:[#allocation8 + $0x30] sm:$0xff]   ;;  %v4579_v24 = vld [vmem:[#allocation8 + $0x38] sm:$0xff]  }
0x1eba   :  { %v3345_v55 = vadd.f32 %v3341_v33, %v3325_v40  ;;  %v3343_v49 = vmul.f32 0.044715, %v3339_v30 }
0x1ebb   :  { %v3346_v56 = vadd.f32 %v3342_v61, %v3327_v18  ;;  %v3344_v2 = vmul.f32 0.044715, %v3340_v44 }
0x1ebc   :  { %v3349_v3 = vmul.f32 0.7978846, %v3345_v55  ;;  %v3347_v9 = vadd.f32 %v3343_v49, %v3329_v5 }
0x1ebd   :  { %v3350_v34 = vmul.f32 0.7978846, %v3346_v56  ;;  %v3348_v21 = vadd.f32 %v3344_v2, %v3331_v29  ;;  %v3572_v56 = vrot.slane %v5477_v6, %v1846_v16 }
0x1ebe   :  { %4668 = vtanh.f32 %v3349_v3  ;;  %v3351_v35 = vmul.f32 0.7978846, %v3347_v9  ;;  %v3578_v3 = vrot.slane %v5477_v6, %v1852_v22 }
0x1ebf   :  { %4670 = vtanh.f32 %v3350_v34  ;;  %v3352_v8 = vmul.f32 0.7978846, %v3348_v21 }
0x1ec0   :  { %4672 = vtanh.f32 %v3351_v35 }
0x1ec1   :  { %4674 = vtanh.f32 %v3352_v8 }
0x1ec8   :  { %v4669_v37 = vpop.eup %4668 }
0x1ec9   :  { %v4671_v17 = vpop.eup %4670  ;;  %v3357_v38 = vadd.f32 1.0, %v4669_v37 }
0x1eca   :  { %v4673_v41 = vpop.eup %4672  ;;  %v3358_v48 = vadd.f32 1.0, %v4671_v17 }
0x1ecb   :  { %v4675_v50 = vpop.eup %4674  ;;  %v3361_v51 = vmul.f32 0.5, %v3357_v38  ;;  %v3359_v52 = vadd.f32 1.0, %v4673_v41 }
0x1ecc   :  { %v3360_v57 = vadd.f32 1.0, %v4675_v50  ;;  %v3362_v58 = vmul.f32 0.5, %v3358_v48 }
0x1ecd   :  { %v3363_v60 = vmul.f32 0.5, %v3359_v52  ;;  %v3365_v63 = vmul.f32 %v3361_v51, %v3325_v40 }
0x1ece   :  { %v3364_v62 = vmul.f32 0.5, %v3360_v57  ;;  %v3366_v0 = vmul.f32 %v3362_v58, %v3327_v18 }
0x1ecf   :  { %v3367_v59 = vmul.f32 %v3363_v60, %v3329_v5 }
0x1ed0   :  { %v3368_v36 = vmul.f32 %v3364_v62, %v3331_v29  ;;  %v4573_v29 = vld [vmem:[#allocation8 + $0x8] sm:$0xff]  }
0x1ed1   :  { %v3369_v42 = vpack.c.bf16 %v3367_v59, %v3365_v63  ;;  %4351 = vmatpush3.bf16.msra.mxu1 %v4573_v29 }
0x1ed2   :  { %v3370_v46 = vpack.c.bf16 %v3368_v36, %v3366_v0  ;;  %4352 = vmatprep.subr.bf16.mxu1 %v4806_v4 }
0x1ed4   :  { %3536 = vmatprep.mubr.bf16.mxu0 %v3370_v46  ;;  %v3914_v46 = vld [vmem:[%s5592_s10] ss:$0 sm:$0xff] }
0x1ed5   :  { %3537 = vmatmul.mubr.bf16.vlgmr.msra.gmra.mrb[76].mxu0 %v3369_v42 }
0x1fa8   :  { %v4061_v7 = vpop.f32.mrb[76].mxu0 }
0x1fa9   :  { %v4062_v10 = vpop.f32.mrb[77].mxu0 }
0x1faa   :  { %v4063_v13 = vadd.f32 %v4062_v10, %v4061_v7  ;;  %v4064_v12 = vpop.f32.mrb[78].mxu0 }
0x1fab   :  { %v4065_v45 = vpop.f32.mrb[79].mxu0 }
0x1fac   :  { %v3539_v19 = vadd.f32 %v4063_v13, %v3407_v11  ;;  %v4066_v39 = vadd.f32 %v4065_v45, %v4064_v12 }
0x1fae   :  { %v3542_v14 = vadd.f32 %v4066_v39, %v3407_v11  ;;  %v3545_v31 = vadd.f32 %v3539_v19, %v5536_v53  ;;  %v4574_v53 = vld [vmem:[#allocation8 + $0x10] sm:$0xff]  }
0x1faf   :  { %4353 = vmatpush3.bf16.msra.mxu1 %v4574_v53 }
0x1fb0   :  { %3547 = vadd.xlane.f32.xlu0 %v3545_v31  ;;  %v3546_v20 = vadd.f32 %v3542_v14, %v5538_v54  ;;  %4354 = vmatprep.subr.bf16.mxu1 %v4806_v4  ;;  %v4575_v54 = vld [vmem:[#allocation8 + $0x18] sm:$0xff]  }
0x1fb2   :  { %3549 = vadd.xlane.f32.xlu1 %v3546_v20 }
0x1fb3   :  { %4355 = vmatpush3.bf16.msra.mxu1 %v4575_v54 }
0x1fb4   :  { %4356 = vmatprep.subr.bf16.mxu1 %v4806_v4 }
0x1fb7   :  { %4357 = vmatpush3.bf16.msra.mxu1 %v4576_v28 }
0x1fb8   :  { %4358 = vmatprep.subr.bf16.mxu1 %v4806_v4 }
0x1fbb   :  { %4359 = vmatpush3.bf16.msra.mxu1 %v4577_v47 }
0x1fbc   :  { %4360 = vmatprep.subr.bf16.mxu1 %v4806_v4 }
0x1fbf   :  { %4361 = vmatpush3.bf16.msra.mxu1 %v4578_v32 }
0x1fc0   :  { %4362 = vmatprep.subr.bf16.mxu1 %v4806_v4 }
0x1fc3   :  { %4363 = vmatpush3.bf16.msra.mxu1 %v4579_v24 }
0x203d   :  { %v3548_v40 = vpop.xlane.xlu0 %3547 }
0x203e   :  { %v3551_v15 = vmul.f32 0.0078125, %v3548_v40 }
0x203f   :  { %v3550_v18 = vpop.xlane.xlu1 %3549 }
0x2040   :  { %v3553_v23 = vsub.f32 %v3545_v31, %v3551_v15  ;;  %v3552_v1 = vmul.f32 0.0078125, %v3550_v18 }
0x2042   :  { %v3554_v5 = vsub.f32 %v3546_v20, %v3552_v1  ;;  %v3555_v26 = vmul.f32 %v3553_v23, %v3553_v23 }
0x2044   :  { %3557 = vadd.xlane.f32.xlu0 %v3555_v26  ;;  %v3556_v25 = vmul.f32 %v3554_v5, %v3554_v5 }
0x2046   :  { %3559 = vadd.xlane.f32.xlu1 %v3556_v25 }
0x20d1   :  { %v3558_v33 = vpop.xlane.xlu0 %3557 }
0x20d2   :  { %v3561_v30 = vmul.f32 0.0078125, %v3558_v33 }
0x20d3   :  { %v3560_v61 = vpop.xlane.xlu1 %3559 }
0x20d4   :  { %v3563_v44 = vadd.f32 1e-12, %v3561_v30  ;;  %v3562_v55 = vmul.f32 0.0078125, %v3560_v61 }
0x20d6   :  { %4676 = vrsqrt.f32 %v3563_v44  ;;  %v3564_v49 = vadd.f32 1e-12, %v3562_v55 }
0x20d8   :  { %4678 = vrsqrt.f32 %v3564_v49 }
0x20e0   :  { %v4677_v2 = vpop.eup %4676 }
0x20e1   :  { %v3567_v9 = vmul.f32 %v4677_v2, %v3553_v23 }
0x20e2   :  { %v4679_v4 = vpop.eup %4678 }
0x20e3   :  { %v3573_v34 = vmul.f32 %v3572_v56, %v3567_v9  ;;  %v3568_v21 = vmul.f32 %v4679_v4, %v3554_v5 }
0x20e5   :  { %v3579_v35 = vadd.f32 %v3578_v3, %v3573_v34  ;;  %v3574_v8 = vmul.f32 %v3572_v56, %v3568_v21 }
0x20e7   :  { %v3581_v37 = vrot.slane %v3579_v35, 4  ;;  %v3580_v17 = vadd.f32 %v3578_v3, %v3574_v8 }
0x20e9   :  { %v3587_v38 = vrot.slane %v3580_v17, 4  ;;  %v3582_v41 = vadd.f32 %v3581_v37, %v3579_v35 }
0x20eb   :  { %v3583_v48 = vrot.slane %v3582_v41, 2  ;;  %v3588_v50 = vadd.f32 %v3587_v38, %v3580_v17 }
0x20ed   :  { %v3584_v51 = vadd.f32 %v3583_v48, %v3582_v41  ;;  %v3589_v52 = vrot.slane %v3588_v50, 2 }
0x20ef   :  { %v3585_v16 = vrot.slane %v3584_v51, 1  ;;  %v3590_v57 = vadd.f32 %v3589_v52, %v3588_v50 }
0x20f1   :  { %v3586_v58 = vadd.f32 %v3585_v16, %v3584_v51  ;;  %v3591_v43 = vrot.slane %v3590_v57, 1 }
0x20f3   :  { %v3592_v60 = vadd.f32 %v3591_v43, %v3590_v57  ;;  %v3594_v22 = vmul.f32 0.125, %v3586_v58 }
0x20f5   :  { %v3595_v6 = vmul.f32 0.125, %v3592_v60  ;;  %v3596_v62 = vpack.c.bf16 %v3594_v22, %v3594_v22 }
0x20f7   :  { %v3597_v63 = vpack.c.bf16 %v3595_v6, %v3595_v6  ;;  %v3623_v59 = vunpack.c.l.b16 %v3596_v62 }
0x20f9   :  { %v3624_v0 = vunpack.c.l.b16 %v3597_v63 }
0x20fb   :  { %v3626_v36 = vsel %vm3625_vm6, %v3624_v0, %v3623_v59 }
0x20fc   :  { %v3627_v42 = vpack.c.b16 %v3626_v36, %v3626_v36 }
0x20fe   :  { %4365 = vmatmul.mubr.bf16.vlgmr.msra.gmra.mrb[88].mxu1 %v3627_v42 }
0x21d1   :  { %v3711_v7 = vpop.f32.mrb[88].mxu1 }
0x21d2   :  { %v3712_v11 = vadd.f32 %v3914_v46, %v3711_v7  ;;  %v4366_v10 = vpop.f32.mrb[89].mxu1 }
0x21d3   :  { %v3714_v13 = vpop.f32.mrb[90].mxu1 }
0x21d4   :  { %3717 = vst [vmem:[#allocation10] sm:$0x3] %v3712_v11  ;;  %v4367_v12 = vpop.f32.mrb[91].mxu1 }
0x21d5   :  { %4779 = shalt.err (!%p4776_p8)
}
0x21d6   :  { %s4780_s10 = scalar_lea.hbm %s5593_s11, 32 }
0x21d7   :  { %p4781_p9 = scmp.ne.s32.totalorder %s5593_s11, %s4780_s10  ;;  %p4784_p10 = scmp.lt.u32.totalorder %s4780_s10, %s5593_s11 }
0x21d9   :  { %p4786_p11 = pnand %p4784_p10, %p4781_p9 }
0x21db   :  { %4789 = shalt.err (!%p4786_p11)
}
0x21dc   :  { %3727 = dma.vmem_to_hbm [thread:$0]  %s3725_s28, 32, %s5593_s11, [#allocation4]  }
0x21dd   :  { %4796 = dma.done.wait [#allocation4], 32  }
0x21de   :  { %4797 = vsyncadd [#allocation4], 4294967264 }
0x21df   :  { %3731 = vsyncpa [#allocation3], 1 }
0x21e0   :  { %3732 = vsyncpa [#allocation6], 1 }
0x21e1   :  { %3733 = vsyncpa [#allocation9], 1 }
0x21e2   :  { %3734 = vsyncpa [#allocation4], 1 }

</bundles_post_ra>
